<compile_context>
chip_gen: v5e
topology: v5e:2x2
jax: 0.10.0
libtpu: 0.0.40
codegen_flags: <defaults>
</compile_context>

<pallas_src>
import jax
import jax.numpy as jnp
from jax.experimental import pallas as pl
from jax.experimental.pallas import tpu as pltpu

CLIP_DIM = 512
CONVNEXT_DIM = 1024
FUSION_DIM = CLIP_DIM + CONVNEXT_DIM   # 1536
H1 = 512
H2 = 64
H2P = 128                              # layer-2/3 padded to a full lane width
OUT = 1


def _mlp_fusion_kernel(clip_ref, conv_ref, w1a_ref, w1b_ref, b1_ref,
                       w2_ref, b2_ref, w3_ref, b3_ref, o_ref):
    # Activations arrive f32 from HBM; bf16 cast happens here on the VPU
    # (saves a separate XLA cast pass + an extra HBM round trip).
    clip_bf = clip_ref[...].astype(jnp.bfloat16)
    conv_bf = conv_ref[...].astype(jnp.bfloat16)

    # Layer 1: split matmul — the [B, 1536] concat never materializes.
    h1 = jnp.dot(clip_bf, w1a_ref[...], preferred_element_type=jnp.float32)
    h1 = h1 + jnp.dot(conv_bf, w1b_ref[...], preferred_element_type=jnp.float32)
    h1 = jnp.maximum(h1 + b1_ref[...], 0.0)                      # [tb, 512] f32

    # Layer 2: bf16 MXU operands, f32 accumulation. Columns 64..127 are zero
    # padding (zero weights + zero bias -> relu gives exactly 0).
    h2 = jnp.dot(h1.astype(jnp.bfloat16), w2_ref[...],
                 preferred_element_type=jnp.float32)              # [tb, 128]
    h2 = jnp.maximum(h2 + b2_ref[...], 0.0)

    # Layer 3 (out_features == 1): VPU/XLU lane reduction keeps the MXU free.
    # Padded lanes of w3 are zero so they contribute nothing.
    y = jnp.sum(h2 * w3_ref[...], axis=-1) + b3_ref[0]            # [tb]

    # Lane-dense store: (1, tb) block -> unmasked vector stores.
    o_ref[...] = y[None, :].astype(o_ref.dtype)


def prepare_params(params):
    """One-time conversion of nn.Linear-style params into the kernel layout.

    Call this once at model-load time (NOT per forward call): it is the only
    place the f32 weights are read and re-cast.
    """
    w1, b1, w2, b2, w3, b3 = params
    w1 = jnp.asarray(w1, jnp.float32).reshape(FUSION_DIM, H1)
    w2 = jnp.asarray(w2, jnp.float32).reshape(H1, H2)
    w3 = jnp.asarray(w3, jnp.float32).reshape(H2, OUT)

    w1a = w1[:CLIP_DIM].astype(jnp.bfloat16)              # [512, 512]
    w1b = w1[CLIP_DIM:].astype(jnp.bfloat16)               # [1024, 512]
    b1_2d = jnp.asarray(b1, jnp.float32).reshape(1, H1)

    # Zero-pad layer 2/3 to 128 lanes: padded h2 columns are relu(0+0)=0 and
    # the corresponding w3 entries are 0, so the score is unchanged.
    w2p = jnp.zeros((H1, H2P), jnp.bfloat16).at[:, :H2].set(w2.astype(jnp.bfloat16))
    b2p = jnp.zeros((1, H2P), jnp.float32).at[:, :H2].set(
        jnp.asarray(b2, jnp.float32).reshape(1, H2))
    w3p = jnp.zeros((1, H2P), jnp.float32).at[:, :H2].set(w3.reshape(1, H2))
    b3_s = jnp.asarray(b3, jnp.float32).reshape(1)          # scalar, lives in SMEM
    return (w1a, w1b, b1_2d, w2p, b2p, w3p, b3_s)


def _pick_batch_tile(B):
    """Batch tile: multiple of 128, capped at 512 (1024 for very large B),
    and sized so B > 128 yields >= 2 grid steps (v7x has 2 TensorCores)."""
    if B <= 128:
        return B                                  # single full-extent tile
    tb_max = 1024 if B >= 4096 else 512
    half = -(-B // 2)                             # cdiv(B, 2)
    tb = -(-half // 128) * 128                    # round up to multiple of 128
    return min(tb, tb_max)


def art_score_mlp_fusion(clip_feat, conv_feat, prepared_params):
    """Pallas forward of ArtScoreMLP_Fusion.

    clip_feat: [B, 512], conv_feat: [B, 1024] -> [B] f32 scores.
    `prepared_params` must come from prepare_params() (weight prep hoisted
    out of the per-call path).
    """
    w1a, w1b, b1_2d, w2p, b2p, w3p, b3_s = prepared_params
    B = clip_feat.shape[0]

    tb = _pick_batch_tile(B)
    num_tiles = pl.cdiv(B, tb)
    # Output slab width. Inputs are NOT padded: a ragged last tile reads
    # unspecified rows (safe — per-row compute only) which [:B] discards.
    Bp = num_tiles * tb

    flops = 2 * B * (FUSION_DIM * H1 + H1 * H2P + H2P)
    bytes_accessed = (B * FUSION_DIM * 4                     # f32 activations
                      + 2 * (FUSION_DIM * H1 + H1 * H2P)     # bf16 weights
                      + 4 * (H1 + 2 * H2P + 1)               # f32 biases / w3
                      + Bp * 4)                              # f32 output slab

    full = lambda shape: pl.BlockSpec(shape, lambda i: (0,) * len(shape))

    out2d = pl.pallas_call(
        _mlp_fusion_kernel,
        out_shape=jax.ShapeDtypeStruct((1, Bp), jnp.float32),
        grid=(num_tiles,),
        in_specs=[
            pl.BlockSpec((tb, CLIP_DIM), lambda i: (i, 0)),      # clip tile
            pl.BlockSpec((tb, CONVNEXT_DIM), lambda i: (i, 0)),  # conv tile
            full((CLIP_DIM, H1)),                                # w1a
            full((CONVNEXT_DIM, H1)),                            # w1b
            full((1, H1)),                                       # b1
            full((H1, H2P)),                                     # w2 (padded)
            full((1, H2P)),                                      # b2 (padded)
            full((1, H2P)),                                      # w3 row (padded)
            pl.BlockSpec(memory_space=pltpu.MemorySpace.SMEM),   # b3 scalar
        ],
        out_specs=pl.BlockSpec((1, tb), lambda i: (0, i)),
        compiler_params=pltpu.CompilerParams(
            dimension_semantics=("parallel",),
            # v5e's 16 MiB scoped-VMEM default is tight for 512/1024-row f32
            # input tiles; 32 MiB is comfortable on every generation.
            vmem_limit_bytes=(32 * 1024 * 1024 if tb >= 512 else None),
        ),
        cost_estimate=pl.CostEstimate(
            flops=int(flops), transcendentals=0,
            bytes_accessed=int(bytes_accessed)),
    )(clip_feat, conv_feat, w1a, w1b, b1_2d, w2p, b2p, w3p, b3_s)

    return out2d[0, :B]   # .squeeze(-1) semantics -> [B]


def init_params(key):
    """Deterministic synthetic init (shapes match nn.Linear layers, transposed)."""
    k1, k2, k3 = jax.random.split(key, 3)
    s1 = 1.0 / jnp.sqrt(FUSION_DIM)
    s2 = 1.0 / jnp.sqrt(H1)
    s3 = 1.0 / jnp.sqrt(H2)
    w1 = jax.random.uniform(k1, (FUSION_DIM, H1), jnp.float32, -s1, s1)
    b1 = jnp.full((1, H1), 0.01, jnp.float32)
    w2 = jax.random.uniform(k2, (H1, H2), jnp.float32, -s2, s2)
    b2 = jnp.full((1, H2), -0.01, jnp.float32)
    w3 = jax.random.uniform(k3, (H2, OUT), jnp.float32, -s3, s3)
    b3 = jnp.full((1, OUT), 0.02, jnp.float32)
    return (w1, b1, w2, b2, w3, b3)


def _reference(clip_feat, conv_feat, params):
    """Plain-JAX f32 reference mirroring the PyTorch forward."""
    w1, b1, w2, b2, w3, b3 = params
    x = jnp.concatenate([clip_feat, conv_feat], axis=-1)
    h = jnp.maximum(x @ w1 + b1, 0.0)
    h = jnp.maximum(h @ w2 + b2, 0.0)
    return (h @ w3 + b3)[:, 0]


if __name__ == "__main__":
    key = jax.random.PRNGKey(0)
    kp, kc, kv = jax.random.split(key, 3)

    params = init_params(kp)
    prepared = prepare_params(params)          # one-time (model-load) prep

    # Small batch: single-tile path.
    B = 16
    clip_feat = jax.random.normal(kc, (B, CLIP_DIM), jnp.float32)
    conv_feat = jax.random.normal(kv, (B, CONVNEXT_DIM), jnp.float32)
    out = jax.block_until_ready(art_score_mlp_fusion(clip_feat, conv_feat, prepared))
    ref = _reference(clip_feat, conv_feat, params)
    assert out.shape == (B,)
    # bf16 MXU operands with f32 accumulation -> loosened tolerance vs f32 ref.
    assert jnp.allclose(out, ref, atol=5e-2, rtol=5e-2), (out, ref)

    # Ragged multi-tile path: 2 grid steps (v7x megacore sharding) with a
    # partial last tile whose garbage rows are sliced away by the wrapper.
    B2 = 200
    kc2, kv2 = jax.random.split(jax.random.PRNGKey(1))
    clip2 = jax.random.normal(kc2, (B2, CLIP_DIM), jnp.float32)
    conv2 = jax.random.normal(kv2, (B2, CONVNEXT_DIM), jnp.float32)
    out2 = jax.block_until_ready(art_score_mlp_fusion(clip2, conv2, prepared))
    ref2 = _reference(clip2, conv2, params)
    assert out2.shape == (B2,)
    assert jnp.allclose(out2, ref2, atol=5e-2, rtol=5e-2), (out2, ref2)

    print("KERNEL_OK")
</pallas_src>

<mosaic_0001>
module attributes {stable_mosaic.version = 11 : i64} {
  func.func @_mlp_fusion_kernel(%arg0: i32, %arg1: memref<16x512xf32, #tpu.memory_space<vmem>>, %arg2: memref<16x1024xf32, #tpu.memory_space<vmem>>, %arg3: memref<512x512xbf16, #tpu.memory_space<vmem>>, %arg4: memref<1024x512xbf16, #tpu.memory_space<vmem>>, %arg5: memref<1x512xf32, #tpu.memory_space<vmem>>, %arg6: memref<512x128xbf16, #tpu.memory_space<vmem>>, %arg7: memref<1x128xf32, #tpu.memory_space<vmem>>, %arg8: memref<1x128xf32, #tpu.memory_space<vmem>>, %arg9: memref<1xf32, #tpu.memory_space<smem>>, %arg10: memref<1x16xf32, #tpu.memory_space<vmem>>) attributes {dimension_semantics = [#tpu.dimension_semantics<parallel>], iteration_bounds = array<i64: 1>, scalar_prefetch = 0 : i64, scratch_operands = 0 : i64, tpu.core_type = #tpu.core_type<tc>, window_params = [{transform_indices = @transform_0, window_bounds = array<i64: 16, 512>}, {transform_indices = @transform_1, window_bounds = array<i64: 16, 1024>}, {pipeline_mode = #tpu.pipeline_mode<synchronous>, transform_indices = @transform_2, window_bounds = array<i64: 512, 512>}, {pipeline_mode = #tpu.pipeline_mode<synchronous>, transform_indices = @transform_3, window_bounds = array<i64: 1024, 512>}, {pipeline_mode = #tpu.pipeline_mode<synchronous>, transform_indices = @transform_4, window_bounds = array<i64: 1, 512>}, {pipeline_mode = #tpu.pipeline_mode<synchronous>, transform_indices = @transform_5, window_bounds = array<i64: 512, 128>}, {pipeline_mode = #tpu.pipeline_mode<synchronous>, transform_indices = @transform_6, window_bounds = array<i64: 1, 128>}, {pipeline_mode = #tpu.pipeline_mode<synchronous>, transform_indices = @transform_7, window_bounds = array<i64: 1, 128>}, {transform_indices = @transform_8, window_bounds = array<i64: 1>}, {transform_indices = @transform_9, window_bounds = array<i64: 1, 16>}]} {
    %c0 = arith.constant 0 : index
    %c0_0 = arith.constant 0 : index
    %0 = vector.load %arg1[%c0, %c0_0] : memref<16x512xf32, #tpu.memory_space<vmem>>, vector<16x512xf32>
    %1 = arith.truncf %0 : vector<16x512xf32> to vector<16x512xbf16>
    %c0_1 = arith.constant 0 : index
    %c0_2 = arith.constant 0 : index
    %2 = vector.load %arg2[%c0_1, %c0_2] : memref<16x1024xf32, #tpu.memory_space<vmem>>, vector<16x1024xf32>
    %3 = arith.truncf %2 : vector<16x1024xf32> to vector<16x1024xbf16>
    %c0_3 = arith.constant 0 : index
    %c0_4 = arith.constant 0 : index
    %4 = vector.load %arg3[%c0_3, %c0_4] : memref<512x512xbf16, #tpu.memory_space<vmem>>, vector<512x512xbf16>
    %cst = arith.constant dense<0.000000e+00> : vector<16x512xf32>
    %5 = tpu.matmul %1, %4, %cst {dimension_numbers = #tpu.dot_dimension_numbers<[1], [0], [0], [1], [0, 0, 1, 1], [], []>} : vector<16x512xbf16>, vector<512x512xbf16>, vector<16x512xf32> -> vector<16x512xf32>
    %c0_5 = arith.constant 0 : index
    %c0_6 = arith.constant 0 : index
    %6 = vector.load %arg4[%c0_5, %c0_6] : memref<1024x512xbf16, #tpu.memory_space<vmem>>, vector<1024x512xbf16>
    %cst_7 = arith.constant dense<0.000000e+00> : vector<16x512xf32>
    %7 = tpu.matmul %3, %6, %cst_7 {dimension_numbers = #tpu.dot_dimension_numbers<[1], [0], [0], [1], [0, 0, 1, 1], [], []>} : vector<16x1024xbf16>, vector<1024x512xbf16>, vector<16x512xf32> -> vector<16x512xf32>
    %8 = arith.addf %5, %7 : vector<16x512xf32>
    %c0_8 = arith.constant 0 : index
    %c0_9 = arith.constant 0 : index
    %9 = vector.load %arg5[%c0_8, %c0_9] : memref<1x512xf32, #tpu.memory_space<vmem>>, vector<1x512xf32>
    %10 = vector.broadcast %9 : vector<1x512xf32> to vector<16x512xf32>
    %11 = arith.addf %8, %10 : vector<16x512xf32>
    %cst_10 = arith.constant 0.000000e+00 : f32
    %12 = vector.broadcast %cst_10 : f32 to vector<16x512xf32>
    %13 = arith.maximumf %11, %12 : vector<16x512xf32>
    %14 = arith.truncf %13 : vector<16x512xf32> to vector<16x512xbf16>
    %c0_11 = arith.constant 0 : index
    %c0_12 = arith.constant 0 : index
    %15 = vector.load %arg6[%c0_11, %c0_12] : memref<512x128xbf16, #tpu.memory_space<vmem>>, vector<512x128xbf16>
    %cst_13 = arith.constant dense<0.000000e+00> : vector<16x128xf32>
    %16 = tpu.matmul %14, %15, %cst_13 {dimension_numbers = #tpu.dot_dimension_numbers<[1], [0], [0], [1], [0, 0, 1, 1], [], []>} : vector<16x512xbf16>, vector<512x128xbf16>, vector<16x128xf32> -> vector<16x128xf32>
    %c0_14 = arith.constant 0 : index
    %c0_15 = arith.constant 0 : index
    %17 = vector.load %arg7[%c0_14, %c0_15] : memref<1x128xf32, #tpu.memory_space<vmem>>, vector<1x128xf32>
    %18 = vector.broadcast %17 : vector<1x128xf32> to vector<16x128xf32>
    %19 = arith.addf %16, %18 : vector<16x128xf32>
    %cst_16 = arith.constant 0.000000e+00 : f32
    %20 = vector.broadcast %cst_16 : f32 to vector<16x128xf32>
    %21 = arith.maximumf %19, %20 : vector<16x128xf32>
    %c0_17 = arith.constant 0 : index
    %c0_18 = arith.constant 0 : index
    %22 = vector.load %arg8[%c0_17, %c0_18] : memref<1x128xf32, #tpu.memory_space<vmem>>, vector<1x128xf32>
    %23 = vector.broadcast %22 : vector<1x128xf32> to vector<16x128xf32>
    %24 = arith.mulf %21, %23 : vector<16x128xf32>
    %cst_19 = arith.constant dense<0.000000e+00> : vector<16xf32>
    %25 = vector.multi_reduction <add>, %24, %cst_19 [1] : vector<16x128xf32> to vector<16xf32>
    %c0_20 = arith.constant 0 : index
    %26 = memref.load %arg9[%c0_20] : memref<1xf32, #tpu.memory_space<smem>>
    %27 = vector.broadcast %26 : f32 to vector<16xf32>
    %28 = arith.addf %25, %27 : vector<16xf32>
    %29 = vector.shape_cast %28 : vector<16xf32> to vector<1x16xf32>
    %c0_21 = arith.constant 0 : index
    %c0_22 = arith.constant 0 : index
    %30 = vector.load %arg10[%c0_21, %c0_22] : memref<1x16xf32, #tpu.memory_space<vmem>>, vector<1x16xf32>
    tpu.vector_store %arg10[%c0_21, %c0_22], %29 {strides = array<i32>} : memref<1x16xf32, #tpu.memory_space<vmem>>, vector<1x16xf32>,
    return
  }
  func.func @transform_0(%arg0: i32) -> (i32, i32) {
    %c0_i32 = arith.constant 0 : i32
    %c0_i32_0 = arith.constant 0 : i32
    return %arg0, %c0_i32 : i32, i32
  }
  func.func @transform_1(%arg0: i32) -> (i32, i32) {
    %c0_i32 = arith.constant 0 : i32
    %c0_i32_0 = arith.constant 0 : i32
    return %arg0, %c0_i32 : i32, i32
  }
  func.func @transform_2(%arg0: i32) -> (i32, i32) {
    %c0_i32 = arith.constant 0 : i32
    %c0_i32_0 = arith.constant 0 : i32
    %c0_i32_1 = arith.constant 0 : i32
    return %c0_i32, %c0_i32_0 : i32, i32
  }
  func.func @transform_3(%arg0: i32) -> (i32, i32) {
    %c0_i32 = arith.constant 0 : i32
    %c0_i32_0 = arith.constant 0 : i32
    %c0_i32_1 = arith.constant 0 : i32
    return %c0_i32, %c0_i32_0 : i32, i32
  }
  func.func @transform_4(%arg0: i32) -> (i32, i32) {
    %c0_i32 = arith.constant 0 : i32
    %c0_i32_0 = arith.constant 0 : i32
    %c0_i32_1 = arith.constant 0 : i32
    return %c0_i32, %c0_i32_0 : i32, i32
  }
  func.func @transform_5(%arg0: i32) -> (i32, i32) {
    %c0_i32 = arith.constant 0 : i32
    %c0_i32_0 = arith.constant 0 : i32
    %c0_i32_1 = arith.constant 0 : i32
    return %c0_i32, %c0_i32_0 : i32, i32
  }
  func.func @transform_6(%arg0: i32) -> (i32, i32) {
    %c0_i32 = arith.constant 0 : i32
    %c0_i32_0 = arith.constant 0 : i32
    %c0_i32_1 = arith.constant 0 : i32
    return %c0_i32, %c0_i32_0 : i32, i32
  }
  func.func @transform_7(%arg0: i32) -> (i32, i32) {
    %c0_i32 = arith.constant 0 : i32
    %c0_i32_0 = arith.constant 0 : i32
    %c0_i32_1 = arith.constant 0 : i32
    return %c0_i32, %c0_i32_0 : i32, i32
  }
  func.func @transform_8(%arg0: i32) -> i32 {
    %c0_i32 = arith.constant 0 : i32
    %c0_i32_0 = arith.constant 0 : i32
    return %c0_i32 : i32
  }
  func.func @transform_9(%arg0: i32) -> (i32, i32) {
    %c0_i32 = arith.constant 0 : i32
    %c0_i32_0 = arith.constant 0 : i32
    return %c0_i32, %arg0 : i32, i32
  }
}

</mosaic_0001>

<bundles_post_ra>
// kernel: tpu_custom_call.1
= control target key start
LH: loop header
LB: loop body
LE: loop exit
PB: predicated region body
PF: predicated region fallthrough
CT: control target
= control target key end

     0   :  { %15 = vsyncpa [#allocation4], 0  ;;  %s5977_s0 = inlined_call_operand.hbm [shape: f32[16,512], index: 0, kind: input, shape index: {}]   ;;  %s5978_s1 = inlined_call_operand.hbm [shape: f32[16,1024], index: 1, kind: input, shape index: {}]   ;;  %s5979_s2 = inlined_call_operand.hbm [shape: bf16[512,512], index: 2, kind: input, shape index: {}]   ;;  %s5980_s3 = inlined_call_operand.hbm [shape: bf16[1024,512], index: 3, kind: input, shape index: {}]   ;;  %s5981_s4 = inlined_call_operand.vmem [shape: f32[1,512], index: 4, kind: input, shape index: {}]   ;;  %s5982_s5 = inlined_call_operand.hbm [shape: bf16[512,128], index: 5, kind: input, shape index: {}]   ;;  %s5983_s6 = inlined_call_operand.vmem [shape: f32[1,128], index: 6, kind: input, shape index: {}]   ;;  %s5984_s7 = inlined_call_operand.vmem [shape: f32[1,128], index: 7, kind: input, shape index: {}]   ;;  %s5985_s8 = inlined_call_operand.<no memory space> [shape: f32[1], index: 8, kind: input, shape index: {}]   ;;  %s5986_s9 = inlined_call_operand.hbm [shape: f32[1,16], index: 9, kind: output, shape index: {}]  }
   0x1   :  { %16 = vsyncpa [#allocation7], 0 }
   0x2   :  { %17 = vsyncpa [#allocation10], 0  ;;  %s36_s11 = sshll.u32 %s5978_s1, 4  ;;  %s37_s11 = int_to_ptr.hbm [resolvable:$true] %s36_s11 }
   0x3   :  { %18 = vsyncpa [#allocation5], 0  ;;  %s5764_s12 = smov [#allocation6]   ;;  %s5765_s14 = smov 1024  }
   0x4   :  { %s38_s13 = sshll.u32 %s5764_s12, 4  ;;  %s5766_s15 = smov 64   ;;  %s39_s13 = int_to_ptr.vmem [resolvable:$true] %s38_s13 }
   0x5   :  { %44 = dma.hbm_to_vmem [thread:$0]  %s37_s11, 2048, %s39_s13, [#allocation7], %s5765_s14, %s5765_s14, %s5766_s15  }
   0x6   :  { %s62_s18 = sshll.u32 %s5980_s3, 4  ;;  %s5767_s19 = smov [#allocation9]   ;;  %s63_s18 = int_to_ptr.hbm [resolvable:$true] %s62_s18 }
   0x7   :  { %s64_s20 = sshll.u32 %s5767_s19, 4  ;;  %s23_s1 = sshll.u32 %s5977_s0, 4  ;;  %s65_s20 = int_to_ptr.vmem [resolvable:$true] %s64_s20  ;;  %s24_s1 = int_to_ptr.hbm [resolvable:$true] %s23_s1 }
   0x8   :  { %s5768_s23 = smov 256   ;;  %s5769_s24 = smov 16  }
   0x9   :  { %70 = dma.hbm_to_vmem [thread:$0]  %s63_s18, 32768, %s65_s20, [#allocation10], %s5768_s23, %s5768_s23, %s5769_s24  }
   0xa   :  { %s5770_s25 = smov [#allocation3]   ;;  %s49_s29 = sshll.u32 %s5979_s2, 4  ;;  %s50_s29 = int_to_ptr.hbm [resolvable:$true] %s49_s29 }
   0xb   :  { %s25_s26 = sshll.u32 %s5770_s25, 4  ;;  %s5771_s3 = smov 512   ;;  %s26_s26 = int_to_ptr.vmem [resolvable:$true] %s25_s26 }
   0xc   :  { %s5772_s30 = smov 32   ;;  %s5773_s10 = smov [#allocation8]  }
   0xd   :  { %31 = dma.hbm_to_vmem [thread:$0]  %s24_s1, 1024, %s26_s26, [#allocation4], %s5771_s3, %s5771_s3, %s5772_s30  }
   0xe   :  { %s51_s11 = sshll.u32 %s5773_s10, 4  ;;  %s77_s13 = sshll.u32 %s5982_s5, 4  ;;  %s52_s11 = int_to_ptr.vmem [resolvable:$true] %s51_s11  ;;  %s78_s13 = int_to_ptr.hbm [resolvable:$true] %s77_s13 }
   0xf   :  { %57 = dma.hbm_to_vmem [thread:$0]  %s50_s29, 16384, %s52_s11, [#allocation7], %s5768_s23, %s5768_s23, %s5769_s24  }
  0x10   :  { %s5774_s14 = smov [#allocation11]   ;;  %s5775_s17 = smov 4  }
  0x11   :  { %s79_s16 = sshll.u32 %s5774_s14, 4  ;;  %s80_s16 = int_to_ptr.vmem [resolvable:$true] %s79_s16 }
  0x12   :  { %85 = dma.hbm_to_vmem [thread:$0]  %s78_s13, 4096, %s80_s16, [#allocation10], %s5766_s15, %s5766_s15, %s5775_s17  }
  0x13   :  { %5756 = dma.done.wait [#allocation4], 1024  }
  0x14   :  { %5757 = vsyncadd [#allocation4], 4294966272 }
  0x15   :  { %5758 = dma.done.wait [#allocation7], 18432  }
  0x16   :  { %5759 = vsyncadd [#allocation7], 4294948864 }
  0x17   :  { %5760 = dma.done.wait [#allocation10], 36864  }
  0x18   :  { %5761 = vsyncadd [#allocation10], 4294930432  ;;  %v3631_v0 = vld [vmem:[#allocation9 + $0xe0] sm:$0xf]  ;;  %v5339_v1 = vld [vmem:[#allocation9 + $0xec] sm:$0xf0] }
  0x19   :  { %v3759_v2 = vld [vmem:[#allocation9 + $0x1e0] sm:$0xf]  ;;  %v3632_v3 = vor.u32 %v5339_v1, %v3631_v0  ;;  %v5371_v4 = vld [vmem:[#allocation9 + $0x1ec] sm:$0xf0]  ;;  %s3505_s23 = sshll.u32 %s5986_s9, 4  ;;  %vm3493_vm0 = vcmask 130112   ;;  %s3506_s23 = int_to_ptr.hbm [resolvable:$true] %s3505_s23 }
  0x1a   :  { %v3887_v5 = vld [vmem:[#allocation9 + $0x2e0] sm:$0xf]  ;;  %v5403_v6 = vld [vmem:[#allocation9 + $0x2ec] sm:$0xf0]  ;;  %v3760_v7 = vor.u32 %v5371_v4, %v3759_v2  ;;  %vm3496_vm1 = vcmask 122880  }
  0x1b   :  { %v3888_v8 = vor.u32 %v5403_v6, %v3887_v5  ;;  %v4015_v9 = vld [vmem:[#allocation9 + $0x3e0] sm:$0xf]  ;;  %v5435_v10 = vld [vmem:[#allocation9 + $0x3ec] sm:$0xf0]  ;;  %1812 = vmatpush.bf16.msra.mxu0 %v3632_v3 }
  0x1c   :  { %v3615_v11 = vld [vmem:[#allocation9 + $0xc0] sm:$0xf]  ;;  %v4016_v12 = vor.u32 %v5435_v10, %v4015_v9  ;;  %v5335_v13 = vld [vmem:[#allocation9 + $0xcc] sm:$0xf0]  ;;  %1826 = vmatpush.bf16.msra.mxu1 %v3760_v7 }
  0x1d   :  { %v3743_v14 = vld [vmem:[#allocation9 + $0x1c0] sm:$0xf]  ;;  %v5367_v15 = vld [vmem:[#allocation9 + $0x1cc] sm:$0xf0]  ;;  %1840 = vmatpush.bf16.msra.mxu2 %v3888_v8  ;;  %v3616_v16 = vor.u32 %v5335_v13, %v3615_v11 }
  0x1e   :  { %v3744_v17 = vor.u32 %v5367_v15, %v3743_v14  ;;  %v3871_v18 = vld [vmem:[#allocation9 + $0x2c0] sm:$0xf]  ;;  %v5399_v19 = vld [vmem:[#allocation9 + $0x2cc] sm:$0xf0]  ;;  %1854 = vmatpush.bf16.msra.mxu3 %v4016_v12 }
  0x1f   :  { %v3999_v20 = vld [vmem:[#allocation9 + $0x3c0] sm:$0xf]  ;;  %v3872_v21 = vor.u32 %v5399_v19, %v3871_v18  ;;  %v5431_v22 = vld [vmem:[#allocation9 + $0x3cc] sm:$0xf0]  ;;  %1813 = vmatpush.bf16.msra.mxu0 %v3616_v16 }
  0x20   :  { %v3599_v23 = vld [vmem:[#allocation9 + $0xa0] sm:$0xf]  ;;  %v5331_v24 = vld [vmem:[#allocation9 + $0xac] sm:$0xf0]  ;;  %v4000_v25 = vor.u32 %v5431_v22, %v3999_v20  ;;  %1827 = vmatpush.bf16.msra.mxu1 %v3744_v17 }
  0x21   :  { %v3727_v26 = vld [vmem:[#allocation9 + $0x1a0] sm:$0xf]  ;;  %v5363_v27 = vld [vmem:[#allocation9 + $0x1ac] sm:$0xf0]  ;;  %v3600_v29 = vor.u32 %v5331_v24, %v3599_v23  ;;  %1841 = vmatpush.bf16.msra.mxu2 %v3872_v21 }
  0x22   :  { %v3855_v28 = vld [vmem:[#allocation9 + $0x2a0] sm:$0xf]  ;;  %v5395_v30 = vld [vmem:[#allocation9 + $0x2ac] sm:$0xf0]  ;;  %v3728_v33 = vor.u32 %v5363_v27, %v3727_v26  ;;  %1855 = vmatpush.bf16.msra.mxu3 %v4000_v25 }
  0x23   :  { %v3983_v31 = vld [vmem:[#allocation9 + $0x3a0] sm:$0xf]  ;;  %v5427_v32 = vld [vmem:[#allocation9 + $0x3ac] sm:$0xf0]  ;;  %v3856_v34 = vor.u32 %v5395_v30, %v3855_v28  ;;  %1814 = vmatpush.bf16.msra.mxu0 %v3600_v29 }
  0x24   :  { %v3583_v35 = vld [vmem:[#allocation9 + $0x80] sm:$0xf]  ;;  %v5327_v36 = vld [vmem:[#allocation9 + $0x8c] sm:$0xf0]  ;;  %v3984_v38 = vor.u32 %v5427_v32, %v3983_v31  ;;  %1828 = vmatpush.bf16.msra.mxu1 %v3728_v33 }
  0x25   :  { %v3711_v37 = vld [vmem:[#allocation9 + $0x180] sm:$0xf]  ;;  %v5359_v39 = vld [vmem:[#allocation9 + $0x18c] sm:$0xf0]  ;;  %v3584_v44 = vor.u32 %v5327_v36, %v3583_v35  ;;  %1842 = vmatpush.bf16.msra.mxu2 %v3856_v34 }
  0x26   :  { %v3839_v40 = vld [vmem:[#allocation9 + $0x280] sm:$0xf]  ;;  %v5391_v41 = vld [vmem:[#allocation9 + $0x28c] sm:$0xf0]  ;;  %v3712_v45 = vor.u32 %v5359_v39, %v3711_v37  ;;  %1856 = vmatpush.bf16.msra.mxu3 %v3984_v38 }
  0x27   :  { %v3967_v42 = vld [vmem:[#allocation9 + $0x380] sm:$0xf]  ;;  %v5423_v43 = vld [vmem:[#allocation9 + $0x38c] sm:$0xf0]  ;;  %v3840_v46 = vor.u32 %v5391_v41, %v3839_v40  ;;  %1815 = vmatpush.bf16.msra.mxu0 %v3584_v44 }
  0x28   :  { %v3567_v47 = vld [vmem:[#allocation9 + $0x60] sm:$0xf]  ;;  %v5323_v48 = vld [vmem:[#allocation9 + $0x6c] sm:$0xf0]  ;;  %v3968_v50 = vor.u32 %v5423_v43, %v3967_v42  ;;  %1829 = vmatpush.bf16.msra.mxu1 %v3712_v45 }
  0x29   :  { %v3695_v49 = vld [vmem:[#allocation9 + $0x160] sm:$0xf]  ;;  %v5355_v51 = vld [vmem:[#allocation9 + $0x16c] sm:$0xf0]  ;;  %v3568_v56 = vor.u32 %v5323_v48, %v3567_v47  ;;  %1843 = vmatpush.bf16.msra.mxu2 %v3840_v46 }
  0x2a   :  { %v3823_v52 = vld [vmem:[#allocation9 + $0x260] sm:$0xf]  ;;  %v5387_v53 = vld [vmem:[#allocation9 + $0x26c] sm:$0xf0]  ;;  %v3696_v57 = vor.u32 %v5355_v51, %v3695_v49  ;;  %1857 = vmatpush.bf16.msra.mxu3 %v3968_v50 }
  0x2b   :  { %v3951_v54 = vld [vmem:[#allocation9 + $0x360] sm:$0xf]  ;;  %v5419_v55 = vld [vmem:[#allocation9 + $0x36c] sm:$0xf0]  ;;  %v3824_v58 = vor.u32 %v5387_v53, %v3823_v52  ;;  %1816 = vmatpush.bf16.msra.mxu0 %v3568_v56 }
  0x2c   :  { %v3551_v59 = vld [vmem:[#allocation9 + $0x40] sm:$0xf]  ;;  %v5319_v60 = vld [vmem:[#allocation9 + $0x4c] sm:$0xf0]  ;;  %v3952_v62 = vor.u32 %v5419_v55, %v3951_v54  ;;  %1830 = vmatpush.bf16.msra.mxu1 %v3696_v57 }
  0x2d   :  { %v3679_v61 = vld [vmem:[#allocation9 + $0x140] sm:$0xf]  ;;  %v5351_v63 = vld [vmem:[#allocation9 + $0x14c] sm:$0xf0]  ;;  %v3552_v4 = vor.u32 %v5319_v60, %v3551_v59  ;;  %1844 = vmatpush.bf16.msra.mxu2 %v3824_v58 }
  0x2e   :  { %v3807_v0 = vld [vmem:[#allocation9 + $0x240] sm:$0xf]  ;;  %v5383_v1 = vld [vmem:[#allocation9 + $0x24c] sm:$0xf0]  ;;  %v3680_v5 = vor.u32 %v5351_v63, %v3679_v61  ;;  %1858 = vmatpush.bf16.msra.mxu3 %v3952_v62 }
  0x2f   :  { %v3935_v2 = vld [vmem:[#allocation9 + $0x340] sm:$0xf]  ;;  %v5415_v3 = vld [vmem:[#allocation9 + $0x34c] sm:$0xf0]  ;;  %v3808_v6 = vor.u32 %v5383_v1, %v3807_v0  ;;  %1817 = vmatpush.bf16.msra.mxu0 %v3552_v4 }
  0x30   :  { %v3535_v7 = vld [vmem:[#allocation9 + $0x20] sm:$0xf]  ;;  %v5315_v8 = vld [vmem:[#allocation9 + $0x2c] sm:$0xf0]  ;;  %v3936_v10 = vor.u32 %v5415_v3, %v3935_v2  ;;  %1831 = vmatpush.bf16.msra.mxu1 %v3680_v5 }
  0x31   :  { %v3663_v9 = vld [vmem:[#allocation9 + $0x120] sm:$0xf]  ;;  %v5347_v11 = vld [vmem:[#allocation9 + $0x12c] sm:$0xf0]  ;;  %v3536_v16 = vor.u32 %v5315_v8, %v3535_v7  ;;  %1845 = vmatpush.bf16.msra.mxu2 %v3808_v6  ;;  %v125_v6 = vld [vmem:[#allocation6 + $0x8] sm:$0xff] }
  0x32   :  { %v3791_v12 = vld [vmem:[#allocation9 + $0x220] sm:$0xf]  ;;  %v5379_v13 = vld [vmem:[#allocation9 + $0x22c] sm:$0xf0]  ;;  %v3664_v19 = vor.u32 %v5347_v11, %v3663_v9  ;;  %1859 = vmatpush.bf16.msra.mxu3 %v3936_v10  ;;  %v133_v7 = vld [vmem:[#allocation6 + $0x48] sm:$0xff] }
  0x33   :  { %v3919_v14 = vld [vmem:[#allocation9 + $0x320] sm:$0xf]  ;;  %v5411_v15 = vld [vmem:[#allocation9 + $0x32c] sm:$0xf0]  ;;  %v3792_v20 = vor.u32 %v5379_v13, %v3791_v12  ;;  %1818 = vmatpush.bf16.msra.mxu0 %v3536_v16  ;;  %v127_v8 = vld [vmem:[#allocation6 + $0x18] sm:$0xff]  ;;  %v5851_v10 = vpack.c.bf16 %v133_v7, %v125_v6 }
  0x34   :  { %v3519_v17 = vld [vmem:[#allocation9] sm:$0xf]  ;;  %v5311_v18 = vld [vmem:[#allocation9 + $0xc] sm:$0xf0]  ;;  %v3920_v24 = vor.u32 %v5411_v15, %v3919_v14  ;;  %1832 = vmatpush.bf16.msra.mxu1 %v3664_v19  ;;  %v135_v11 = vld [vmem:[#allocation6 + $0x58] sm:$0xff] }
  0x35   :  { %v3647_v21 = vld [vmem:[#allocation9 + $0x100] sm:$0xf]  ;;  %v5343_v22 = vld [vmem:[#allocation9 + $0x10c] sm:$0xf0]  ;;  %v3520_v31 = vor.u32 %v5311_v18, %v3519_v17  ;;  %1846 = vmatpush.bf16.msra.mxu2 %v3792_v20  ;;  %v5853_v17 = vpack.c.bf16 %v135_v11, %v127_v8 }
  0x36   :  { %v3775_v23 = vld [vmem:[#allocation9 + $0x200] sm:$0xf]  ;;  %v5375_v25 = vld [vmem:[#allocation9 + $0x20c] sm:$0xf0]  ;;  %v3648_v35 = vor.u32 %v5343_v22, %v3647_v21  ;;  %1860 = vmatpush.bf16.msra.mxu3 %v3920_v24 }
  0x37   :  { %v3903_v26 = vld [vmem:[#allocation9 + $0x300] sm:$0xf]  ;;  %v5407_v27 = vld [vmem:[#allocation9 + $0x30c] sm:$0xf0]  ;;  %v3776_v36 = vor.u32 %v5375_v25, %v3775_v23  ;;  %1819 = vmatpush.bf16.msra.mxu0 %v3520_v31 }
  0x38   :  { %v4143_v28 = vld [vmem:[#allocation9 + $0x4e0] sm:$0xf]  ;;  %v5467_v29 = vld [vmem:[#allocation9 + $0x4ec] sm:$0xf0]  ;;  %v3904_v39 = vor.u32 %v5407_v27, %v3903_v26  ;;  %1833 = vmatpush.bf16.msra.mxu1 %v3648_v35 }
  0x39   :  { %v4271_v30 = vld [vmem:[#allocation9 + $0x5e0] sm:$0xf]  ;;  %v5499_v32 = vld [vmem:[#allocation9 + $0x5ec] sm:$0xf0]  ;;  %v4144_v40 = vor.u32 %v5467_v29, %v4143_v28  ;;  %1847 = vmatpush.bf16.msra.mxu2 %v3776_v36 }
  0x3a   :  { %v4399_v33 = vld [vmem:[#allocation9 + $0x6e0] sm:$0xf]  ;;  %v5531_v34 = vld [vmem:[#allocation9 + $0x6ec] sm:$0xf0]  ;;  %v4272_v43 = vor.u32 %v5499_v32, %v4271_v30  ;;  %1861 = vmatpush.bf16.msra.mxu3 %v3904_v39 }
  0x3b   :  { %v4527_v37 = vld [vmem:[#allocation9 + $0x7e0] sm:$0xf]  ;;  %v5563_v38 = vld [vmem:[#allocation9 + $0x7ec] sm:$0xf0]  ;;  %v4400_v44 = vor.u32 %v5531_v34, %v4399_v33  ;;  %1868 = vmatpush.bf16.msrb.mxu0 %v4144_v40  ;;  %1834 = vmatmul.bf16.vlgmr.msra.gmra.mxu1 %v5851_v10 }
  0x3c   :  { %v4127_v41 = vld [vmem:[#allocation9 + $0x4c0] sm:$0xf]  ;;  %v5463_v42 = vld [vmem:[#allocation9 + $0x4cc] sm:$0xf0]  ;;  %v4528_v48 = vor.u32 %v5563_v38, %v4527_v37  ;;  %1882 = vmatpush.bf16.msrb.mxu1 %v4272_v43 }
  0x3d   :  { %v4255_v45 = vld [vmem:[#allocation9 + $0x5c0] sm:$0xf]  ;;  %v5495_v46 = vld [vmem:[#allocation9 + $0x5cc] sm:$0xf0]  ;;  %v4128_v55 = vor.u32 %v5463_v42, %v4127_v41  ;;  %1896 = vmatpush.bf16.msrb.mxu2 %v4400_v44  ;;  %1862 = vmatmul.bf16.vlgmr.msra.gmra.mxu3 %v5853_v17 }
  0x3e   :  { %v4383_v47 = vld [vmem:[#allocation9 + $0x6c0] sm:$0xf]  ;;  %v5527_v49 = vld [vmem:[#allocation9 + $0x6cc] sm:$0xf0]  ;;  %v4256_v60 = vor.u32 %v5495_v46, %v4255_v45  ;;  %1910 = vmatpush.bf16.msrb.mxu3 %v4528_v48 }
  0x3f   :  { %v4511_v50 = vld [vmem:[#allocation9 + $0x7c0] sm:$0xf]  ;;  %v5559_v51 = vld [vmem:[#allocation9 + $0x7cc] sm:$0xf0]  ;;  %v4384_v61 = vor.u32 %v5527_v49, %v4383_v47  ;;  %1869 = vmatpush.bf16.msrb.mxu0 %v4128_v55 }
  0x40   :  { %v124_v52 = vld [vmem:[#allocation6] sm:$0xff]  ;;  %v126_v54 = vld [vmem:[#allocation6 + $0x10] sm:$0xff]  ;;  %v4512_v2 = vor.u32 %v5559_v51, %v4511_v50  ;;  %1883 = vmatpush.bf16.msrb.mxu1 %v4256_v60 }
  0x41   :  { %v132_v53 = vld [vmem:[#allocation6 + $0x40] sm:$0xff]  ;;  %v5459_v57 = vld [vmem:[#allocation9 + $0x4ac] sm:$0xf0]  ;;  %1897 = vmatpush.bf16.msrb.mxu2 %v4384_v61 }
  0x42   :  { %v4111_v56 = vld [vmem:[#allocation9 + $0x4a0] sm:$0xf]  ;;  %v5845_v58 = vpack.c.bf16 %v132_v53, %v124_v52  ;;  %v134_v59 = vld [vmem:[#allocation6 + $0x50] sm:$0xff]  ;;  %1911 = vmatpush.bf16.msrb.mxu3 %v4512_v2 }
  0x43   :  { %v4239_v62 = vld [vmem:[#allocation9 + $0x5a0] sm:$0xf]  ;;  %v5491_v63 = vld [vmem:[#allocation9 + $0x5ac] sm:$0xf0]  ;;  %v5847_v1 = vpack.c.bf16 %v134_v59, %v126_v54  ;;  %v4112_v9 = vor.u32 %v5459_v57, %v4111_v56 }
  0x44   :  { %v4367_v0 = vld [vmem:[#allocation9 + $0x6a0] sm:$0xf]  ;;  %v5523_v3 = vld [vmem:[#allocation9 + $0x6ac] sm:$0xf0]  ;;  %1820 = vmatmul.bf16.vlgmr.msra.gmra.mxu0 %v5845_v58  ;;  %v4240_v12 = vor.u32 %v5491_v63, %v4239_v62 }
  0x45   :  { %v4495_v4 = vld [vmem:[#allocation9 + $0x7a0] sm:$0xf]  ;;  %v5555_v5 = vld [vmem:[#allocation9 + $0x7ac] sm:$0xf0]  ;;  %1848 = vmatmul.bf16.vlgmr.msra.gmra.mxu2 %v5847_v1  ;;  %v4368_v13 = vor.u32 %v5523_v3, %v4367_v0  ;;  %1870 = vmatpush.bf16.msrb.mxu0 %v4112_v9  ;;  %v5337_v9 = vld [vmem:[#allocation9 + $0xe4] sm:$0xf] }
  0x46   :  { %v4095_v14 = vld [vmem:[#allocation9 + $0x480] sm:$0xf]  ;;  %v5455_v15 = vld [vmem:[#allocation9 + $0x48c] sm:$0xf0]  ;;  %v4496_v18 = vor.u32 %v5555_v5, %v4495_v4  ;;  %1884 = vmatpush.bf16.msrb.mxu1 %v4240_v12  ;;  %v3633_v12 = vld [vmem:[#allocation9 + $0xf0] sm:$0xf0] }
  0x47   :  { %v4223_v16 = vld [vmem:[#allocation9 + $0x580] sm:$0xf]  ;;  %v5487_v19 = vld [vmem:[#allocation9 + $0x58c] sm:$0xf0]  ;;  %v4096_v24 = vor.u32 %v5455_v15, %v4095_v14  ;;  %1898 = vmatpush.bf16.msrb.mxu2 %v4368_v13  ;;  %v5369_v13 = vld [vmem:[#allocation9 + $0x1e4] sm:$0xf] }
  0x48   :  { %v4351_v20 = vld [vmem:[#allocation9 + $0x680] sm:$0xf]  ;;  %v5519_v21 = vld [vmem:[#allocation9 + $0x68c] sm:$0xf0]  ;;  %v4224_v25 = vor.u32 %v5487_v19, %v4223_v16  ;;  %1912 = vmatpush.bf16.msrb.mxu3 %v4496_v18  ;;  %v3761_v14 = vld [vmem:[#allocation9 + $0x1f0] sm:$0xf0] }
  0x49   :  { %v4479_v22 = vld [vmem:[#allocation9 + $0x780] sm:$0xf]  ;;  %v5551_v23 = vld [vmem:[#allocation9 + $0x78c] sm:$0xf0]  ;;  %v4352_v26 = vor.u32 %v5519_v21, %v4351_v20  ;;  %1871 = vmatpush.bf16.msrb.mxu0 %v4096_v24  ;;  %v5401_v15 = vld [vmem:[#allocation9 + $0x2e4] sm:$0xf] }
  0x4a   :  { %v4079_v27 = vld [vmem:[#allocation9 + $0x460] sm:$0xf]  ;;  %v5451_v28 = vld [vmem:[#allocation9 + $0x46c] sm:$0xf0]  ;;  %v4480_v30 = vor.u32 %v5551_v23, %v4479_v22  ;;  %1885 = vmatpush.bf16.msrb.mxu1 %v4224_v25  ;;  %v3889_v16 = vld [vmem:[#allocation9 + $0x2f0] sm:$0xf0] }
  0x4b   :  { %v4207_v29 = vld [vmem:[#allocation9 + $0x560] sm:$0xf]  ;;  %v5483_v31 = vld [vmem:[#allocation9 + $0x56c] sm:$0xf0]  ;;  %v4080_v36 = vor.u32 %v5451_v28, %v4079_v27  ;;  %1899 = vmatpush.bf16.msrb.mxu2 %v4352_v26  ;;  %v5433_v18 = vld [vmem:[#allocation9 + $0x3e4] sm:$0xf] }
  0x4c   :  { %v4335_v32 = vld [vmem:[#allocation9 + $0x660] sm:$0xf]  ;;  %v5515_v33 = vld [vmem:[#allocation9 + $0x66c] sm:$0xf0]  ;;  %v4208_v37 = vor.u32 %v5483_v31, %v4207_v29  ;;  %1913 = vmatpush.bf16.msrb.mxu3 %v4480_v30  ;;  %v4017_v20 = vld [vmem:[#allocation9 + $0x3f0] sm:$0xf0]  ;;  %v3636_v29 = vor.u32 %v5337_v9, %v3633_v12 }
  0x4d   :  { %v4463_v34 = vld [vmem:[#allocation9 + $0x760] sm:$0xf]  ;;  %v5547_v35 = vld [vmem:[#allocation9 + $0x76c] sm:$0xf0]  ;;  %v4336_v38 = vor.u32 %v5515_v33, %v4335_v32  ;;  %1872 = vmatpush.bf16.msrb.mxu0 %v4080_v36  ;;  %v129_v27 = vld [vmem:[#allocation6 + $0x28] sm:$0xff]  ;;  %v3764_v33 = vor.u32 %v5369_v13, %v3761_v14 }
  0x4e   :  { %v4063_v39 = vld [vmem:[#allocation9 + $0x440] sm:$0xf]  ;;  %v5447_v40 = vld [vmem:[#allocation9 + $0x44c] sm:$0xf0]  ;;  %v4464_v42 = vor.u32 %v5547_v35, %v4463_v34  ;;  %1886 = vmatpush.bf16.msrb.mxu1 %v4208_v37  ;;  %v137_v30 = vld [vmem:[#allocation6 + $0x68] sm:$0xff]  ;;  %v3892_v34 = vor.u32 %v5401_v15, %v3889_v16 }
  0x4f   :  { %v4191_v41 = vld [vmem:[#allocation9 + $0x540] sm:$0xf]  ;;  %v5479_v43 = vld [vmem:[#allocation9 + $0x54c] sm:$0xf0]  ;;  %v4064_v48 = vor.u32 %v5447_v40, %v4063_v39  ;;  %1900 = vmatpush.bf16.msrb.mxu2 %v4336_v38  ;;  %v131_v31 = vld [vmem:[#allocation6 + $0x38] sm:$0xff]  ;;  %v4020_v38 = vor.u32 %v5433_v18, %v4017_v20 }
  0x50   :  { %v4319_v44 = vld [vmem:[#allocation9 + $0x640] sm:$0xf]  ;;  %v5511_v45 = vld [vmem:[#allocation9 + $0x64c] sm:$0xf0]  ;;  %v4192_v50 = vor.u32 %v5479_v43, %v4191_v41  ;;  %1914 = vmatpush.bf16.msrb.mxu3 %v4464_v42  ;;  %v139_v32 = vld [vmem:[#allocation6 + $0x78] sm:$0xff] }
  0x51   :  { %v4447_v46 = vld [vmem:[#allocation9 + $0x740] sm:$0xf]  ;;  %v5543_v47 = vld [vmem:[#allocation9 + $0x74c] sm:$0xf0]  ;;  %v4320_v51 = vor.u32 %v5511_v45, %v4319_v44  ;;  %1873 = vmatpush.bf16.msrb.mxu0 %v4064_v48  ;;  %v5333_v35 = vld [vmem:[#allocation9 + $0xc4] sm:$0xf]  ;;  %v5861_v44 = vpack.c.bf16 %v137_v30, %v129_v27 }
  0x52   :  { %v4047_v49 = vld [vmem:[#allocation9 + $0x420] sm:$0xf]  ;;  %v5443_v52 = vld [vmem:[#allocation9 + $0x42c] sm:$0xf0]  ;;  %v4448_v55 = vor.u32 %v5543_v47, %v4447_v46  ;;  %1887 = vmatpush.bf16.msrb.mxu1 %v4192_v50  ;;  %v3617_v36 = vld [vmem:[#allocation9 + $0xd0] sm:$0xf0]  ;;  %v5863_v47 = vpack.c.bf16 %v139_v32, %v131_v31 }
  0x53   :  { %v4175_v53 = vld [vmem:[#allocation9 + $0x520] sm:$0xf]  ;;  %v5475_v54 = vld [vmem:[#allocation9 + $0x52c] sm:$0xf0]  ;;  %v4048_v63 = vor.u32 %v5443_v52, %v4047_v49  ;;  %1901 = vmatpush.bf16.msrb.mxu2 %v4320_v51  ;;  %v5365_v37 = vld [vmem:[#allocation9 + $0x1c4] sm:$0xf]  ;;  %v3620_v48 = vor.u32 %v5333_v35, %v3617_v36 }
  0x54   :  { %v4303_v56 = vld [vmem:[#allocation9 + $0x620] sm:$0xf]  ;;  %v5507_v57 = vld [vmem:[#allocation9 + $0x62c] sm:$0xf0]  ;;  %v4176_v5 = vor.u32 %v5475_v54, %v4175_v53  ;;  %1915 = vmatpush.bf16.msrb.mxu3 %v4448_v55  ;;  %v3745_v40 = vld [vmem:[#allocation9 + $0x1d0] sm:$0xf0] }
  0x55   :  { %v4431_v59 = vld [vmem:[#allocation9 + $0x720] sm:$0xf]  ;;  %v5539_v60 = vld [vmem:[#allocation9 + $0x72c] sm:$0xf0]  ;;  %v4304_v6 = vor.u32 %v5507_v57, %v4303_v56  ;;  %1874 = vmatpush.bf16.msrb.mxu0 %v4048_v63  ;;  %v5397_v41 = vld [vmem:[#allocation9 + $0x2c4] sm:$0xf]  ;;  %v3748_v49 = vor.u32 %v5365_v37, %v3745_v40 }
  0x56   :  { %v4031_v61 = vld [vmem:[#allocation9 + $0x400] sm:$0xf]  ;;  %v5439_v62 = vld [vmem:[#allocation9 + $0x40c] sm:$0xf0]  ;;  %v4432_v11 = vor.u32 %v5539_v60, %v4431_v59  ;;  %1888 = vmatpush.bf16.msrb.mxu1 %v4176_v5  ;;  %v3873_v42 = vld [vmem:[#allocation9 + $0x2d0] sm:$0xf0] }
  0x57   :  { %v4159_v0 = vld [vmem:[#allocation9 + $0x500] sm:$0xf]  ;;  %v5471_v2 = vld [vmem:[#allocation9 + $0x50c] sm:$0xf0]  ;;  %v4032_v19 = vor.u32 %v5439_v62, %v4031_v61  ;;  %1902 = vmatpush.bf16.msrb.mxu2 %v4304_v6  ;;  %v5429_v45 = vld [vmem:[#allocation9 + $0x3c4] sm:$0xf]  ;;  %v3876_v50 = vor.u32 %v5397_v41, %v3873_v42 }
  0x58   :  { %v4287_v3 = vld [vmem:[#allocation9 + $0x600] sm:$0xf]  ;;  %v5503_v4 = vld [vmem:[#allocation9 + $0x60c] sm:$0xf0]  ;;  %v4160_v23 = vor.u32 %v5471_v2, %v4159_v0  ;;  %1916 = vmatpush.bf16.msrb.mxu3 %v4432_v11  ;;  %v4001_v46 = vld [vmem:[#allocation9 + $0x3d0] sm:$0xf0] }
  0x59   :  { %v4415_v7 = vld [vmem:[#allocation9 + $0x700] sm:$0xf]  ;;  %v5535_v8 = vld [vmem:[#allocation9 + $0x70c] sm:$0xf0]  ;;  %v4288_v24 = vor.u32 %v5503_v4, %v4287_v3  ;;  %1875 = vmatpush.bf16.msrb.mxu0 %v4032_v19  ;;  %v5329_v51 = vld [vmem:[#allocation9 + $0xa4] sm:$0xf]  ;;  %v4004_v54 = vor.u32 %v5429_v45, %v4001_v46 }
  0x5a   :  { %v128_v21 = vld [vmem:[#allocation6 + $0x20] sm:$0xff]  ;;  %v130_v25 = vld [vmem:[#allocation6 + $0x30] sm:$0xff]  ;;  %v4416_v28 = vor.u32 %v5535_v8, %v4415_v7  ;;  %1889 = vmatpush.bf16.msrb.mxu1 %v4160_v23 }
  0x5b   :  { %v136_v22 = vld [vmem:[#allocation6 + $0x60] sm:$0xff]  ;;  %v138_v26 = vld [vmem:[#allocation6 + $0x70] sm:$0xff]  ;;  %1903 = vmatpush.bf16.msrb.mxu2 %v4288_v24 }
  0x5c   :  { %v5857_v39 = vpack.c.bf16 %v136_v22, %v128_v21  ;;  %v5859_v43 = vpack.c.bf16 %v138_v26, %v130_v25  ;;  %1917 = vmatpush.bf16.msrb.mxu3 %v4416_v28  ;;  %v3601_v52 = vld [vmem:[#allocation9 + $0xb0] sm:$0xf0]  ;;  %v5361_v53 = vld [vmem:[#allocation9 + $0x1a4] sm:$0xf] }
  0x5d   :  { %1924 = vmatpush.bf16.msra.mxu0 %v3636_v29  ;;  %v3729_v55 = vld [vmem:[#allocation9 + $0x1b0] sm:$0xf0]  ;;  %v5393_v56 = vld [vmem:[#allocation9 + $0x2a4] sm:$0xf]  ;;  %1890 = vmatmul.bf16.vlgmr.msrb.gmra.mxu1 %v5861_v44  ;;  %v3604_v61 = vor.u32 %v5329_v51, %v3601_v52 }
  0x5e   :  { %1938 = vmatpush.bf16.msra.mxu1 %v3764_v33  ;;  %1876 = vmatmul.bf16.vlgmr.msrb.gmra.mxu0 %v5857_v39  ;;  %v3857_v57 = vld [vmem:[#allocation9 + $0x2b0] sm:$0xf0]  ;;  %v5425_v59 = vld [vmem:[#allocation9 + $0x3a4] sm:$0xf]  ;;  %v3732_v62 = vor.u32 %v5361_v53, %v3729_v55 }
  0x5f   :  { %1952 = vmatpush.bf16.msra.mxu2 %v3892_v34  ;;  %v3985_v60 = vld [vmem:[#allocation9 + $0x3b0] sm:$0xf0]  ;;  %1918 = vmatmul.bf16.vlgmr.msrb.gmra.mxu3 %v5863_v47  ;;  %v3860_v63 = vor.u32 %v5393_v56, %v3857_v57  ;;  %v5325_v0 = vld [vmem:[#allocation9 + $0x84] sm:$0xf] }
  0x60   :  { %1966 = vmatpush.bf16.msra.mxu3 %v4020_v38  ;;  %1904 = vmatmul.bf16.vlgmr.msrb.gmra.mxu2 %v5859_v43  ;;  %v3585_v2 = vld [vmem:[#allocation9 + $0x90] sm:$0xf0]  ;;  %v5357_v3 = vld [vmem:[#allocation9 + $0x184] sm:$0xf]  ;;  %v3988_v4 = vor.u32 %v5425_v59, %v3985_v60 }
  0x61   :  { %1925 = vmatpush.bf16.msra.mxu0 %v3620_v48  ;;  %v3713_v5 = vld [vmem:[#allocation9 + $0x190] sm:$0xf0]  ;;  %v5389_v6 = vld [vmem:[#allocation9 + $0x284] sm:$0xf]  ;;  %v3588_v11 = vor.u32 %v5325_v0, %v3585_v2 }
  0x62   :  { %1939 = vmatpush.bf16.msra.mxu1 %v3748_v49  ;;  %v3841_v7 = vld [vmem:[#allocation9 + $0x290] sm:$0xf0]  ;;  %v5421_v8 = vld [vmem:[#allocation9 + $0x384] sm:$0xf]  ;;  %v3716_v12 = vor.u32 %v5357_v3, %v3713_v5 }
  0x63   :  { %1953 = vmatpush.bf16.msra.mxu2 %v3876_v50  ;;  %v3969_v9 = vld [vmem:[#allocation9 + $0x390] sm:$0xf0]  ;;  %v3844_v13 = vor.u32 %v5389_v6, %v3841_v7  ;;  %v5321_v14 = vld [vmem:[#allocation9 + $0x64] sm:$0xf] }
  0x64   :  { %1967 = vmatpush.bf16.msra.mxu3 %v4004_v54  ;;  %v3569_v15 = vld [vmem:[#allocation9 + $0x70] sm:$0xf0]  ;;  %v5353_v16 = vld [vmem:[#allocation9 + $0x164] sm:$0xf]  ;;  %v3972_v18 = vor.u32 %v5421_v8, %v3969_v9 }
  0x65   :  { %1926 = vmatpush.bf16.msra.mxu0 %v3604_v61  ;;  %v3697_v19 = vld [vmem:[#allocation9 + $0x170] sm:$0xf0]  ;;  %v5385_v20 = vld [vmem:[#allocation9 + $0x264] sm:$0xf]  ;;  %v3572_v24 = vor.u32 %v5321_v14, %v3569_v15 }
  0x66   :  { %1940 = vmatpush.bf16.msra.mxu1 %v3732_v62  ;;  %v3825_v21 = vld [vmem:[#allocation9 + $0x270] sm:$0xf0]  ;;  %v5417_v22 = vld [vmem:[#allocation9 + $0x364] sm:$0xf]  ;;  %v3700_v25 = vor.u32 %v5353_v16, %v3697_v19 }
  0x67   :  { %1954 = vmatpush.bf16.msra.mxu2 %v3860_v63  ;;  %v3953_v23 = vld [vmem:[#allocation9 + $0x370] sm:$0xf0]  ;;  %v3828_v26 = vor.u32 %v5385_v20, %v3825_v21  ;;  %v5317_v27 = vld [vmem:[#allocation9 + $0x44] sm:$0xf] }
  0x68   :  { %1968 = vmatpush.bf16.msra.mxu3 %v3988_v4  ;;  %v3553_v28 = vld [vmem:[#allocation9 + $0x50] sm:$0xf0]  ;;  %v5349_v29 = vld [vmem:[#allocation9 + $0x144] sm:$0xf]  ;;  %v3956_v30 = vor.u32 %v5417_v22, %v3953_v23 }
  0x69   :  { %1927 = vmatpush.bf16.msra.mxu0 %v3588_v11  ;;  %v3681_v31 = vld [vmem:[#allocation9 + $0x150] sm:$0xf0]  ;;  %v5381_v32 = vld [vmem:[#allocation9 + $0x244] sm:$0xf]  ;;  %v3556_v36 = vor.u32 %v5317_v27, %v3553_v28 }
  0x6a   :  { %1941 = vmatpush.bf16.msra.mxu1 %v3716_v12  ;;  %v3809_v33 = vld [vmem:[#allocation9 + $0x250] sm:$0xf0]  ;;  %v5413_v34 = vld [vmem:[#allocation9 + $0x344] sm:$0xf]  ;;  %v3684_v37 = vor.u32 %v5349_v29, %v3681_v31 }
  0x6b   :  { %1955 = vmatpush.bf16.msra.mxu2 %v3844_v13  ;;  %v3937_v35 = vld [vmem:[#allocation9 + $0x350] sm:$0xf0]  ;;  %v3812_v38 = vor.u32 %v5381_v32, %v3809_v33  ;;  %v5313_v40 = vld [vmem:[#allocation9 + $0x24] sm:$0xf] }
  0x6c   :  { %1969 = vmatpush.bf16.msra.mxu3 %v3972_v18  ;;  %v3537_v41 = vld [vmem:[#allocation9 + $0x30] sm:$0xf0]  ;;  %v5345_v42 = vld [vmem:[#allocation9 + $0x124] sm:$0xf]  ;;  %v3940_v45 = vor.u32 %v5413_v34, %v3937_v35 }
  0x6d   :  { %1928 = vmatpush.bf16.msra.mxu0 %v3572_v24  ;;  %v3665_v46 = vld [vmem:[#allocation9 + $0x130] sm:$0xf0]  ;;  %v5377_v48 = vld [vmem:[#allocation9 + $0x224] sm:$0xf]  ;;  %v3540_v52 = vor.u32 %v5313_v40, %v3537_v41 }
  0x6e   :  { %1942 = vmatpush.bf16.msra.mxu1 %v3700_v25  ;;  %v3793_v49 = vld [vmem:[#allocation9 + $0x230] sm:$0xf0]  ;;  %v5409_v50 = vld [vmem:[#allocation9 + $0x324] sm:$0xf]  ;;  %v3668_v55 = vor.u32 %v5345_v42, %v3665_v46 }
  0x6f   :  { %1956 = vmatpush.bf16.msra.mxu2 %v3828_v26  ;;  %v3921_v51 = vld [vmem:[#allocation9 + $0x330] sm:$0xf0]  ;;  %v5309_v53 = vld [vmem:[#allocation9 + $0x4] sm:$0xf]  ;;  %v3796_v56 = vor.u32 %v5377_v48, %v3793_v49 }
  0x70   :  { %1970 = vmatpush.bf16.msra.mxu3 %v3956_v30  ;;  %v3521_v54 = vld [vmem:[#allocation9 + $0x10] sm:$0xf0]  ;;  %v5341_v57 = vld [vmem:[#allocation9 + $0x104] sm:$0xf]  ;;  %v3924_v61 = vor.u32 %v5409_v50, %v3921_v51 }
  0x71   :  { %1929 = vmatpush.bf16.msra.mxu0 %v3556_v36  ;;  %v3649_v59 = vld [vmem:[#allocation9 + $0x110] sm:$0xf0]  ;;  %v5373_v60 = vld [vmem:[#allocation9 + $0x204] sm:$0xf]  ;;  %v3524_v5 = vor.u32 %v5309_v53, %v3521_v54 }
  0x72   :  { %1943 = vmatpush.bf16.msra.mxu1 %v3684_v37  ;;  %v3777_v62 = vld [vmem:[#allocation9 + $0x210] sm:$0xf0]  ;;  %v5405_v63 = vld [vmem:[#allocation9 + $0x304] sm:$0xf]  ;;  %v3652_v9 = vor.u32 %v5341_v57, %v3649_v59 }
  0x73   :  { %1957 = vmatpush.bf16.msra.mxu2 %v3812_v38  ;;  %v3905_v0 = vld [vmem:[#allocation9 + $0x310] sm:$0xf0]  ;;  %v5465_v2 = vld [vmem:[#allocation9 + $0x4e4] sm:$0xf]  ;;  %v3780_v11 = vor.u32 %v5373_v60, %v3777_v62 }
  0x74   :  { %1971 = vmatpush.bf16.msra.mxu3 %v3940_v45  ;;  %v4145_v3 = vld [vmem:[#allocation9 + $0x4f0] sm:$0xf0]  ;;  %v5497_v4 = vld [vmem:[#allocation9 + $0x5e4] sm:$0xf]  ;;  %v3908_v14 = vor.u32 %v5405_v63, %v3905_v0 }
  0x75   :  { %1930 = vmatpush.bf16.msra.mxu0 %v3540_v52  ;;  %v4273_v6 = vld [vmem:[#allocation9 + $0x5f0] sm:$0xf0]  ;;  %v5529_v7 = vld [vmem:[#allocation9 + $0x6e4] sm:$0xf]  ;;  %v4148_v15 = vor.u32 %v5465_v2, %v4145_v3 }
  0x76   :  { %v4401_v8 = vld [vmem:[#allocation9 + $0x6f0] sm:$0xf0]  ;;  %1944 = vmatpush.bf16.msra.mxu1 %v3668_v55  ;;  %v5561_v12 = vld [vmem:[#allocation9 + $0x7e4] sm:$0xf]  ;;  %v4276_v16 = vor.u32 %v5497_v4, %v4273_v6 }
  0x77   :  { %1958 = vmatpush.bf16.msra.mxu2 %v3796_v56  ;;  %v4529_v13 = vld [vmem:[#allocation9 + $0x7f0] sm:$0xf0]  ;;  %v4404_v18 = vor.u32 %v5529_v7, %v4401_v8  ;;  %v5461_v19 = vld [vmem:[#allocation9 + $0x4c4] sm:$0xf] }
  0x78   :  { %1972 = vmatpush.bf16.msra.mxu3 %v3924_v61  ;;  %v4129_v20 = vld [vmem:[#allocation9 + $0x4d0] sm:$0xf0]  ;;  %v5493_v21 = vld [vmem:[#allocation9 + $0x5c4] sm:$0xf]  ;;  %v4532_v22 = vor.u32 %v5561_v12, %v4529_v13 }
  0x79   :  { %1931 = vmatpush.bf16.msra.mxu0 %v3524_v5  ;;  %v4257_v23 = vld [vmem:[#allocation9 + $0x5d0] sm:$0xf0]  ;;  %v5525_v24 = vld [vmem:[#allocation9 + $0x6c4] sm:$0xf]  ;;  %v4132_v28 = vor.u32 %v5461_v19, %v4129_v20 }
  0x7a   :  { %v4385_v25 = vld [vmem:[#allocation9 + $0x6d0] sm:$0xf0]  ;;  %1945 = vmatpush.bf16.msra.mxu1 %v3652_v9  ;;  %v5557_v26 = vld [vmem:[#allocation9 + $0x7c4] sm:$0xf]  ;;  %v4260_v29 = vor.u32 %v5493_v21, %v4257_v23 }
  0x7b   :  { %1959 = vmatpush.bf16.msra.mxu2 %v3780_v11  ;;  %v4513_v27 = vld [vmem:[#allocation9 + $0x7d0] sm:$0xf0]  ;;  %v4388_v30 = vor.u32 %v5525_v24, %v4385_v25  ;;  %v5457_v31 = vld [vmem:[#allocation9 + $0x4a4] sm:$0xf] }
  0x7c   :  { %1973 = vmatpush.bf16.msra.mxu3 %v3908_v14  ;;  %v4113_v32 = vld [vmem:[#allocation9 + $0x4b0] sm:$0xf0]  ;;  %v5489_v33 = vld [vmem:[#allocation9 + $0x5a4] sm:$0xf]  ;;  %v4516_v34 = vor.u32 %v5557_v26, %v4513_v27  ;;  %1932 = vmatmul.bf16.vlgmr.msra.gmra.mxu0 %v5845_v58 }
  0x7d   :  { %1980 = vmatpush.bf16.msrb.mxu0 %v4148_v15  ;;  %v4241_v35 = vld [vmem:[#allocation9 + $0x5b0] sm:$0xf0]  ;;  %v5521_v36 = vld [vmem:[#allocation9 + $0x6a4] sm:$0xf]  ;;  %1946 = vmatmul.bf16.vlgmr.msra.gmra.mxu1 %v5851_v10  ;;  %v4116_v41 = vor.u32 %v5457_v31, %v4113_v32 }
  0x7e   :  { %1994 = vmatpush.bf16.msrb.mxu1 %v4276_v16  ;;  %v4369_v37 = vld [vmem:[#allocation9 + $0x6b0] sm:$0xf0]  ;;  %v5553_v38 = vld [vmem:[#allocation9 + $0x7a4] sm:$0xf]  ;;  %1960 = vmatmul.bf16.vlgmr.msra.gmra.mxu2 %v5847_v1  ;;  %v4244_v42 = vor.u32 %v5489_v33, %v4241_v35 }
  0x7f   :  { %2008 = vmatpush.bf16.msrb.mxu2 %v4404_v18  ;;  %v4497_v40 = vld [vmem:[#allocation9 + $0x7b0] sm:$0xf0]  ;;  %1974 = vmatmul.bf16.vlgmr.msra.gmra.mxu3 %v5853_v17  ;;  %v4372_v45 = vor.u32 %v5521_v36, %v4369_v37  ;;  %v5453_v46 = vld [vmem:[#allocation9 + $0x484] sm:$0xf] }
  0x80   :  { %2022 = vmatpush.bf16.msrb.mxu3 %v4532_v22  ;;  %v4097_v48 = vld [vmem:[#allocation9 + $0x490] sm:$0xf0]  ;;  %v5485_v49 = vld [vmem:[#allocation9 + $0x584] sm:$0xf]  ;;  %v4500_v50 = vor.u32 %v5553_v38, %v4497_v40 }
  0x81   :  { %1981 = vmatpush.bf16.msrb.mxu0 %v4132_v28  ;;  %v4225_v51 = vld [vmem:[#allocation9 + $0x590] sm:$0xf0]  ;;  %v5517_v52 = vld [vmem:[#allocation9 + $0x684] sm:$0xf]  ;;  %v4100_v56 = vor.u32 %v5453_v46, %v4097_v48  ;;  %v3639_v48 = vld [vmem:[#allocation9 + $0xe8] sm:$0xf] }
  0x82   :  { %1995 = vmatpush.bf16.msrb.mxu1 %v4260_v29  ;;  %v4353_v53 = vld [vmem:[#allocation9 + $0x690] sm:$0xf0]  ;;  %v5549_v54 = vld [vmem:[#allocation9 + $0x784] sm:$0xf]  ;;  %v4228_v57 = vor.u32 %v5485_v49, %v4225_v51  ;;  %v5340_v49 = vld [vmem:[#allocation9 + $0xf4] sm:$0xf0] }
  0x83   :  { %2009 = vmatpush.bf16.msrb.mxu2 %v4388_v30  ;;  %v4481_v55 = vld [vmem:[#allocation9 + $0x790] sm:$0xf0]  ;;  %v4356_v59 = vor.u32 %v5517_v52, %v4353_v53  ;;  %v5449_v60 = vld [vmem:[#allocation9 + $0x464] sm:$0xf]  ;;  %v5372_v52 = vld [vmem:[#allocation9 + $0x1f4] sm:$0xf0] }
  0x84   :  { %2023 = vmatpush.bf16.msrb.mxu3 %v4516_v34  ;;  %v4081_v61 = vld [vmem:[#allocation9 + $0x470] sm:$0xf0]  ;;  %v5481_v62 = vld [vmem:[#allocation9 + $0x564] sm:$0xf]  ;;  %v4484_v63 = vor.u32 %v5549_v54, %v4481_v55  ;;  %v3895_v53 = vld [vmem:[#allocation9 + $0x2e8] sm:$0xf] }
  0x85   :  { %1982 = vmatpush.bf16.msrb.mxu0 %v4116_v41  ;;  %v4209_v0 = vld [vmem:[#allocation9 + $0x570] sm:$0xf0]  ;;  %v5513_v2 = vld [vmem:[#allocation9 + $0x664] sm:$0xf]  ;;  %v4084_v6 = vor.u32 %v5449_v60, %v4081_v61  ;;  %v5404_v54 = vld [vmem:[#allocation9 + $0x2f4] sm:$0xf0]  ;;  %v3640_v61 = vor.u32 %v5340_v49, %v3639_v48 }
  0x86   :  { %1996 = vmatpush.bf16.msrb.mxu1 %v4244_v42  ;;  %v4337_v3 = vld [vmem:[#allocation9 + $0x670] sm:$0xf0]  ;;  %v5545_v4 = vld [vmem:[#allocation9 + $0x764] sm:$0xf]  ;;  %v4212_v7 = vor.u32 %v5481_v62, %v4209_v0  ;;  %v3623_v0 = vld [vmem:[#allocation9 + $0xc8] sm:$0xf] }
  0x87   :  { %2010 = vmatpush.bf16.msrb.mxu2 %v4372_v45  ;;  %v4465_v5 = vld [vmem:[#allocation9 + $0x770] sm:$0xf0]  ;;  %v4340_v8 = vor.u32 %v5513_v2, %v4337_v3  ;;  %v5445_v9 = vld [vmem:[#allocation9 + $0x444] sm:$0xf]  ;;  %v5336_v2 = vld [vmem:[#allocation9 + $0xd4] sm:$0xf0] }
  0x88   :  { %2024 = vmatpush.bf16.msrb.mxu3 %v4500_v50  ;;  %v4065_v11 = vld [vmem:[#allocation9 + $0x450] sm:$0xf0]  ;;  %v5477_v12 = vld [vmem:[#allocation9 + $0x544] sm:$0xf]  ;;  %v4468_v13 = vor.u32 %v5545_v4, %v4465_v5  ;;  %v3767_v50 = vld [vmem:[#allocation9 + $0x1e8] sm:$0xf] }
  0x89   :  { %1983 = vmatpush.bf16.msrb.mxu0 %v4100_v56  ;;  %v4193_v14 = vld [vmem:[#allocation9 + $0x550] sm:$0xf0]  ;;  %v5509_v15 = vld [vmem:[#allocation9 + $0x644] sm:$0xf]  ;;  %v4068_v20 = vor.u32 %v5445_v9, %v4065_v11  ;;  %v3768_v62 = vor.u32 %v5372_v52, %v3767_v50  ;;  %v3751_v3 = vld [vmem:[#allocation9 + $0x1c8] sm:$0xf]  ;;  %v3624_v11 = vor.u32 %v5336_v2, %v3623_v0 }
  0x8a   :  { %1997 = vmatpush.bf16.msrb.mxu1 %v4228_v57  ;;  %v4321_v16 = vld [vmem:[#allocation9 + $0x650] sm:$0xf0]  ;;  %v5541_v18 = vld [vmem:[#allocation9 + $0x744] sm:$0xf]  ;;  %v4196_v21 = vor.u32 %v5477_v12, %v4193_v14  ;;  %v4023_v57 = vld [vmem:[#allocation9 + $0x3e8] sm:$0xf] }
  0x8b   :  { %2011 = vmatpush.bf16.msrb.mxu2 %v4356_v59  ;;  %v4449_v19 = vld [vmem:[#allocation9 + $0x750] sm:$0xf0]  ;;  %v4324_v22 = vor.u32 %v5509_v15, %v4321_v16  ;;  %v5441_v23 = vld [vmem:[#allocation9 + $0x424] sm:$0xf]  ;;  %v5436_v59 = vld [vmem:[#allocation9 + $0x3f4] sm:$0xf0] }
  0x8c   :  { %2025 = vmatpush.bf16.msrb.mxu3 %v4484_v63  ;;  %v4049_v24 = vld [vmem:[#allocation9 + $0x430] sm:$0xf0]  ;;  %v5473_v25 = vld [vmem:[#allocation9 + $0x524] sm:$0xf]  ;;  %v4452_v26 = vor.u32 %v5541_v18, %v4449_v19  ;;  %v3896_v63 = vor.u32 %v5404_v54, %v3895_v53  ;;  %v4024_v4 = vor.u32 %v5436_v59, %v4023_v57  ;;  %v5368_v5 = vld [vmem:[#allocation9 + $0x1d4] sm:$0xf0] }
  0x8d   :  { %1984 = vmatpush.bf16.msrb.mxu0 %v4084_v6  ;;  %v4177_v27 = vld [vmem:[#allocation9 + $0x530] sm:$0xf0]  ;;  %v5505_v28 = vld [vmem:[#allocation9 + $0x624] sm:$0xf]  ;;  %v4052_v32 = vor.u32 %v5441_v23, %v4049_v24  ;;  %v3879_v6 = vld [vmem:[#allocation9 + $0x2c8] sm:$0xf]  ;;  %v3752_v12 = vor.u32 %v5368_v5, %v3751_v3 }
  0x8e   :  { %1998 = vmatpush.bf16.msrb.mxu1 %v4212_v7  ;;  %v4305_v29 = vld [vmem:[#allocation9 + $0x630] sm:$0xf0]  ;;  %v5537_v30 = vld [vmem:[#allocation9 + $0x724] sm:$0xf]  ;;  %v4180_v35 = vor.u32 %v5473_v25, %v4177_v27  ;;  %v5400_v7 = vld [vmem:[#allocation9 + $0x2d4] sm:$0xf0] }
  0x8f   :  { %2012 = vmatpush.bf16.msrb.mxu2 %v4340_v8  ;;  %v4433_v31 = vld [vmem:[#allocation9 + $0x730] sm:$0xf0]  ;;  %v5437_v33 = vld [vmem:[#allocation9 + $0x404] sm:$0xf]  ;;  %v4308_v36 = vor.u32 %v5505_v28, %v4305_v29  ;;  %v4007_v8 = vld [vmem:[#allocation9 + $0x3c8] sm:$0xf] }
  0x90   :  { %2026 = vmatpush.bf16.msrb.mxu3 %v4468_v13  ;;  %v4033_v34 = vld [vmem:[#allocation9 + $0x410] sm:$0xf0]  ;;  %v5469_v37 = vld [vmem:[#allocation9 + $0x504] sm:$0xf]  ;;  %v4436_v41 = vor.u32 %v5537_v30, %v4433_v31  ;;  %v5432_v9 = vld [vmem:[#allocation9 + $0x3d4] sm:$0xf0]  ;;  %v3880_v13 = vor.u32 %v5400_v7, %v3879_v6 }
  0x91   :  { %1985 = vmatpush.bf16.msrb.mxu0 %v4068_v20  ;;  %v4161_v38 = vld [vmem:[#allocation9 + $0x510] sm:$0xf0]  ;;  %v5501_v40 = vld [vmem:[#allocation9 + $0x604] sm:$0xf]  ;;  %v4036_v51 = vor.u32 %v5437_v33, %v4033_v34  ;;  %v3607_v14 = vld [vmem:[#allocation9 + $0xa8] sm:$0xf]  ;;  %v4008_v18 = vor.u32 %v5432_v9, %v4007_v8 }
  0x92   :  { %1999 = vmatpush.bf16.msrb.mxu1 %v4196_v21  ;;  %v4289_v42 = vld [vmem:[#allocation9 + $0x610] sm:$0xf0]  ;;  %v5533_v45 = vld [vmem:[#allocation9 + $0x704] sm:$0xf]  ;;  %v4164_v55 = vor.u32 %v5469_v37, %v4161_v38  ;;  %v5332_v15 = vld [vmem:[#allocation9 + $0xb4] sm:$0xf0] }
  0x93   :  { %2013 = vmatpush.bf16.msrb.mxu2 %v4324_v22  ;;  %v4417_v46 = vld [vmem:[#allocation9 + $0x710] sm:$0xf0]  ;;  %v4292_v56 = vor.u32 %v5501_v40, %v4289_v42  ;;  %v3735_v16 = vld [vmem:[#allocation9 + $0x1a8] sm:$0xf]  ;;  %v5364_v19 = vld [vmem:[#allocation9 + $0x1b4] sm:$0xf0]  ;;  %v3608_v24 = vor.u32 %v5332_v15, %v3607_v14 }
  0x94   :  { %2027 = vmatpush.bf16.msrb.mxu3 %v4452_v26  ;;  %v4420_v60 = vor.u32 %v5533_v45, %v4417_v46  ;;  %v3863_v20 = vld [vmem:[#allocation9 + $0x2a8] sm:$0xf]  ;;  %v5396_v21 = vld [vmem:[#allocation9 + $0x2b4] sm:$0xf0]  ;;  %v3736_v25 = vor.u32 %v5364_v19, %v3735_v16 }
  0x95   :  { %1986 = vmatpush.bf16.msrb.mxu0 %v4052_v32  ;;  %v3991_v22 = vld [vmem:[#allocation9 + $0x3a8] sm:$0xf]  ;;  %v5428_v23 = vld [vmem:[#allocation9 + $0x3b4] sm:$0xf0]  ;;  %v3864_v26 = vor.u32 %v5396_v21, %v3863_v20 }
  0x96   :  { %2000 = vmatpush.bf16.msrb.mxu1 %v4180_v35  ;;  %v3591_v27 = vld [vmem:[#allocation9 + $0x88] sm:$0xf]  ;;  %v5328_v28 = vld [vmem:[#allocation9 + $0x94] sm:$0xf0]  ;;  %v3992_v30 = vor.u32 %v5428_v23, %v3991_v22 }
  0x97   :  { %2014 = vmatpush.bf16.msrb.mxu2 %v4308_v36  ;;  %v3719_v29 = vld [vmem:[#allocation9 + $0x188] sm:$0xf]  ;;  %v5360_v31 = vld [vmem:[#allocation9 + $0x194] sm:$0xf0]  ;;  %v3592_v36 = vor.u32 %v5328_v28, %v3591_v27 }
  0x98   :  { %2028 = vmatpush.bf16.msrb.mxu3 %v4436_v41  ;;  %v3847_v32 = vld [vmem:[#allocation9 + $0x288] sm:$0xf]  ;;  %v5392_v33 = vld [vmem:[#allocation9 + $0x294] sm:$0xf0]  ;;  %v3720_v37 = vor.u32 %v5360_v31, %v3719_v29 }
  0x99   :  { %1987 = vmatpush.bf16.msrb.mxu0 %v4036_v51  ;;  %v3975_v34 = vld [vmem:[#allocation9 + $0x388] sm:$0xf]  ;;  %v5424_v35 = vld [vmem:[#allocation9 + $0x394] sm:$0xf0]  ;;  %v3848_v38 = vor.u32 %v5392_v33, %v3847_v32 }
  0x9a   :  { %2001 = vmatpush.bf16.msrb.mxu1 %v4164_v55  ;;  %v3575_v40 = vld [vmem:[#allocation9 + $0x68] sm:$0xf]  ;;  %v5324_v41 = vld [vmem:[#allocation9 + $0x74] sm:$0xf0]  ;;  %v3976_v45 = vor.u32 %v5424_v35, %v3975_v34 }
  0x9b   :  { %2015 = vmatpush.bf16.msrb.mxu2 %v4292_v56  ;;  %v3703_v42 = vld [vmem:[#allocation9 + $0x168] sm:$0xf]  ;;  %v5356_v46 = vld [vmem:[#allocation9 + $0x174] sm:$0xf0]  ;;  %v3576_v52 = vor.u32 %v5324_v41, %v3575_v40 }
  0x9c   :  { %2029 = vmatpush.bf16.msrb.mxu3 %v4420_v60  ;;  %1988 = vmatmul.bf16.vlgmr.msrb.gmra.mxu0 %v5857_v39  ;;  %v3831_v48 = vld [vmem:[#allocation9 + $0x268] sm:$0xf]  ;;  %v5388_v49 = vld [vmem:[#allocation9 + $0x274] sm:$0xf0]  ;;  %v3704_v53 = vor.u32 %v5356_v46, %v3703_v42 }
  0x9d   :  { %2036 = vmatpush.bf16.msra.mxu0 %v3640_v61  ;;  %2002 = vmatmul.bf16.vlgmr.msrb.gmra.mxu1 %v5861_v44  ;;  %v3959_v50 = vld [vmem:[#allocation9 + $0x368] sm:$0xf]  ;;  %v5420_v51 = vld [vmem:[#allocation9 + $0x374] sm:$0xf0]  ;;  %v3832_v54 = vor.u32 %v5388_v49, %v3831_v48 }
  0x9e   :  { %2050 = vmatpush.bf16.msra.mxu1 %v3768_v62  ;;  %2016 = vmatmul.bf16.vlgmr.msrb.gmra.mxu2 %v5859_v43  ;;  %v3559_v55 = vld [vmem:[#allocation9 + $0x48] sm:$0xf]  ;;  %v5320_v56 = vld [vmem:[#allocation9 + $0x54] sm:$0xf0]  ;;  %v3960_v59 = vor.u32 %v5420_v51, %v3959_v50 }
  0x9f   :  { %2064 = vmatpush.bf16.msra.mxu2 %v3896_v63  ;;  %2030 = vmatmul.bf16.vlgmr.msrb.gmra.mxu3 %v5863_v47  ;;  %v3687_v57 = vld [vmem:[#allocation9 + $0x148] sm:$0xf]  ;;  %v5352_v60 = vld [vmem:[#allocation9 + $0x154] sm:$0xf0]  ;;  %v3560_v2 = vor.u32 %v5320_v56, %v3559_v55 }
  0xa0   :  { %2078 = vmatpush.bf16.msra.mxu3 %v4024_v4  ;;  %v3815_v61 = vld [vmem:[#allocation9 + $0x248] sm:$0xf]  ;;  %v5384_v62 = vld [vmem:[#allocation9 + $0x254] sm:$0xf0]  ;;  %v3688_v3 = vor.u32 %v5352_v60, %v3687_v57 }
  0xa1   :  { %2037 = vmatpush.bf16.msra.mxu0 %v3624_v11  ;;  %v3943_v63 = vld [vmem:[#allocation9 + $0x348] sm:$0xf]  ;;  %v5416_v0 = vld [vmem:[#allocation9 + $0x354] sm:$0xf0]  ;;  %v3816_v4 = vor.u32 %v5384_v62, %v3815_v61 }
  0xa2   :  { %2051 = vmatpush.bf16.msra.mxu1 %v3752_v12  ;;  %v3543_v5 = vld [vmem:[#allocation9 + $0x28] sm:$0xf]  ;;  %v5316_v6 = vld [vmem:[#allocation9 + $0x34] sm:$0xf0]  ;;  %v3944_v8 = vor.u32 %v5416_v0, %v3943_v63 }
  0xa3   :  { %2065 = vmatpush.bf16.msra.mxu2 %v3880_v13  ;;  %v3671_v7 = vld [vmem:[#allocation9 + $0x128] sm:$0xf]  ;;  %v5348_v9 = vld [vmem:[#allocation9 + $0x134] sm:$0xf0]  ;;  %v3544_v15 = vor.u32 %v5316_v6, %v3543_v5 }
  0xa4   :  { %2079 = vmatpush.bf16.msra.mxu3 %v4008_v18  ;;  %v3799_v11 = vld [vmem:[#allocation9 + $0x228] sm:$0xf]  ;;  %v5380_v12 = vld [vmem:[#allocation9 + $0x234] sm:$0xf0]  ;;  %v3672_v19 = vor.u32 %v5348_v9, %v3671_v7 }
  0xa5   :  { %2038 = vmatpush.bf16.msra.mxu0 %v3608_v24  ;;  %v3927_v13 = vld [vmem:[#allocation9 + $0x328] sm:$0xf]  ;;  %v5412_v14 = vld [vmem:[#allocation9 + $0x334] sm:$0xf0]  ;;  %v3800_v20 = vor.u32 %v5380_v12, %v3799_v11 }
  0xa6   :  { %2052 = vmatpush.bf16.msra.mxu1 %v3736_v25  ;;  %v3527_v16 = vld [vmem:[#allocation9 + $0x8] sm:$0xf]  ;;  %v5312_v18 = vld [vmem:[#allocation9 + $0x14] sm:$0xf0]  ;;  %v3928_v24 = vor.u32 %v5412_v14, %v3927_v13 }
  0xa7   :  { %2066 = vmatpush.bf16.msra.mxu2 %v3864_v26  ;;  %v3655_v21 = vld [vmem:[#allocation9 + $0x108] sm:$0xf]  ;;  %v5344_v22 = vld [vmem:[#allocation9 + $0x114] sm:$0xf0]  ;;  %v3528_v31 = vor.u32 %v5312_v18, %v3527_v16 }
  0xa8   :  { %2080 = vmatpush.bf16.msra.mxu3 %v3992_v30  ;;  %v3783_v23 = vld [vmem:[#allocation9 + $0x208] sm:$0xf]  ;;  %v5376_v25 = vld [vmem:[#allocation9 + $0x214] sm:$0xf0]  ;;  %v3656_v35 = vor.u32 %v5344_v22, %v3655_v21 }
  0xa9   :  { %2039 = vmatpush.bf16.msra.mxu0 %v3592_v36  ;;  %v3911_v26 = vld [vmem:[#allocation9 + $0x308] sm:$0xf]  ;;  %v5408_v27 = vld [vmem:[#allocation9 + $0x314] sm:$0xf0]  ;;  %v3784_v36 = vor.u32 %v5376_v25, %v3783_v23 }
  0xaa   :  { %2053 = vmatpush.bf16.msra.mxu1 %v3720_v37  ;;  %v4151_v28 = vld [vmem:[#allocation9 + $0x4e8] sm:$0xf]  ;;  %v5468_v29 = vld [vmem:[#allocation9 + $0x4f4] sm:$0xf0]  ;;  %v3912_v40 = vor.u32 %v5408_v27, %v3911_v26 }
  0xab   :  { %2067 = vmatpush.bf16.msra.mxu2 %v3848_v38  ;;  %v4279_v30 = vld [vmem:[#allocation9 + $0x5e8] sm:$0xf]  ;;  %v5500_v32 = vld [vmem:[#allocation9 + $0x5f4] sm:$0xf0]  ;;  %v4152_v41 = vor.u32 %v5468_v29, %v4151_v28 }
  0xac   :  { %2081 = vmatpush.bf16.msra.mxu3 %v3976_v45  ;;  %v4407_v33 = vld [vmem:[#allocation9 + $0x6e8] sm:$0xf]  ;;  %v5532_v34 = vld [vmem:[#allocation9 + $0x6f4] sm:$0xf0]  ;;  %v4280_v42 = vor.u32 %v5500_v32, %v4279_v30 }
  0xad   :  { %2040 = vmatpush.bf16.msra.mxu0 %v3576_v52  ;;  %v4535_v37 = vld [vmem:[#allocation9 + $0x7e8] sm:$0xf]  ;;  %v5564_v38 = vld [vmem:[#allocation9 + $0x7f4] sm:$0xf0]  ;;  %v4408_v45 = vor.u32 %v5532_v34, %v4407_v33 }
  0xae   :  { %2054 = vmatpush.bf16.msra.mxu1 %v3704_v53  ;;  %v4135_v46 = vld [vmem:[#allocation9 + $0x4c8] sm:$0xf]  ;;  %v5464_v48 = vld [vmem:[#allocation9 + $0x4d4] sm:$0xf0]  ;;  %v4536_v50 = vor.u32 %v5564_v38, %v4535_v37 }
  0xaf   :  { %2068 = vmatpush.bf16.msra.mxu2 %v3832_v54  ;;  %v4263_v49 = vld [vmem:[#allocation9 + $0x5c8] sm:$0xf]  ;;  %v5496_v51 = vld [vmem:[#allocation9 + $0x5d4] sm:$0xf0]  ;;  %v4136_v56 = vor.u32 %v5464_v48, %v4135_v46 }
  0xb0   :  { %2082 = vmatpush.bf16.msra.mxu3 %v3960_v59  ;;  %v4391_v52 = vld [vmem:[#allocation9 + $0x6c8] sm:$0xf]  ;;  %v5528_v53 = vld [vmem:[#allocation9 + $0x6d4] sm:$0xf0]  ;;  %v4264_v57 = vor.u32 %v5496_v51, %v4263_v49 }
  0xb1   :  { %2041 = vmatpush.bf16.msra.mxu0 %v3560_v2  ;;  %v4519_v54 = vld [vmem:[#allocation9 + $0x7c8] sm:$0xf]  ;;  %v5560_v55 = vld [vmem:[#allocation9 + $0x7d4] sm:$0xf0]  ;;  %v4392_v59 = vor.u32 %v5528_v53, %v4391_v52 }
  0xb2   :  { %2055 = vmatpush.bf16.msra.mxu1 %v3688_v3  ;;  %v4119_v60 = vld [vmem:[#allocation9 + $0x4a8] sm:$0xf]  ;;  %v5460_v61 = vld [vmem:[#allocation9 + $0x4b4] sm:$0xf0]  ;;  %v4520_v63 = vor.u32 %v5560_v55, %v4519_v54 }
  0xb3   :  { %2069 = vmatpush.bf16.msra.mxu2 %v3816_v4  ;;  %v4247_v62 = vld [vmem:[#allocation9 + $0x5a8] sm:$0xf]  ;;  %v5492_v0 = vld [vmem:[#allocation9 + $0x5b4] sm:$0xf0]  ;;  %v4120_v6 = vor.u32 %v5460_v61, %v4119_v60 }
  0xb4   :  { %2083 = vmatpush.bf16.msra.mxu3 %v3944_v8  ;;  %v4375_v2 = vld [vmem:[#allocation9 + $0x6a8] sm:$0xf]  ;;  %v5524_v3 = vld [vmem:[#allocation9 + $0x6b4] sm:$0xf0]  ;;  %v4248_v7 = vor.u32 %v5492_v0, %v4247_v62 }
  0xb5   :  { %2042 = vmatpush.bf16.msra.mxu0 %v3544_v15  ;;  %v4503_v4 = vld [vmem:[#allocation9 + $0x7a8] sm:$0xf]  ;;  %v5556_v5 = vld [vmem:[#allocation9 + $0x7b4] sm:$0xf0]  ;;  %v4376_v8 = vor.u32 %v5524_v3, %v4375_v2 }
  0xb6   :  { %2056 = vmatpush.bf16.msra.mxu1 %v3672_v19  ;;  %v4103_v9 = vld [vmem:[#allocation9 + $0x488] sm:$0xf]  ;;  %v5456_v11 = vld [vmem:[#allocation9 + $0x494] sm:$0xf0]  ;;  %v4504_v13 = vor.u32 %v5556_v5, %v4503_v4 }
  0xb7   :  { %2070 = vmatpush.bf16.msra.mxu2 %v3800_v20  ;;  %v4231_v12 = vld [vmem:[#allocation9 + $0x588] sm:$0xf]  ;;  %v5488_v14 = vld [vmem:[#allocation9 + $0x594] sm:$0xf0]  ;;  %v4104_v20 = vor.u32 %v5456_v11, %v4103_v9 }
  0xb8   :  { %2084 = vmatpush.bf16.msra.mxu3 %v3928_v24  ;;  %v4359_v15 = vld [vmem:[#allocation9 + $0x688] sm:$0xf]  ;;  %v5520_v16 = vld [vmem:[#allocation9 + $0x694] sm:$0xf0]  ;;  %v4232_v21 = vor.u32 %v5488_v14, %v4231_v12  ;;  %v1835_v33 = vpop.f32.mrf.mxu1 }
  0xb9   :  { %2043 = vmatpush.bf16.msra.mxu0 %v3528_v31  ;;  %v4487_v18 = vld [vmem:[#allocation9 + $0x788] sm:$0xf]  ;;  %v5552_v19 = vld [vmem:[#allocation9 + $0x794] sm:$0xf0]  ;;  %v4360_v22 = vor.u32 %v5520_v16, %v4359_v15 }
  0xba   :  { %2057 = vmatpush.bf16.msra.mxu1 %v3656_v35  ;;  %v4087_v23 = vld [vmem:[#allocation9 + $0x468] sm:$0xf]  ;;  %v5452_v24 = vld [vmem:[#allocation9 + $0x474] sm:$0xf0]  ;;  %v4488_v26 = vor.u32 %v5552_v19, %v4487_v18  ;;  %v5338_v19 = vld [vmem:[#allocation9 + $0xec] sm:$0xf] }
  0xbb   :  { %2071 = vmatpush.bf16.msra.mxu2 %v3784_v36  ;;  %v4215_v25 = vld [vmem:[#allocation9 + $0x568] sm:$0xf]  ;;  %v5484_v27 = vld [vmem:[#allocation9 + $0x574] sm:$0xf0]  ;;  %v4088_v34 = vor.u32 %v5452_v24, %v4087_v23  ;;  %v3769_v23 = vld [vmem:[#allocation9 + $0x1f8] sm:$0xf0] }
  0xbc   :  { %2085 = vmatpush.bf16.msra.mxu3 %v3912_v40  ;;  %2044 = vmatmul.bf16.vlgmr.msra.gmra.mxu0 %v5845_v58  ;;  %v4343_v28 = vld [vmem:[#allocation9 + $0x668] sm:$0xf]  ;;  %v5516_v29 = vld [vmem:[#allocation9 + $0x674] sm:$0xf0]  ;;  %v4216_v36 = vor.u32 %v5484_v27, %v4215_v25  ;;  %v5402_v24 = vld [vmem:[#allocation9 + $0x2ec] sm:$0xf] }
  0xbd   :  { %2092 = vmatpush.bf16.msrb.mxu0 %v4152_v41  ;;  %2058 = vmatmul.bf16.vlgmr.msra.gmra.mxu1 %v5851_v10  ;;  %v4471_v30 = vld [vmem:[#allocation9 + $0x768] sm:$0xf]  ;;  %v5548_v31 = vld [vmem:[#allocation9 + $0x774] sm:$0xf0]  ;;  %v4344_v37 = vor.u32 %v5516_v29, %v4343_v28  ;;  %v3897_v25 = vld [vmem:[#allocation9 + $0x2f8] sm:$0xf0] }
  0xbe   :  { %2106 = vmatpush.bf16.msrb.mxu1 %v4280_v42  ;;  %2072 = vmatmul.bf16.vlgmr.msra.gmra.mxu2 %v5847_v1  ;;  %v4071_v38 = vld [vmem:[#allocation9 + $0x448] sm:$0xf]  ;;  %v5448_v40 = vld [vmem:[#allocation9 + $0x454] sm:$0xf0]  ;;  %v4472_v42 = vor.u32 %v5548_v31, %v4471_v30  ;;  %v5434_v28 = vld [vmem:[#allocation9 + $0x3ec] sm:$0xf] }
  0xbf   :  { %2120 = vmatpush.bf16.msrb.mxu2 %v4408_v45  ;;  %2086 = vmatmul.bf16.vlgmr.msra.gmra.mxu3 %v5853_v17  ;;  %v4199_v41 = vld [vmem:[#allocation9 + $0x548] sm:$0xf]  ;;  %v5480_v45 = vld [vmem:[#allocation9 + $0x554] sm:$0xf0]  ;;  %v4072_v53 = vor.u32 %v5448_v40, %v4071_v38  ;;  %v4025_v29 = vld [vmem:[#allocation9 + $0x3f8] sm:$0xf0] }
  0xc0   :  { %2134 = vmatpush.bf16.msrb.mxu3 %v4536_v50  ;;  %v4327_v46 = vld [vmem:[#allocation9 + $0x648] sm:$0xf]  ;;  %v5512_v48 = vld [vmem:[#allocation9 + $0x654] sm:$0xf0]  ;;  %v4200_v54 = vor.u32 %v5480_v45, %v4199_v41  ;;  %v1863_v0 = vpop.f32.mrf.mxu3  ;;  %v4028_v38 = vor.u32 %v5434_v28, %v4025_v29  ;;  %v3753_v40 = vld [vmem:[#allocation9 + $0x1d8] sm:$0xf0]  ;;  %v1837_v45 = vpop.f32.mrf.mxu1 }
  0xc1   :  { %2093 = vmatpush.bf16.msrb.mxu0 %v4136_v56  ;;  %v1821_v32 = vpop.f32.mrf.mxu0  ;;  %v4455_v50 = vld [vmem:[#allocation9 + $0x748] sm:$0xf]  ;;  %v5544_v51 = vld [vmem:[#allocation9 + $0x754] sm:$0xf0]  ;;  %v4328_v55 = vor.u32 %v5512_v48, %v4327_v46  ;;  %v5398_v41 = vld [vmem:[#allocation9 + $0x2cc] sm:$0xf] }
  0xc2   :  { %2107 = vmatpush.bf16.msrb.mxu1 %v4264_v57  ;;  %v1836_v35 = vadd.f32 %v1835_v33, %v1821_v32  ;;  %v4055_v56 = vld [vmem:[#allocation9 + $0x428] sm:$0xf]  ;;  %v5444_v57 = vld [vmem:[#allocation9 + $0x434] sm:$0xf0]  ;;  %v4456_v60 = vor.u32 %v5544_v51, %v4455_v50  ;;  %v3900_v33 = vor.u32 %v5402_v24, %v3897_v25  ;;  %v5430_v46 = vld [vmem:[#allocation9 + $0x3cc] sm:$0xf] }
  0xc3   :  { %2121 = vmatpush.bf16.msrb.mxu2 %v4392_v59  ;;  %v4183_v59 = vld [vmem:[#allocation9 + $0x528] sm:$0xf]  ;;  %v5476_v61 = vld [vmem:[#allocation9 + $0x534] sm:$0xf0]  ;;  %v4056_v5 = vor.u32 %v5444_v57, %v4055_v56  ;;  %v4009_v48 = vld [vmem:[#allocation9 + $0x3d8] sm:$0xf0] }
  0xc4   :  { %2135 = vmatpush.bf16.msrb.mxu3 %v4520_v63  ;;  %v4311_v62 = vld [vmem:[#allocation9 + $0x628] sm:$0xf]  ;;  %v5508_v63 = vld [vmem:[#allocation9 + $0x634] sm:$0xf0]  ;;  %v3737_v56 = vld [vmem:[#allocation9 + $0x1b8] sm:$0xf0] }
  0xc5   :  { %2094 = vmatpush.bf16.msrb.mxu0 %v4120_v6  ;;  %v4439_v2 = vld [vmem:[#allocation9 + $0x728] sm:$0xf]  ;;  %v5540_v3 = vld [vmem:[#allocation9 + $0x734] sm:$0xf0]  ;;  %v4312_v9 = vor.u32 %v5508_v63, %v4311_v62  ;;  %v5394_v57 = vld [vmem:[#allocation9 + $0x2ac] sm:$0xf] }
  0xc6   :  { %2108 = vmatpush.bf16.msrb.mxu1 %v4248_v7  ;;  %v4039_v6 = vld [vmem:[#allocation9 + $0x408] sm:$0xf]  ;;  %v5440_v7 = vld [vmem:[#allocation9 + $0x414] sm:$0xf0]  ;;  %v4440_v14 = vor.u32 %v5540_v3, %v4439_v2  ;;  %v3577_v24 = vld [vmem:[#allocation9 + $0x78] sm:$0xf0] }
  0xc7   :  { %2122 = vmatpush.bf16.msrb.mxu2 %v4376_v8  ;;  %v4184_v8 = vor.u32 %v5476_v61, %v4183_v59  ;;  %v4167_v11 = vld [vmem:[#allocation9 + $0x508] sm:$0xf]  ;;  %v5472_v12 = vld [vmem:[#allocation9 + $0x514] sm:$0xf0]  ;;  %v3865_v59 = vld [vmem:[#allocation9 + $0x2b8] sm:$0xf0] }
  0xc8   :  { %2136 = vmatpush.bf16.msrb.mxu3 %v4504_v13  ;;  %v1849_v49 = vpop.f32.mrf.mxu2  ;;  %v4295_v13 = vld [vmem:[#allocation9 + $0x608] sm:$0xf]  ;;  %v5504_v15 = vld [vmem:[#allocation9 + $0x614] sm:$0xf0]  ;;  %v3993_v61 = vld [vmem:[#allocation9 + $0x3b8] sm:$0xf0]  ;;  %v3868_v2 = vor.u32 %v5394_v57, %v3865_v59  ;;  %v1865_v3 = vpop.f32.mrf.mxu3 }
  0xc9   :  { %2095 = vmatpush.bf16.msrb.mxu0 %v4104_v20  ;;  %v1850_v52 = vadd.f32 %v1849_v49, %v1836_v35  ;;  %v4423_v16 = vld [vmem:[#allocation9 + $0x708] sm:$0xf]  ;;  %v5536_v18 = vld [vmem:[#allocation9 + $0x714] sm:$0xf0]  ;;  %v3641_v20 = vld [vmem:[#allocation9 + $0xf8] sm:$0xf0]  ;;  %v4296_v27 = vor.u32 %v5504_v15, %v4295_v13 }
  0xca   :  { %2109 = vmatpush.bf16.msrb.mxu1 %v4232_v21  ;;  %v5370_v21 = vld [vmem:[#allocation9 + $0x1ec] sm:$0xf]  ;;  %v4424_v30 = vor.u32 %v5536_v18, %v4423_v16  ;;  %v3644_v31 = vor.u32 %v5338_v19, %v3641_v20  ;;  %v3849_v13 = vld [vmem:[#allocation9 + $0x298] sm:$0xf0] }
  0xcb   :  { %2123 = vmatpush.bf16.msrb.mxu2 %v4360_v22  ;;  %v5881_v4 = vadd.f32 %v1863_v0, %v1850_v52  ;;  %v4040_v22 = vor.u32 %v5440_v7, %v4039_v6  ;;  %v3772_v32 = vor.u32 %v5370_v21, %v3769_v23  ;;  %v5334_v35 = vld [vmem:[#allocation9 + $0xcc] sm:$0xf]  ;;  %v3593_v6 = vld [vmem:[#allocation9 + $0x98] sm:$0xf0] }
  0xcc   :  { %2137 = vmatpush.bf16.msrb.mxu3 %v4488_v26  ;;  %v4168_v26 = vor.u32 %v5472_v12, %v4167_v11  ;;  %v5330_v52 = vld [vmem:[#allocation9 + $0xac] sm:$0xf]  ;;  %v3721_v11 = vld [vmem:[#allocation9 + $0x198] sm:$0xf0] }
  0xcd   :  { %2096 = vmatpush.bf16.msrb.mxu0 %v4088_v34  ;;  %v1823_v34 = vpop.f32.mrf.mxu0  ;;  %v5358_v7 = vld [vmem:[#allocation9 + $0x18c] sm:$0xf]  ;;  %v3977_v16 = vld [vmem:[#allocation9 + $0x398] sm:$0xf0] }
  0xce   :  { %2110 = vmatpush.bf16.msrb.mxu1 %v4216_v36  ;;  %v3625_v36 = vld [vmem:[#allocation9 + $0xd8] sm:$0xf0]  ;;  %v5390_v12 = vld [vmem:[#allocation9 + $0x28c] sm:$0xf]  ;;  %v3724_v21 = vor.u32 %v5358_v7, %v3721_v11 }
  0xcf   :  { %2124 = vmatpush.bf16.msrb.mxu2 %v4344_v37  ;;  %v5366_v37 = vld [vmem:[#allocation9 + $0x1cc] sm:$0xf]  ;;  %v3628_v49 = vor.u32 %v5334_v35, %v3625_v36  ;;  %v3705_v29 = vld [vmem:[#allocation9 + $0x178] sm:$0xf0] }
  0xd0   :  { %2138 = vmatpush.bf16.msrb.mxu3 %v4472_v42  ;;  %v3881_v42 = vld [vmem:[#allocation9 + $0x2d8] sm:$0xf0]  ;;  %v3756_v50 = vor.u32 %v5366_v37, %v3753_v40  ;;  %v1851_v63 = vpop.f32.mrf.mxu2  ;;  %v5422_v15 = vld [vmem:[#allocation9 + $0x38c] sm:$0xf] }
  0xd1   :  { %2097 = vmatpush.bf16.msrb.mxu0 %v4072_v53  ;;  %v3884_v51 = vor.u32 %v5398_v41, %v3881_v42  ;;  %v3609_v53 = vld [vmem:[#allocation9 + $0xb8] sm:$0xf0]  ;;  %v5322_v23 = vld [vmem:[#allocation9 + $0x6c] sm:$0xf] }
  0xd2   :  { %2111 = vmatpush.bf16.msrb.mxu1 %v4200_v54  ;;  %v5362_v54 = vld [vmem:[#allocation9 + $0x1ac] sm:$0xf]  ;;  %v3612_v62 = vor.u32 %v5330_v52, %v3609_v53  ;;  %v3561_v37 = vld [vmem:[#allocation9 + $0x58] sm:$0xf0] }
  0xd3   :  { %2125 = vmatpush.bf16.msrb.mxu2 %v4328_v55  ;;  %v4012_v55 = vor.u32 %v5430_v46, %v4009_v48  ;;  %v3740_v0 = vor.u32 %v5362_v54, %v3737_v56  ;;  %v5354_v25 = vld [vmem:[#allocation9 + $0x16c] sm:$0xf]  ;;  %v3817_v48 = vld [vmem:[#allocation9 + $0x258] sm:$0xf0] }
  0xd4   :  { %2139 = vmatpush.bf16.msrb.mxu3 %v4456_v60  ;;  %v5426_v60 = vld [vmem:[#allocation9 + $0x3ac] sm:$0xf]  ;;  %v3945_v53 = vld [vmem:[#allocation9 + $0x358] sm:$0xf0] }
  0xd5   :  { %2098 = vmatpush.bf16.msrb.mxu0 %v4056_v5  ;;  %v5326_v5 = vld [vmem:[#allocation9 + $0x8c] sm:$0xf] }
  0xd6   :  { %2112 = vmatpush.bf16.msrb.mxu1 %v4184_v8  ;;  %v1838_v8 = vadd.f32 %v1837_v45, %v1823_v34  ;;  %v3596_v19 = vor.u32 %v5326_v5, %v3593_v6  ;;  %v3708_v34 = vor.u32 %v5354_v25, %v3705_v29  ;;  %v5318_v36 = vld [vmem:[#allocation9 + $0x4c] sm:$0xf]  ;;  %v3689_v45 = vld [vmem:[#allocation9 + $0x158] sm:$0xf0] }
  0xd7   :  { %2126 = vmatpush.bf16.msrb.mxu2 %v4312_v9  ;;  %v3996_v9 = vor.u32 %v5426_v60, %v3993_v61  ;;  %v5382_v46 = vld [vmem:[#allocation9 + $0x24c] sm:$0xf]  ;;  %v3801_v6 = vld [vmem:[#allocation9 + $0x238] sm:$0xf0] }
  0xd8   :  { %2140 = vmatpush.bf16.msrb.mxu3 %v4440_v14  ;;  %v5414_v52 = vld [vmem:[#allocation9 + $0x34c] sm:$0xf]  ;;  %v3820_v60 = vor.u32 %v5382_v46, %v3817_v48 }
  0xd9   :  { %2099 = vmatpush.bf16.msrb.mxu0 %v4040_v22  ;;  %v3852_v22 = vor.u32 %v5390_v12, %v3849_v13  ;;  %v5314_v61 = vld [vmem:[#allocation9 + $0x2c] sm:$0xf]  ;;  %v3529_v12 = vld [vmem:[#allocation9 + $0x18] sm:$0xf0] }
  0xda   :  { %2113 = vmatpush.bf16.msrb.mxu1 %v4168_v26  ;;  %v1891_v20 = vpop.f32.mrf.mxu1  ;;  %v1852_v26 = vadd.f32 %v1851_v63, %v1838_v8  ;;  %v5346_v63 = vld [vmem:[#allocation9 + $0x12c] sm:$0xf]  ;;  %v3929_v8 = vld [vmem:[#allocation9 + $0x338] sm:$0xf0] }
  0xdb   :  { %2127 = vmatpush.bf16.msrb.mxu2 %v4296_v27  ;;  %v1877_v14 = vpop.f32.mrf.mxu0  ;;  %v3980_v27 = vor.u32 %v5422_v15, %v3977_v16  ;;  %v5378_v5 = vld [vmem:[#allocation9 + $0x22c] sm:$0xf]  ;;  %v3657_v16 = vld [vmem:[#allocation9 + $0x118] sm:$0xf0] }
  0xdc   :  { %2141 = vmatpush.bf16.msrb.mxu3 %v4424_v30  ;;  %2100 = vmatmul.bf16.vlgmr.msrb.gmra.mxu0 %v5857_v39  ;;  %v1878_v18 = vadd.f32 %v1877_v14, %v5881_v4  ;;  %v5386_v30 = vld [vmem:[#allocation9 + $0x26c] sm:$0xf]  ;;  %v3580_v4 = vor.u32 %v5322_v23, %v3577_v24  ;;  %v1866_v40 = vadd.f32 %v1865_v3, %v1852_v26  ;;  %v3673_v3 = vld [vmem:[#allocation9 + $0x138] sm:$0xf0] }
  0xdd   :  { %2148 = vmatpush.bf16.msra.mxu0 %v3644_v31  ;;  %2114 = vmatmul.bf16.vlgmr.msrb.gmra.mxu1 %v5861_v44  ;;  %v3833_v31 = vld [vmem:[#allocation9 + $0x278] sm:$0xf0]  ;;  %v5410_v7 = vld [vmem:[#allocation9 + $0x32c] sm:$0xf]  ;;  %v3676_v13 = vor.u32 %v5346_v63, %v3673_v3  ;;  %v3804_v14 = vor.u32 %v5378_v5, %v3801_v6 }
  0xde   :  { %2162 = vmatpush.bf16.msra.mxu1 %v3772_v32  ;;  %2128 = vmatmul.bf16.vlgmr.msrb.gmra.mxu2 %v5859_v43  ;;  %v1892_v28 = vadd.f32 %v1891_v20, %v1878_v18  ;;  %v5418_v32 = vld [vmem:[#allocation9 + $0x36c] sm:$0xf]  ;;  %v3836_v35 = vor.u32 %v5386_v30, %v3833_v31  ;;  %v3913_v23 = vld [vmem:[#allocation9 + $0x318] sm:$0xf0] }
  0xdf   :  { %2176 = vmatpush.bf16.msra.mxu2 %v3900_v33  ;;  %2142 = vmatmul.bf16.vlgmr.msrb.gmra.mxu3 %v5863_v47  ;;  %v3961_v33 = vld [vmem:[#allocation9 + $0x378] sm:$0xf0]  ;;  %v5310_v11 = vld [vmem:[#allocation9 + $0xc] sm:$0xf] }
  0xe0   :  { %2190 = vmatpush.bf16.msra.mxu3 %v4028_v38  ;;  %v5350_v38 = vld [vmem:[#allocation9 + $0x14c] sm:$0xf]  ;;  %v3964_v41 = vor.u32 %v5418_v32, %v3961_v33  ;;  %v3532_v29 = vor.u32 %v5310_v11, %v3529_v12  ;;  %v4281_v30 = vld [vmem:[#allocation9 + $0x5f8] sm:$0xf0] }
  0xe1   :  { %2149 = vmatpush.bf16.msra.mxu0 %v3628_v49  ;;  %v3692_v59 = vor.u32 %v5350_v38, %v3689_v45  ;;  %v5342_v15 = vld [vmem:[#allocation9 + $0x10c] sm:$0xf]  ;;  %v4409_v32 = vld [vmem:[#allocation9 + $0x6f8] sm:$0xf0] }
  0xe2   :  { %2163 = vmatpush.bf16.msra.mxu1 %v3756_v50  ;;  %v1893_v56 = vpop.f32.mrf.mxu1  ;;  %v5374_v18 = vld [vmem:[#allocation9 + $0x20c] sm:$0xf]  ;;  %v4137_v45 = vld [vmem:[#allocation9 + $0x4d8] sm:$0xf0] }
  0xe3   :  { %2177 = vmatpush.bf16.msra.mxu2 %v3884_v51  ;;  %v1905_v42 = vpop.f32.mrf.mxu2  ;;  %v1879_v50 = vpop.f32.mrf.mxu0  ;;  %v5466_v26 = vld [vmem:[#allocation9 + $0x4ec] sm:$0xf]  ;;  %v4249_v63 = vld [vmem:[#allocation9 + $0x5b8] sm:$0xf0] }
  0xe4   :  { %2191 = vmatpush.bf16.msra.mxu3 %v4012_v55  ;;  %v1906_v49 = vadd.f32 %v1905_v42, %v1892_v28  ;;  %v1919_v51 = vpop.f32.mrf.mxu3  ;;  %v1880_v54 = vadd.f32 %v1879_v50, %v1866_v40  ;;  %v3564_v55 = vor.u32 %v5318_v36, %v3561_v37  ;;  %v5498_v28 = vld [vmem:[#allocation9 + $0x5ec] sm:$0xf]  ;;  %v4537_v36 = vld [vmem:[#allocation9 + $0x7f8] sm:$0xf0] }
  0xe5   :  { %2150 = vmatpush.bf16.msra.mxu0 %v3612_v62  ;;  %v3545_v62 = vld [vmem:[#allocation9 + $0x38] sm:$0xf0]  ;;  %v5530_v31 = vld [vmem:[#allocation9 + $0x6ec] sm:$0xf]  ;;  %v4284_v40 = vor.u32 %v5498_v28, %v4281_v30 }
  0xe6   :  { %2164 = vmatpush.bf16.msra.mxu1 %v3740_v0  ;;  %v5888_v57 = vadd.f32 %v1919_v51, %v1906_v49  ;;  %v3948_v0 = vor.u32 %v5414_v52, %v3945_v53  ;;  %v5462_v42 = vld [vmem:[#allocation9 + $0x4cc] sm:$0xf]  ;;  %v4265_v49 = vld [vmem:[#allocation9 + $0x5d8] sm:$0xf0] }
  0xe7   :  { %2178 = vmatpush.bf16.msra.mxu2 %v3868_v2  ;;  %v1894_v2 = vadd.f32 %v1893_v56, %v1880_v54  ;;  %v5494_v46 = vld [vmem:[#allocation9 + $0x5cc] sm:$0xf]  ;;  %v4393_v51 = vld [vmem:[#allocation9 + $0x6d8] sm:$0xf0]  ;;  %v4140_v54 = vor.u32 %v5462_v42, %v4137_v45 }
  0xe8   :  { %2192 = vmatpush.bf16.msra.mxu3 %v3996_v9  ;;  %v3548_v9 = vor.u32 %v5314_v61, %v3545_v62  ;;  %v5526_v50 = vld [vmem:[#allocation9 + $0x6cc] sm:$0xf]  ;;  %v4521_v53 = vld [vmem:[#allocation9 + $0x7d8] sm:$0xf0] }
  0xe9   :  { %2151 = vmatpush.bf16.msra.mxu0 %v3596_v19  ;;  %v3932_v19 = vor.u32 %v5410_v7, %v3929_v8  ;;  %v5558_v52 = vld [vmem:[#allocation9 + $0x7cc] sm:$0xf]  ;;  %v4396_v56 = vor.u32 %v5526_v50, %v4393_v51  ;;  %v4505_v5 = vld [vmem:[#allocation9 + $0x7b8] sm:$0xf0] }
  0xea   :  { %2165 = vmatpush.bf16.msra.mxu1 %v3724_v21  ;;  %v3785_v21 = vld [vmem:[#allocation9 + $0x218] sm:$0xf0]  ;;  %v5490_v61 = vld [vmem:[#allocation9 + $0x5ac] sm:$0xf]  ;;  %v4524_v62 = vor.u32 %v5558_v52, %v4521_v53 }
  0xeb   :  { %2179 = vmatpush.bf16.msra.mxu2 %v3852_v22  ;;  %v1907_v20 = vpop.f32.mrf.mxu2  ;;  %v5406_v22 = vld [vmem:[#allocation9 + $0x30c] sm:$0xf]  ;;  %v4252_v7 = vor.u32 %v5490_v61, %v4249_v63  ;;  %v4105_v11 = vld [vmem:[#allocation9 + $0x498] sm:$0xf0] }
  0xec   :  { %2193 = vmatpush.bf16.msra.mxu3 %v3980_v27  ;;  %v1908_v24 = vadd.f32 %v1907_v20, %v1894_v2  ;;  %v1921_v25 = vpop.f32.mrf.mxu3  ;;  %v4153_v27 = vld [vmem:[#allocation9 + $0x4f8] sm:$0xf0]  ;;  %v3916_v37 = vor.u32 %v5406_v22, %v3913_v23  ;;  %v5554_v3 = vld [vmem:[#allocation9 + $0x7ac] sm:$0xf] }
  0xed   :  { %2152 = vmatpush.bf16.msra.mxu0 %v3580_v4  ;;  %v3660_v4 = vor.u32 %v5342_v15, %v3657_v16  ;;  %v4156_v38 = vor.u32 %v5466_v26, %v4153_v27  ;;  %v4377_v2 = vld [vmem:[#allocation9 + $0x6b8] sm:$0xf0]  ;;  %v5486_v12 = vld [vmem:[#allocation9 + $0x58c] sm:$0xf] }
  0xee   :  { %2166 = vmatpush.bf16.msra.mxu1 %v3708_v34  ;;  %v5890_v33 = vadd.f32 %v1921_v25, %v1908_v24  ;;  %v3788_v34 = vor.u32 %v5374_v18, %v3785_v21  ;;  %v4361_v15 = vld [vmem:[#allocation9 + $0x698] sm:$0xf0]  ;;  %v5550_v16 = vld [vmem:[#allocation9 + $0x78c] sm:$0xf] }
  0xef   :  { %2180 = vmatpush.bf16.msra.mxu2 %v3836_v35  ;;  %v5562_v35 = vld [vmem:[#allocation9 + $0x7ec] sm:$0xf]  ;;  %v4089_v22 = vld [vmem:[#allocation9 + $0x478] sm:$0xf0] }
  0xf0   :  { %2194 = vmatpush.bf16.msra.mxu3 %v3964_v41  ;;  %v4412_v41 = vor.u32 %v5530_v31, %v4409_v32  ;;  %v4540_v48 = vor.u32 %v5562_v35, %v4537_v36  ;;  %v5450_v21 = vld [vmem:[#allocation9 + $0x46c] sm:$0xf]  ;;  %v4217_v26 = vld [vmem:[#allocation9 + $0x578] sm:$0xf0] }
  0xf1   :  { %2153 = vmatpush.bf16.msra.mxu0 %v3564_v55  ;;  %v4268_v55 = vor.u32 %v5494_v46, %v4265_v49  ;;  %v5482_v23 = vld [vmem:[#allocation9 + $0x56c] sm:$0xf]  ;;  %v4345_v28 = vld [vmem:[#allocation9 + $0x678] sm:$0xf0]  ;;  %v4092_v31 = vor.u32 %v5450_v21, %v4089_v22  ;;  %v5243_v22 = vld [vmem:[#allocation8 + $0x1ec] sm:$0xf0] }
  0xf2   :  { %2167 = vmatpush.bf16.msra.mxu1 %v3692_v59  ;;  %v5458_v59 = vld [vmem:[#allocation9 + $0x4ac] sm:$0xf]  ;;  %v4473_v30 = vld [vmem:[#allocation9 + $0x778] sm:$0xf0] }
  0xf3   :  { %2181 = vmatpush.bf16.msra.mxu2 %v3820_v60  ;;  %v4121_v60 = vld [vmem:[#allocation9 + $0x4b8] sm:$0xf0]  ;;  %v5514_v27 = vld [vmem:[#allocation9 + $0x66c] sm:$0xf] }
  0xf4   :  { %2195 = vmatpush.bf16.msra.mxu3 %v3948_v0  ;;  %v5522_v0 = vld [vmem:[#allocation9 + $0x6ac] sm:$0xf]  ;;  %v4124_v6 = vor.u32 %v5458_v59, %v4121_v60  ;;  %v4073_v35 = vld [vmem:[#allocation9 + $0x458] sm:$0xf0] }
  0xf5   :  { %2154 = vmatpush.bf16.msra.mxu0 %v3548_v9  ;;  %v4380_v8 = vor.u32 %v5522_v0, %v4377_v2  ;;  %v5454_v9 = vld [vmem:[#allocation9 + $0x48c] sm:$0xf]  ;;  %v4457_v46 = vld [vmem:[#allocation9 + $0x758] sm:$0xf0] }
  0xf6   :  { %2168 = vmatpush.bf16.msra.mxu1 %v3676_v13  ;;  %v4508_v13 = vor.u32 %v5554_v3, %v4505_v5  ;;  %v5446_v32 = vld [vmem:[#allocation9 + $0x44c] sm:$0xf]  ;;  %v4185_v63 = vld [vmem:[#allocation9 + $0x538] sm:$0xf0] }
  0xf7   :  { %2182 = vmatpush.bf16.msra.mxu2 %v3804_v14  ;;  %v5518_v14 = vld [vmem:[#allocation9 + $0x68c] sm:$0xf]  ;;  %v4076_v50 = vor.u32 %v5446_v32, %v4073_v35  ;;  %v4313_v2 = vld [vmem:[#allocation9 + $0x638] sm:$0xf0]  ;;  %v4639_v35 = vld [vmem:[#allocation8 + $0xc0] sm:$0xf] }
  0xf8   :  { %2196 = vmatpush.bf16.msra.mxu3 %v3932_v19  ;;  %v4364_v20 = vor.u32 %v5518_v14, %v4361_v15  ;;  %v5478_v36 = vld [vmem:[#allocation9 + $0x54c] sm:$0xf]  ;;  %v4441_v5 = vld [vmem:[#allocation9 + $0x738] sm:$0xf0] }
  0xf9   :  { %2155 = vmatpush.bf16.msra.mxu0 %v3532_v29  ;;  %v1933_v18 = vpop.f32.mrf.mxu0  ;;  %v5546_v29 = vld [vmem:[#allocation9 + $0x76c] sm:$0xf]  ;;  %v4297_v15 = vld [vmem:[#allocation9 + $0x618] sm:$0xf0] }
  0xfa   :  { %2169 = vmatpush.bf16.msra.mxu1 %v3660_v4  ;;  %v1947_v19 = vpop.f32.mrf.mxu1  ;;  %v4220_v4 = vor.u32 %v5482_v23, %v4217_v26  ;;  %v5542_v45 = vld [vmem:[#allocation9 + $0x74c] sm:$0xf]  ;;  %v4911_v23 = vld [vmem:[#allocation8 + $0x2e0] sm:$0xf] }
  0xfb   :  { %2183 = vmatpush.bf16.msra.mxu2 %v3788_v34  ;;  %v1948_v24 = vadd.f32 %v1947_v19, %v1933_v18  ;;  %v4348_v34 = vor.u32 %v5514_v27, %v4345_v28  ;;  %v5474_v59 = vld [vmem:[#allocation9 + $0x52c] sm:$0xf]  ;;  %v5211_v19 = vld [vmem:[#allocation8 + $0xec] sm:$0xf0]  ;;  %v5039_v28 = vld [vmem:[#allocation8 + $0x3e0] sm:$0xf] }
  0xfc   :  { %2197 = vmatpush.bf16.msra.mxu3 %v3916_v37  ;;  %2156 = vmatmul.bf16.vlgmr.msra.gmra.mxu0 %v5845_v58  ;;  %v4233_v58 = vld [vmem:[#allocation9 + $0x598] sm:$0xf0]  ;;  %v5506_v0 = vld [vmem:[#allocation9 + $0x62c] sm:$0xf] }
  0xfd   :  { %2204 = vmatpush.bf16.msrb.mxu0 %v4156_v38  ;;  %2170 = vmatmul.bf16.vlgmr.msra.gmra.mxu1 %v5851_v10  ;;  %v4108_v10 = vor.u32 %v5454_v9, %v4105_v11  ;;  %v4201_v37 = vld [vmem:[#allocation9 + $0x558] sm:$0xf0]  ;;  %v4476_v38 = vor.u32 %v5546_v29, %v4473_v30  ;;  %v5538_v3 = vld [vmem:[#allocation9 + $0x72c] sm:$0xf]  ;;  %v4188_v9 = vor.u32 %v5474_v59, %v4185_v63  ;;  %v5307_v29 = vld [vmem:[#allocation8 + $0x3ec] sm:$0xf0] }
  0xfe   :  { %2218 = vmatpush.bf16.msrb.mxu1 %v4284_v40  ;;  %2184 = vmatmul.bf16.vlgmr.msra.gmra.mxu2 %v5847_v1  ;;  %v4489_v1 = vld [vmem:[#allocation9 + $0x798] sm:$0xf0]  ;;  %v5510_v40 = vld [vmem:[#allocation9 + $0x64c] sm:$0xf]  ;;  %v4204_v51 = vor.u32 %v5478_v36, %v4201_v37  ;;  %v4316_v11 = vor.u32 %v5506_v0, %v4313_v2  ;;  %v4444_v14 = vor.u32 %v5538_v3, %v4441_v5  ;;  %v5207_v36 = vld [vmem:[#allocation8 + $0xcc] sm:$0xf0] }
  0xff   :  { %2232 = vmatpush.bf16.msrb.mxu2 %v4412_v41  ;;  %2198 = vmatmul.bf16.vlgmr.msra.gmra.mxu3 %v5853_v17  ;;  %v4236_v17 = vor.u32 %v5486_v12, %v4233_v58  ;;  %v4492_v25 = vor.u32 %v5550_v16, %v4489_v1  ;;  %v4329_v41 = vld [vmem:[#allocation9 + $0x658] sm:$0xf0]  ;;  %v5470_v12 = vld [vmem:[#allocation9 + $0x50c] sm:$0xf]  ;;  %v4767_v37 = vld [vmem:[#allocation8 + $0x1c0] sm:$0xf] }
 0x100   :  { %2246 = vmatpush.bf16.msrb.mxu3 %v4540_v48  ;;  %v5502_v58 = vld [vmem:[#allocation9 + $0x60c] sm:$0xf]  ;;  %v4425_v1 = vld [vmem:[#allocation9 + $0x718] sm:$0xf0]  ;;  %v5267_v59 = vld [vmem:[#allocation8 + $0x2ac] sm:$0xf0] }
 0x101   :  { %2205 = vmatpush.bf16.msrb.mxu0 %v4140_v54  ;;  %v1961_v42 = vpop.f32.mrf.mxu2  ;;  %v1935_v52 = vpop.f32.mrf.mxu0  ;;  %v4332_v54 = vor.u32 %v5510_v40, %v4329_v41  ;;  %v5534_v16 = vld [vmem:[#allocation9 + $0x70c] sm:$0xf]  ;;  %v4300_v27 = vor.u32 %v5502_v58, %v4297_v15  ;;  %v5239_v40 = vld [vmem:[#allocation8 + $0x1cc] sm:$0xf0]  ;;  %v4895_v41 = vld [vmem:[#allocation8 + $0x2c0] sm:$0xf] }
 0x102   :  { %2219 = vmatpush.bf16.msrb.mxu1 %v4268_v55  ;;  %v1962_v48 = vadd.f32 %v1961_v42, %v1948_v24  ;;  %v1975_v49 = vpop.f32.mrf.mxu3  ;;  %v1949_v53 = vpop.f32.mrf.mxu1  ;;  %v5442_v55 = vld [vmem:[#allocation9 + $0x42c] sm:$0xf]  ;;  %v5275_v24 = vld [vmem:[#allocation8 + $0x2ec] sm:$0xf0]  ;;  %v4607_v3 = vld [vmem:[#allocation8 + $0x80] sm:$0xf] }
 0x103   :  { %2233 = vmatpush.bf16.msrb.mxu2 %v4396_v56  ;;  %v4057_v56 = vld [vmem:[#allocation9 + $0x438] sm:$0xf0]  ;;  %v1950_v61 = vadd.f32 %v1949_v53, %v1935_v52  ;;  %v5271_v42 = vld [vmem:[#allocation8 + $0x2cc] sm:$0xf0]  ;;  %v4751_v53 = vld [vmem:[#allocation8 + $0x1a0] sm:$0xf] }
 0x104   :  { %2247 = vmatpush.bf16.msrb.mxu3 %v4524_v62  ;;  %v5896_v60 = vadd.f32 %v1975_v49, %v1962_v48  ;;  %v4460_v62 = vor.u32 %v5542_v45, %v4457_v46  ;;  %v5023_v45 = vld [vmem:[#allocation8 + $0x3c0] sm:$0xf]  ;;  %v5303_v46 = vld [vmem:[#allocation8 + $0x3cc] sm:$0xf0]  ;;  %v4640_v48 = vor.u32 %v5207_v36, %v4639_v35  ;;  %v4768_v49 = vor.u32 %v5239_v40, %v4767_v37 }
 0x105   :  { %2206 = vmatpush.bf16.msrb.mxu0 %v4124_v6  ;;  %v4060_v6 = vor.u32 %v5442_v55, %v4057_v56  ;;  %v5203_v52 = vld [vmem:[#allocation8 + $0xac] sm:$0xf0]  ;;  %v4879_v56 = vld [vmem:[#allocation8 + $0x2a0] sm:$0xf] }
 0x106   :  { %2220 = vmatpush.bf16.msrb.mxu1 %v4252_v7  ;;  %v5438_v7 = vld [vmem:[#allocation9 + $0x40c] sm:$0xf]  ;;  %v5235_v55 = vld [vmem:[#allocation8 + $0x1ac] sm:$0xf0]  ;;  %v4880_v2 = vor.u32 %v5267_v59, %v4879_v56  ;;  %v4735_v5 = vld [vmem:[#allocation8 + $0x180] sm:$0xf] }
 0x107   :  { %2234 = vmatpush.bf16.msrb.mxu2 %v4380_v8  ;;  %v4041_v8 = vld [vmem:[#allocation9 + $0x418] sm:$0xf0]  ;;  %v4752_v0 = vor.u32 %v5235_v55, %v4751_v53  ;;  %v4591_v15 = vld [vmem:[#allocation8 + $0x60] sm:$0xf]  ;;  %v5251_v56 = vld [vmem:[#allocation8 + $0x22c] sm:$0xf0] }
 0x108   :  { %2248 = vmatpush.bf16.msrb.mxu3 %v4508_v13  ;;  %v4169_v13 = vld [vmem:[#allocation9 + $0x518] sm:$0xf0]  ;;  %v4044_v21 = vor.u32 %v5438_v7, %v4041_v8  ;;  %v5231_v7 = vld [vmem:[#allocation8 + $0x18c] sm:$0xf0]  ;;  %v4863_v8 = vld [vmem:[#allocation8 + $0x280] sm:$0xf] }
 0x109   :  { %2207 = vmatpush.bf16.msrb.mxu0 %v4108_v10  ;;  %v1963_v18 = vpop.f32.mrf.mxu2  ;;  %v4655_v10 = vld [vmem:[#allocation8 + $0xe0] sm:$0xf]  ;;  %v4172_v26 = vor.u32 %v5470_v12, %v4169_v13  ;;  %v4736_v58 = vor.u32 %v5231_v7, %v4735_v5 }
 0x10a   :  { %2221 = vmatpush.bf16.msrb.mxu1 %v4236_v17  ;;  %v4783_v17 = vld [vmem:[#allocation8 + $0x1e0] sm:$0xf]  ;;  %v4656_v32 = vor.u32 %v5211_v19, %v4655_v10  ;;  %v5227_v19 = vld [vmem:[#allocation8 + $0x16c] sm:$0xf0] }
 0x10b   :  { %2235 = vmatpush.bf16.msrb.mxu2 %v4364_v20  ;;  %v1964_v20 = vadd.f32 %v1963_v18, %v1950_v61  ;;  %v5007_v61 = vld [vmem:[#allocation8 + $0x3a0] sm:$0xf] }
 0x10c   :  { %2249 = vmatpush.bf16.msrb.mxu3 %v4492_v25  ;;  %v1977_v25 = vpop.f32.mrf.mxu3  ;;  %v4959_v37 = vld [vmem:[#allocation8 + $0x340] sm:$0xf] }
 0x10d   :  { %2208 = vmatpush.bf16.msrb.mxu0 %v4092_v31  ;;  %v5898_v30 = vadd.f32 %v1977_v25, %v1964_v20  ;;  %v4428_v31 = vor.u32 %v5534_v16, %v4425_v1  ;;  %v5195_v16 = vld [vmem:[#allocation8 + $0x6c] sm:$0xf0]  ;;  %v4719_v1 = vld [vmem:[#allocation8 + $0x160] sm:$0xf] }
 0x10e   :  { %2222 = vmatpush.bf16.msrb.mxu1 %v4220_v4  ;;  %v4784_v4 = vor.u32 %v5243_v22, %v4783_v17  ;;  %v4847_v17 = vld [vmem:[#allocation8 + $0x260] sm:$0xf]  ;;  %v5259_v20 = vld [vmem:[#allocation8 + $0x26c] sm:$0xf0] }
 0x10f   :  { %2236 = vmatpush.bf16.msrb.mxu2 %v4348_v34  ;;  %v4912_v34 = vor.u32 %v5275_v24, %v4911_v23  ;;  %v5291_v22 = vld [vmem:[#allocation8 + $0x36c] sm:$0xf0]  ;;  %v4592_v23 = vor.u32 %v5195_v16, %v4591_v15  ;;  %v4848_v24 = vor.u32 %v5259_v20, %v4847_v17  ;;  %v4575_v25 = vld [vmem:[#allocation8 + $0x40] sm:$0xf]  ;;  %v4913_v15 = vld [vmem:[#allocation8 + $0x2f0] sm:$0xf0] }
 0x110   :  { %2250 = vmatpush.bf16.msrb.mxu3 %v4476_v38  ;;  %v5040_v38 = vor.u32 %v5307_v29, %v5039_v28  ;;  %v4815_v55 = vld [vmem:[#allocation8 + $0x220] sm:$0xf]  ;;  %v5305_v16 = vld [vmem:[#allocation8 + $0x3e4] sm:$0xf] }
 0x111   :  { %2209 = vmatpush.bf16.msrb.mxu0 %v4076_v50  ;;  %v4896_v50 = vor.u32 %v5271_v42, %v4895_v41  ;;  %v4943_v59 = vld [vmem:[#allocation8 + $0x320] sm:$0xf] }
 0x112   :  { %2223 = vmatpush.bf16.msrb.mxu1 %v4204_v51  ;;  %v4623_v51 = vld [vmem:[#allocation8 + $0xa0] sm:$0xf] }
 0x113   :  { %2237 = vmatpush.bf16.msrb.mxu2 %v4332_v54  ;;  %v5024_v54 = vor.u32 %v5303_v46, %v5023_v45  ;;  %v4624_v63 = vor.u32 %v5203_v52, %v4623_v51  ;;  %v4559_v45 = vld [vmem:[#allocation8 + $0x20] sm:$0xf]  ;;  %v5219_v52 = vld [vmem:[#allocation8 + $0x12c] sm:$0xf0] }
 0x114   :  { %2251 = vmatpush.bf16.msrb.mxu3 %v4460_v62  ;;  %v5299_v62 = vld [vmem:[#allocation8 + $0x3ac] sm:$0xf0]  ;;  %v4687_v51 = vld [vmem:[#allocation8 + $0x120] sm:$0xf] }
 0x115   :  { %2210 = vmatpush.bf16.msrb.mxu0 %v4060_v6  ;;  %v5008_v6 = vor.u32 %v5299_v62, %v5007_v61  ;;  %v5283_v61 = vld [vmem:[#allocation8 + $0x32c] sm:$0xf0]  ;;  %v4688_v5 = vor.u32 %v5219_v52, %v4687_v51  ;;  %v4927_v7 = vld [vmem:[#allocation8 + $0x300] sm:$0xf] }
 0x116   :  { %2224 = vmatpush.bf16.msrb.mxu1 %v4188_v9  ;;  %v5183_v62 = vld [vmem:[#allocation8 + $0xc] sm:$0xf0] }
 0x117   :  { %2238 = vmatpush.bf16.msrb.mxu2 %v4316_v11  ;;  %v5295_v11 = vld [vmem:[#allocation8 + $0x38c] sm:$0xf0] }
 0x118   :  { %2252 = vmatpush.bf16.msrb.mxu3 %v4444_v14 }
 0x119   :  { %2211 = vmatpush.bf16.msrb.mxu0 %v4044_v21  ;;  %v1989_v9 = vpop.f32.mrf.mxu0  ;;  %v4975_v21 = vld [vmem:[#allocation8 + $0x360] sm:$0xf] }
 0x11a   :  { %2225 = vmatpush.bf16.msrb.mxu1 %v4172_v26  ;;  %v2003_v13 = vpop.f32.mrf.mxu1  ;;  %v5191_v26 = vld [vmem:[#allocation8 + $0x4c] sm:$0xf0]  ;;  %v4976_v28 = vor.u32 %v5291_v22, %v4975_v21 }
 0x11b   :  { %2239 = vmatpush.bf16.msrb.mxu2 %v4300_v27  ;;  %v4703_v27 = vld [vmem:[#allocation8 + $0x140] sm:$0xf]  ;;  %v4576_v41 = vor.u32 %v5191_v26, %v4575_v25  ;;  %v114_v22 = vld [vmem:[#allocation3 + $0x10] sm:$0xff]  ;;  %v117_v26 = vld [vmem:[#allocation3 + $0x28] sm:$0xff] }
 0x11c   :  { %2253 = vmatpush.bf16.msrb.mxu3 %v4428_v31  ;;  %2212 = vmatmul.bf16.vlgmr.msrb.gmra.mxu0 %v5857_v39  ;;  %v5199_v39 = vld [vmem:[#allocation8 + $0x8c] sm:$0xf0] }
 0x11d   :  { %2900 = vmatpush.bf16.msra.mxu0 %v4656_v32  ;;  %2226 = vmatmul.bf16.vlgmr.msrb.gmra.mxu1 %v5861_v44  ;;  %v4991_v44 = vld [vmem:[#allocation8 + $0x380] sm:$0xf]  ;;  %v4608_v12 = vor.u32 %v5199_v39, %v4607_v3  ;;  %v5223_v31 = vld [vmem:[#allocation8 + $0x14c] sm:$0xf0] }
 0x11e   :  { %2914 = vmatpush.bf16.msra.mxu1 %v4784_v4  ;;  %2240 = vmatmul.bf16.vlgmr.msrb.gmra.mxu2 %v5859_v43  ;;  %v5263_v43 = vld [vmem:[#allocation8 + $0x28c] sm:$0xf0]  ;;  %v4992_v18 = vor.u32 %v5295_v11, %v4991_v44  ;;  %v4831_v32 = vld [vmem:[#allocation8 + $0x240] sm:$0xf]  ;;  %v4657_v11 = vld [vmem:[#allocation8 + $0xf0] sm:$0xf0] }
 0x11f   :  { %2928 = vmatpush.bf16.msra.mxu2 %v4912_v34  ;;  %2254 = vmatmul.bf16.vlgmr.msrb.gmra.mxu3 %v5863_v47  ;;  %v1990_v47 = vadd.f32 %v1989_v9, %v5896_v60  ;;  %v4864_v14 = vor.u32 %v5263_v43, %v4863_v8  ;;  %v4720_v60 = vor.u32 %v5227_v19, %v4719_v1  ;;  %v5255_v4 = vld [vmem:[#allocation8 + $0x24c] sm:$0xf0]  ;;  %v4799_v3 = vld [vmem:[#allocation8 + $0x200] sm:$0xf]  ;;  %v5209_v43 = vld [vmem:[#allocation8 + $0xe4] sm:$0xf] }
 0x120   :  { %2942 = vmatpush.bf16.msra.mxu3 %v5040_v38  ;;  %v5287_v38 = vld [vmem:[#allocation8 + $0x34c] sm:$0xf0]  ;;  %v4944_v9 = vor.u32 %v5283_v61, %v4943_v59  ;;  %v116_v19 = vld [vmem:[#allocation3 + $0x20] sm:$0xff]  ;;  %v4660_v25 = vor.u32 %v5209_v43, %v4657_v11  ;;  %v4753_v59 = vld [vmem:[#allocation8 + $0x1b0] sm:$0xf0] }
 0x121   :  { %2901 = vmatpush.bf16.msra.mxu0 %v4640_v48  ;;  %v2004_v10 = vadd.f32 %v2003_v13, %v1990_v47  ;;  %v2017_v29 = vpop.f32.mrf.mxu2  ;;  %v1991_v35 = vpop.f32.mrf.mxu0  ;;  %v4704_v48 = vor.u32 %v5223_v31, %v4703_v27  ;;  %v4960_v53 = vor.u32 %v5287_v38, %v4959_v37  ;;  %v5247_v39 = vld [vmem:[#allocation8 + $0x20c] sm:$0xf0]  ;;  %v5241_v47 = vld [vmem:[#allocation8 + $0x1e4] sm:$0xf]  ;;  %v115_v27 = vld [vmem:[#allocation3 + $0x18] sm:$0xff] }
 0x122   :  { %2915 = vmatpush.bf16.msra.mxu1 %v4768_v49  ;;  %v2031_v36 = vpop.f32.mrf.mxu3  ;;  %v1992_v40 = vadd.f32 %v1991_v35, %v5898_v30  ;;  %v2005_v42 = vpop.f32.mrf.mxu1  ;;  %v4832_v49 = vor.u32 %v5255_v4, %v4831_v32  ;;  %v4543_v30 = vld [vmem:[#allocation8] sm:$0xf]  ;;  %v5279_v8 = vld [vmem:[#allocation8 + $0x30c] sm:$0xf0]  ;;  %v4800_v21 = vor.u32 %v5247_v39, %v4799_v3  ;;  %v5205_v32 = vld [vmem:[#allocation8 + $0xc4] sm:$0xf] }
 0x123   :  { %2929 = vmatpush.bf16.msra.mxu2 %v4896_v50  ;;  %v2018_v34 = vadd.f32 %v2017_v29, %v2004_v10  ;;  %v5187_v50 = vld [vmem:[#allocation8 + $0x2c] sm:$0xf0]  ;;  %v4544_v1 = vor.u32 %v5183_v62, %v4543_v30  ;;  %v112_v10 = vld [vmem:[#allocation3] sm:$0xff]  ;;  %v4641_v4 = vld [vmem:[#allocation8 + $0xd0] sm:$0xf0] }
 0x124   :  { %2943 = vmatpush.bf16.msra.mxu3 %v5024_v54  ;;  %v2006_v54 = vadd.f32 %v2005_v42, %v1992_v40  ;;  %v4769_v37 = vld [vmem:[#allocation8 + $0x1d0] sm:$0xf0]  ;;  %v5269_v38 = vld [vmem:[#allocation8 + $0x2c4] sm:$0xf] }
 0x125   :  { %2902 = vmatpush.bf16.msra.mxu0 %v4624_v63  ;;  %v5906_v46 = vadd.f32 %v2031_v36, %v2018_v34  ;;  %v4560_v63 = vor.u32 %v5187_v50, %v4559_v45  ;;  %v5237_v34 = vld [vmem:[#allocation8 + $0x1c4] sm:$0xf]  ;;  %v5910_v36 = vpack.c.bf16 %v116_v19, %v112_v10  ;;  %v4897_v40 = vld [vmem:[#allocation8 + $0x2d0] sm:$0xf0]  ;;  %v4644_v50 = vor.u32 %v5205_v32, %v4641_v4 }
 0x126   :  { %2916 = vmatpush.bf16.msra.mxu1 %v4752_v0  ;;  %v4671_v0 = vld [vmem:[#allocation8 + $0x100] sm:$0xf]  ;;  %v5301_v45 = vld [vmem:[#allocation8 + $0x3c4] sm:$0xf]  ;;  %v4772_v51 = vor.u32 %v5237_v34, %v4769_v37  ;;  %v4900_v52 = vor.u32 %v5269_v38, %v4897_v40  ;;  %v4881_v30 = vld [vmem:[#allocation8 + $0x2b0] sm:$0xf0] }
 0x127   :  { %2930 = vmatpush.bf16.msra.mxu2 %v4880_v2  ;;  %v5215_v2 = vld [vmem:[#allocation8 + $0x10c] sm:$0xf0]  ;;  %v5265_v61 = vld [vmem:[#allocation8 + $0x2a4] sm:$0xf]  ;;  %v4993_v11 = vld [vmem:[#allocation8 + $0x390] sm:$0xf0] }
 0x128   :  { %2944 = vmatpush.bf16.msra.mxu3 %v5008_v6  ;;  %v4816_v6 = vor.u32 %v5251_v56, %v4815_v55  ;;  %v4672_v20 = vor.u32 %v5215_v2, %v4671_v0  ;;  %v5233_v55 = vld [vmem:[#allocation8 + $0x1a4] sm:$0xf]  ;;  %v4884_v3 = vor.u32 %v5265_v61, %v4881_v30  ;;  %v4721_v19 = vld [vmem:[#allocation8 + $0x170] sm:$0xf0] }
 0x129   :  { %2903 = vmatpush.bf16.msra.mxu0 %v4608_v12  ;;  %v2019_v44 = vpop.f32.mrf.mxu2  ;;  %v4785_v12 = vld [vmem:[#allocation8 + $0x1f0] sm:$0xf0]  ;;  %v5297_v62 = vld [vmem:[#allocation8 + $0x3a4] sm:$0xf]  ;;  %v4756_v2 = vor.u32 %v5233_v55, %v4753_v59 }
 0x12a   :  { %2917 = vmatpush.bf16.msra.mxu1 %v4736_v58  ;;  %v2020_v13 = vadd.f32 %v2019_v44, %v2006_v54  ;;  %v2033_v58 = vpop.f32.mrf.mxu3  ;;  %v4788_v29 = vor.u32 %v5241_v47, %v4785_v12  ;;  %v4625_v54 = vld [vmem:[#allocation8 + $0xb0] sm:$0xf0]  ;;  %v5197_v39 = vld [vmem:[#allocation8 + $0x84] sm:$0xf] }
 0x12b   :  { %2931 = vmatpush.bf16.msra.mxu2 %v4864_v14  ;;  %v5273_v14 = vld [vmem:[#allocation8 + $0x2e4] sm:$0xf]  ;;  %v4833_v4 = vld [vmem:[#allocation8 + $0x250] sm:$0xf0] }
 0x12c   :  { %2945 = vmatpush.bf16.msra.mxu3 %v4992_v18  ;;  %v5041_v18 = vld [vmem:[#allocation8 + $0x3f0] sm:$0xf0]  ;;  %v5908_v17 = vadd.f32 %v2033_v58, %v2020_v13  ;;  %v4916_v31 = vor.u32 %v5273_v14, %v4913_v15  ;;  %v5261_v43 = vld [vmem:[#allocation8 + $0x284] sm:$0xf] }
 0x12d   :  { %2904 = vmatpush.bf16.msra.mxu0 %v4592_v23  ;;  %v118_v23 = vld [vmem:[#allocation3 + $0x30] sm:$0xff]  ;;  %v5044_v35 = vor.u32 %v5305_v16, %v5041_v18  ;;  %v5293_v44 = vld [vmem:[#allocation8 + $0x384] sm:$0xf] }
 0x12e   :  { %2918 = vmatpush.bf16.msra.mxu1 %v4720_v60  ;;  %v113_v60 = vld [vmem:[#allocation3 + $0x8] sm:$0xff]  ;;  %v5193_v15 = vld [vmem:[#allocation8 + $0x64] sm:$0xf]  ;;  %v4593_v16 = vld [vmem:[#allocation8 + $0x70] sm:$0xf0]  ;;  %v4996_v10 = vor.u32 %v5293_v44, %v4993_v11 }
 0x12f   :  { %2932 = vmatpush.bf16.msra.mxu2 %v4848_v24  ;;  %v4928_v24 = vor.u32 %v5279_v8, %v4927_v7  ;;  %v5914_v42 = vpack.c.bf16 %v117_v26, %v113_v60  ;;  %v4737_v8 = vld [vmem:[#allocation8 + $0x190] sm:$0xf0]  ;;  %v4596_v60 = vor.u32 %v5193_v15, %v4593_v16  ;;  %v5253_v32 = vld [vmem:[#allocation8 + $0x244] sm:$0xf]  ;;  %v4791_v15 = vld [vmem:[#allocation8 + $0x1e8] sm:$0xf] }
 0x130   :  { %2946 = vmatpush.bf16.msra.mxu3 %v4976_v28  ;;  %v119_v28 = vld [vmem:[#allocation3 + $0x38] sm:$0xff]  ;;  %v4961_v37 = vld [vmem:[#allocation8 + $0x350] sm:$0xf0]  ;;  %v5217_v55 = vld [vmem:[#allocation8 + $0x124] sm:$0xf] }
 0x131   :  { %2905 = vmatpush.bf16.msra.mxu0 %v4576_v41  ;;  %v5912_v41 = vpack.c.bf16 %v118_v23, %v114_v22  ;;  %v5289_v22 = vld [vmem:[#allocation8 + $0x364] sm:$0xf]  ;;  %v4977_v23 = vld [vmem:[#allocation8 + $0x370] sm:$0xf0] }
 0x132   :  { %2919 = vmatpush.bf16.msra.mxu1 %v4704_v48  ;;  %v5025_v48 = vld [vmem:[#allocation8 + $0x3d0] sm:$0xf0] }
 0x133   :  { %2933 = vmatpush.bf16.msra.mxu2 %v4832_v49  ;;  %v5916_v49 = vpack.c.bf16 %v119_v28, %v115_v27  ;;  %v5028_v56 = vor.u32 %v5301_v45, %v5025_v48  ;;  %v4577_v27 = vld [vmem:[#allocation8 + $0x50] sm:$0xf0]  ;;  %v5221_v28 = vld [vmem:[#allocation8 + $0x144] sm:$0xf] }
 0x134   :  { %2947 = vmatpush.bf16.msra.mxu3 %v4960_v53  ;;  %v5201_v53 = vld [vmem:[#allocation8 + $0xa4] sm:$0xf]  ;;  %v4689_v30 = vld [vmem:[#allocation8 + $0x130] sm:$0xf0] }
 0x135   :  { %2906 = vmatpush.bf16.msra.mxu0 %v4560_v63  ;;  %v5009_v63 = vld [vmem:[#allocation8 + $0x3b0] sm:$0xf0]  ;;  %v4628_v0 = vor.u32 %v5201_v53, %v4625_v54  ;;  %v5185_v53 = vld [vmem:[#allocation8 + $0x24] sm:$0xf] }
 0x136   :  { %2920 = vmatpush.bf16.msra.mxu1 %v4688_v5  ;;  %v4609_v5 = vld [vmem:[#allocation8 + $0x90] sm:$0xf0]  ;;  %v5012_v7 = vor.u32 %v5297_v62, %v5009_v63  ;;  %v5249_v62 = vld [vmem:[#allocation8 + $0x224] sm:$0xf] }
 0x137   :  { %2934 = vmatpush.bf16.msra.mxu2 %v4816_v6  ;;  %v5229_v6 = vld [vmem:[#allocation8 + $0x184] sm:$0xf]  ;;  %v4612_v12 = vor.u32 %v5197_v39, %v4609_v5  ;;  %v4561_v54 = vld [vmem:[#allocation8 + $0x30] sm:$0xf0] }
 0x138   :  { %2948 = vmatpush.bf16.msra.mxu3 %v4944_v9  ;;  %v4865_v9 = vld [vmem:[#allocation8 + $0x290] sm:$0xf0]  ;;  %v4740_v58 = vor.u32 %v5229_v6, %v4737_v8  ;;  %v5181_v39 = vld [vmem:[#allocation8 + $0x4] sm:$0xf]  ;;  %v4692_v6 = vor.u32 %v5217_v55, %v4689_v30  ;;  %v5236_v55 = vld [vmem:[#allocation8 + $0x1b4] sm:$0xf0] }
 0x139   :  { %2907 = vmatpush.bf16.msra.mxu0 %v4544_v1  ;;  %v2045_v47 = vpop.f32.mrf.mxu0  ;;  %v4868_v14 = vor.u32 %v5261_v43, %v4865_v9  ;;  %v5225_v1 = vld [vmem:[#allocation8 + $0x164] sm:$0xf]  ;;  %v4817_v63 = vld [vmem:[#allocation8 + $0x230] sm:$0xf0]  ;;  %v5015_v30 = vld [vmem:[#allocation8 + $0x3a8] sm:$0xf] }
 0x13a   :  { %2921 = vmatpush.bf16.msra.mxu1 %v4672_v20  ;;  %v2059_v13 = vpop.f32.mrf.mxu1  ;;  %v5257_v20 = vld [vmem:[#allocation8 + $0x264] sm:$0xf]  ;;  %v4545_v5 = vld [vmem:[#allocation8 + $0x10] sm:$0xf0] }
 0x13b   :  { %2935 = vmatpush.bf16.msra.mxu2 %v4800_v21  ;;  %v2060_v18 = vadd.f32 %v2059_v13, %v2045_v47  ;;  %v4849_v21 = vld [vmem:[#allocation8 + $0x270] sm:$0xf0]  ;;  %v5213_v8 = vld [vmem:[#allocation8 + $0x104] sm:$0xf] }
 0x13c   :  { %2949 = vmatpush.bf16.msra.mxu3 %v4928_v24  ;;  %2908 = vmatmul.bf16.vlgmr.msra.gmra.mxu0 %v5910_v36  ;;  %v5189_v24 = vld [vmem:[#allocation8 + $0x44] sm:$0xf]  ;;  %v4852_v26 = vor.u32 %v5257_v20, %v4849_v21  ;;  %v4673_v43 = vld [vmem:[#allocation8 + $0x110] sm:$0xf0] }
 0x13d   :  { %2956 = vmatpush.bf16.msrb.mxu0 %v4660_v25  ;;  %2922 = vmatmul.bf16.vlgmr.msra.gmra.mxu1 %v5914_v42  ;;  %v4724_v25 = vor.u32 %v5225_v1, %v4721_v19  ;;  %v4580_v45 = vor.u32 %v5189_v24, %v4577_v27  ;;  %v5245_v9 = vld [vmem:[#allocation8 + $0x204] sm:$0xf]  ;;  %v4801_v11 = vld [vmem:[#allocation8 + $0x210] sm:$0xf0]  ;;  %v4548_v1 = vor.u32 %v5181_v39, %v4545_v5  ;;  %v5276_v19 = vld [vmem:[#allocation8 + $0x2f4] sm:$0xf0] }
 0x13e   :  { %2970 = vmatpush.bf16.msrb.mxu1 %v4788_v29  ;;  %2936 = vmatmul.bf16.vlgmr.msra.gmra.mxu2 %v5912_v41  ;;  %v4705_v29 = vld [vmem:[#allocation8 + $0x150] sm:$0xf0]  ;;  %v5277_v47 = vld [vmem:[#allocation8 + $0x304] sm:$0xf]  ;;  %v4676_v21 = vor.u32 %v5213_v8, %v4673_v43  ;;  %v5200_v39 = vld [vmem:[#allocation8 + $0x94] sm:$0xf0] }
 0x13f   :  { %2984 = vmatpush.bf16.msrb.mxu2 %v4916_v31  ;;  %2950 = vmatmul.bf16.vlgmr.msra.gmra.mxu3 %v5916_v49  ;;  %v4980_v31 = vor.u32 %v5289_v22, %v4977_v23  ;;  %v4708_v48 = vor.u32 %v5221_v28, %v4705_v29  ;;  %v4804_v22 = vor.u32 %v5245_v9, %v4801_v11  ;;  %v5047_v23 = vld [vmem:[#allocation8 + $0x3e8] sm:$0xf]  ;;  %v5264_v43 = vld [vmem:[#allocation8 + $0x294] sm:$0xf0] }
 0x140   :  { %2998 = vmatpush.bf16.msrb.mxu3 %v5044_v35  ;;  %v5285_v35 = vld [vmem:[#allocation8 + $0x344] sm:$0xf]  ;;  %v4647_v29 = vld [vmem:[#allocation8 + $0xc8] sm:$0xf]  ;;  %v5296_v11 = vld [vmem:[#allocation8 + $0x394] sm:$0xf0] }
 0x141   :  { %2957 = vmatpush.bf16.msrb.mxu0 %v4644_v50  ;;  %v2073_v34 = vpop.f32.mrf.mxu2  ;;  %v2047_v50 = vpop.f32.mrf.mxu0  ;;  %v4964_v61 = vor.u32 %v5285_v35, %v4961_v37  ;;  %v4903_v35 = vld [vmem:[#allocation8 + $0x2c8] sm:$0xf]  ;;  %v5272_v37 = vld [vmem:[#allocation8 + $0x2d4] sm:$0xf0] }
 0x142   :  { %2971 = vmatpush.bf16.msrb.mxu1 %v4772_v51  ;;  %v2074_v38 = vadd.f32 %v2073_v34, %v2060_v18  ;;  %v2087_v40 = vpop.f32.mrf.mxu3  ;;  %v2061_v51 = vpop.f32.mrf.mxu1  ;;  %v5244_v18 = vld [vmem:[#allocation8 + $0x1f4] sm:$0xf0]  ;;  %v4743_v5 = vld [vmem:[#allocation8 + $0x188] sm:$0xf] }
 0x143   :  { %2985 = vmatpush.bf16.msrb.mxu2 %v4900_v52  ;;  %v4836_v52 = vor.u32 %v5253_v32, %v4833_v4  ;;  %v2062_v59 = vadd.f32 %v2061_v51, %v2047_v50  ;;  %v4792_v27 = vor.u32 %v5244_v18, %v4791_v15  ;;  %v4775_v32 = vld [vmem:[#allocation8 + $0x1c8] sm:$0xf]  ;;  %v5240_v34 = vld [vmem:[#allocation8 + $0x1d4] sm:$0xf0]  ;;  %v4904_v50 = vor.u32 %v5272_v37, %v4903_v35 }
 0x144   :  { %2999 = vmatpush.bf16.msrb.mxu3 %v5028_v56  ;;  %v5922_v56 = vadd.f32 %v2087_v40, %v2074_v38  ;;  %v5031_v38 = vld [vmem:[#allocation8 + $0x3c8] sm:$0xf]  ;;  %v5304_v40 = vld [vmem:[#allocation8 + $0x3d4] sm:$0xf0] }
 0x145   :  { %2958 = vmatpush.bf16.msrb.mxu0 %v4628_v0  ;;  %v5281_v0 = vld [vmem:[#allocation8 + $0x324] sm:$0xf]  ;;  %v4631_v51 = vld [vmem:[#allocation8 + $0xa8] sm:$0xf] }
 0x146   :  { %2972 = vmatpush.bf16.msrb.mxu1 %v4756_v2  ;;  %v4945_v2 = vld [vmem:[#allocation8 + $0x330] sm:$0xf0]  ;;  %v4871_v8 = vld [vmem:[#allocation8 + $0x288] sm:$0xf] }
 0x147   :  { %2986 = vmatpush.bf16.msrb.mxu2 %v4884_v3  ;;  %v4564_v3 = vor.u32 %v5185_v53, %v4561_v54  ;;  %v4948_v44 = vor.u32 %v5281_v0, %v4945_v2  ;;  %v4759_v53 = vld [vmem:[#allocation8 + $0x1a8] sm:$0xf]  ;;  %v5032_v54 = vor.u32 %v5304_v40, %v5031_v38 }
 0x148   :  { %3000 = vmatpush.bf16.msrb.mxu3 %v5012_v7  ;;  %v4820_v7 = vor.u32 %v5249_v62, %v4817_v63  ;;  %v5300_v62 = vld [vmem:[#allocation8 + $0x3b4] sm:$0xf0]  ;;  %v4760_v0 = vor.u32 %v5236_v55, %v4759_v53  ;;  %v4599_v15 = vld [vmem:[#allocation8 + $0x68] sm:$0xf] }
 0x149   :  { %2959 = vmatpush.bf16.msrb.mxu0 %v4612_v12  ;;  %v4929_v12 = vld [vmem:[#allocation8 + $0x310] sm:$0xf0]  ;;  %v2075_v13 = vpop.f32.mrf.mxu2  ;;  %v4967_v40 = vld [vmem:[#allocation8 + $0x348] sm:$0xf] }
 0x14a   :  { %2973 = vmatpush.bf16.msrb.mxu1 %v4740_v58  ;;  %v4663_v58 = vld [vmem:[#allocation8 + $0xe8] sm:$0xf]  ;;  %v2076_v16 = vadd.f32 %v2075_v13, %v2062_v59  ;;  %v2089_v20 = vpop.f32.mrf.mxu3 }
 0x14b   :  { %2987 = vmatpush.bf16.msrb.mxu2 %v4868_v14  ;;  %v5212_v14 = vld [vmem:[#allocation8 + $0xf4] sm:$0xf0]  ;;  %v4887_v59 = vld [vmem:[#allocation8 + $0x2a8] sm:$0xf] }
 0x14c   :  { %3001 = vmatpush.bf16.msrb.mxu3 %v4996_v10  ;;  %v4919_v10 = vld [vmem:[#allocation8 + $0x2e8] sm:$0xf]  ;;  %v5924_v24 = vadd.f32 %v2089_v20, %v2076_v16  ;;  %v5196_v16 = vld [vmem:[#allocation8 + $0x74] sm:$0xf0] }
 0x14d   :  { %2960 = vmatpush.bf16.msrb.mxu0 %v4596_v60  ;;  %v5308_v60 = vld [vmem:[#allocation8 + $0x3f4] sm:$0xf0]  ;;  %v4920_v28 = vor.u32 %v5276_v19, %v4919_v10  ;;  %v4855_v20 = vld [vmem:[#allocation8 + $0x268] sm:$0xf] }
 0x14e   :  { %2974 = vmatpush.bf16.msrb.mxu1 %v4724_v25  ;;  %v4932_v25 = vor.u32 %v5277_v47, %v4929_v12  ;;  %v5048_v4 = vor.u32 %v5308_v60, %v5047_v23  ;;  %v5228_v19 = vld [vmem:[#allocation8 + $0x174] sm:$0xf0]  ;;  %v4600_v60 = vor.u32 %v5196_v16, %v4599_v15  ;;  %v4567_v55 = vld [vmem:[#allocation8 + $0x28] sm:$0xf]  ;;  %v5210_v16 = vld [vmem:[#allocation8 + $0xec] sm:$0xf] }
 0x14f   :  { %2988 = vmatpush.bf16.msrb.mxu2 %v4852_v26  ;;  %v4664_v26 = vor.u32 %v5212_v14, %v4663_v58  ;;  %v4872_v14 = vor.u32 %v5264_v43, %v4871_v8  ;;  %v5292_v23 = vld [vmem:[#allocation8 + $0x374] sm:$0xf0]  ;;  %v4679_v43 = vld [vmem:[#allocation8 + $0x108] sm:$0xf] }
 0x150   :  { %3002 = vmatpush.bf16.msrb.mxu3 %v4980_v31  ;;  %v5208_v31 = vld [vmem:[#allocation8 + $0xd4] sm:$0xf0] }
 0x151   :  { %2961 = vmatpush.bf16.msrb.mxu0 %v4580_v45  ;;  %v4648_v45 = vor.u32 %v5208_v31, %v4647_v29 }
 0x152   :  { %2975 = vmatpush.bf16.msrb.mxu1 %v4708_v48  ;;  %v4776_v48 = vor.u32 %v5240_v34, %v4775_v32  ;;  %v5224_v32 = vld [vmem:[#allocation8 + $0x154] sm:$0xf0] }
 0x153   :  { %2989 = vmatpush.bf16.msrb.mxu2 %v4836_v52  ;;  %v5204_v52 = vld [vmem:[#allocation8 + $0xb4] sm:$0xf0] }
 0x154   :  { %3003 = vmatpush.bf16.msrb.mxu3 %v4964_v61  ;;  %v5268_v61 = vld [vmem:[#allocation8 + $0x2b4] sm:$0xf0]  ;;  %v4632_v63 = vor.u32 %v5204_v52, %v4631_v51 }
 0x155   :  { %2962 = vmatpush.bf16.msrb.mxu0 %v4564_v3  ;;  %v4888_v2 = vor.u32 %v5268_v61, %v4887_v59  ;;  %v4615_v3 = vld [vmem:[#allocation8 + $0x88] sm:$0xf]  ;;  %v5256_v34 = vld [vmem:[#allocation8 + $0x254] sm:$0xf0] }
 0x156   :  { %2976 = vmatpush.bf16.msrb.mxu1 %v4692_v6  ;;  %v5016_v6 = vor.u32 %v5300_v62, %v5015_v30  ;;  %v4616_v12 = vor.u32 %v5200_v39, %v4615_v3  ;;  %v5188_v59 = vld [vmem:[#allocation8 + $0x34] sm:$0xf0]  ;;  %v4695_v61 = vld [vmem:[#allocation8 + $0x128] sm:$0xf] }
 0x157   :  { %2990 = vmatpush.bf16.msrb.mxu2 %v4820_v7  ;;  %v5232_v7 = vld [vmem:[#allocation8 + $0x194] sm:$0xf0]  ;;  %v4951_v3 = vld [vmem:[#allocation8 + $0x328] sm:$0xf] }
 0x158   :  { %3004 = vmatpush.bf16.msrb.mxu3 %v4948_v44  ;;  %v4999_v44 = vld [vmem:[#allocation8 + $0x388] sm:$0xf]  ;;  %v4744_v58 = vor.u32 %v5232_v7, %v4743_v5  ;;  %v5284_v39 = vld [vmem:[#allocation8 + $0x334] sm:$0xf0] }
 0x159   :  { %2963 = vmatpush.bf16.msrb.mxu0 %v4548_v1  ;;  %v2101_v9 = vpop.f32.mrf.mxu0  ;;  %v4727_v1 = vld [vmem:[#allocation8 + $0x168] sm:$0xf]  ;;  %v5000_v18 = vor.u32 %v5296_v11, %v4999_v44  ;;  %v4952_v11 = vor.u32 %v5284_v39, %v4951_v3 }
 0x15a   :  { %2977 = vmatpush.bf16.msrb.mxu1 %v4676_v21  ;;  %v2102_v47 = vadd.f32 %v2101_v9, %v5922_v56  ;;  %v2115_v13 = vpop.f32.mrf.mxu1  ;;  %v5260_v21 = vld [vmem:[#allocation8 + $0x274] sm:$0xf0]  ;;  %v4728_v56 = vor.u32 %v5228_v19, %v4727_v1  ;;  %v4551_v5 = vld [vmem:[#allocation8 + $0x8] sm:$0xf]  ;;  %v4665_v1 = vld [vmem:[#allocation8 + $0xf8] sm:$0xf0] }
 0x15b   :  { %2991 = vmatpush.bf16.msrb.mxu2 %v4804_v22  ;;  %v4983_v22 = vld [vmem:[#allocation8 + $0x368] sm:$0xf]  ;;  %v5216_v9 = vld [vmem:[#allocation8 + $0x114] sm:$0xf0]  ;;  %v4793_v19 = vld [vmem:[#allocation8 + $0x1f8] sm:$0xf0] }
 0x15c   :  { %3005 = vmatpush.bf16.msrb.mxu3 %v4932_v25  ;;  %2964 = vmatmul.bf16.vlgmr.msrb.gmra.mxu0 %v5910_v36  ;;  %v2116_v10 = vadd.f32 %v2115_v13, %v2102_v47  ;;  %v4856_v25 = vor.u32 %v5260_v21, %v4855_v20  ;;  %v4984_v29 = vor.u32 %v5292_v23, %v4983_v22  ;;  %v4807_v44 = vld [vmem:[#allocation8 + $0x208] sm:$0xf]  ;;  %v5274_v20 = vld [vmem:[#allocation8 + $0x2ec] sm:$0xf]  ;;  %v4921_v21 = vld [vmem:[#allocation8 + $0x2f8] sm:$0xf0] }
 0x15d   :  { %3012 = vmatpush.bf16.msra.mxu0 %v4664_v26  ;;  %2978 = vmatmul.bf16.vlgmr.msrb.gmra.mxu1 %v5914_v42  ;;  %v4583_v26 = vld [vmem:[#allocation8 + $0x48] sm:$0xf]  ;;  %v4680_v23 = vor.u32 %v5216_v9, %v4679_v43  ;;  %v5262_v43 = vld [vmem:[#allocation8 + $0x28c] sm:$0xf]  ;;  %v4873_v9 = vld [vmem:[#allocation8 + $0x298] sm:$0xf0] }
 0x15e   :  { %3026 = vmatpush.bf16.msra.mxu1 %v4792_v27  ;;  %2992 = vmatmul.bf16.vlgmr.msrb.gmra.mxu2 %v5912_v41  ;;  %v5192_v27 = vld [vmem:[#allocation8 + $0x54] sm:$0xf0]  ;;  %v4935_v13 = vld [vmem:[#allocation8 + $0x308] sm:$0xf] }
 0x15f   :  { %3040 = vmatpush.bf16.msra.mxu2 %v4920_v28  ;;  %3006 = vmatmul.bf16.vlgmr.msrb.gmra.mxu3 %v5916_v49  ;;  %v4711_v28 = vld [vmem:[#allocation8 + $0x148] sm:$0xf] }
 0x160   :  { %3054 = vmatpush.bf16.msra.mxu3 %v5048_v4  ;;  %v4839_v4 = vld [vmem:[#allocation8 + $0x248] sm:$0xf]  ;;  %v4712_v53 = vor.u32 %v5224_v32, %v4711_v28  ;;  %v4649_v32 = vld [vmem:[#allocation8 + $0xd8] sm:$0xf0] }
 0x161   :  { %3013 = vmatpush.bf16.msra.mxu0 %v4648_v45  ;;  %v2129_v31 = vpop.f32.mrf.mxu2  ;;  %v2103_v37 = vpop.f32.mrf.mxu0  ;;  %v5288_v45 = vld [vmem:[#allocation8 + $0x354] sm:$0xf0] }
 0x162   :  { %3027 = vmatpush.bf16.msra.mxu1 %v4776_v48  ;;  %v2130_v35 = vadd.f32 %v2129_v31, %v2116_v10  ;;  %v2143_v38 = vpop.f32.mrf.mxu3  ;;  %v2104_v48 = vadd.f32 %v2103_v37, %v5924_v24  ;;  %v2117_v51 = vpop.f32.mrf.mxu1  ;;  %v4968_v30 = vor.u32 %v5288_v45, %v4967_v40  ;;  %v4568_v24 = vor.u32 %v5188_v59, %v4567_v55  ;;  %v5206_v31 = vld [vmem:[#allocation8 + $0xcc] sm:$0xf]  ;;  %v5033_v45 = vld [vmem:[#allocation8 + $0x3d8] sm:$0xf0] }
 0x163   :  { %3041 = vmatpush.bf16.msra.mxu2 %v4904_v50  ;;  %v4584_v50 = vor.u32 %v5192_v27, %v4583_v26  ;;  %v4668_v27 = vor.u32 %v5210_v16, %v4665_v1  ;;  %v5270_v37 = vld [vmem:[#allocation8 + $0x2cc] sm:$0xf]  ;;  %v4601_v16 = vld [vmem:[#allocation8 + $0x78] sm:$0xf0] }
 0x164   :  { %3055 = vmatpush.bf16.msra.mxu3 %v5032_v54  ;;  %v5932_v52 = vadd.f32 %v2143_v38, %v2130_v35  ;;  %v4840_v54 = vor.u32 %v5256_v34, %v4839_v4  ;;  %v2118_v62 = vadd.f32 %v2117_v51, %v2104_v48  ;;  %v5238_v4 = vld [vmem:[#allocation8 + $0x1cc] sm:$0xf]  ;;  %v4777_v35 = vld [vmem:[#allocation8 + $0x1d8] sm:$0xf0]  ;;  %v4652_v48 = vor.u32 %v5206_v31, %v4649_v32 }
 0x165   :  { %3014 = vmatpush.bf16.msra.mxu0 %v4632_v63  ;;  %v5220_v63 = vld [vmem:[#allocation8 + $0x134] sm:$0xf0]  ;;  %v4905_v38 = vld [vmem:[#allocation8 + $0x2d8] sm:$0xf0]  ;;  %v5302_v40 = vld [vmem:[#allocation8 + $0x3cc] sm:$0xf] }
 0x166   :  { %3028 = vmatpush.bf16.msra.mxu1 %v4760_v0  ;;  %v4823_v0 = vld [vmem:[#allocation8 + $0x228] sm:$0xf]  ;;  %v4696_v7 = vor.u32 %v5220_v63, %v4695_v61  ;;  %v4908_v51 = vor.u32 %v5270_v37, %v4905_v38  ;;  %v5234_v55 = vld [vmem:[#allocation8 + $0x1ac] sm:$0xf]  ;;  %v5036_v59 = vor.u32 %v5302_v40, %v5033_v45  ;;  %v4761_v61 = vld [vmem:[#allocation8 + $0x1b8] sm:$0xf0] }
 0x167   :  { %3042 = vmatpush.bf16.msra.mxu2 %v4888_v2  ;;  %v5252_v2 = vld [vmem:[#allocation8 + $0x234] sm:$0xf0]  ;;  %v5298_v63 = vld [vmem:[#allocation8 + $0x3ac] sm:$0xf]  ;;  %v4764_v3 = vor.u32 %v5234_v55, %v4761_v61  ;;  %v4713_v31 = vld [vmem:[#allocation8 + $0x158] sm:$0xf0] }
 0x168   :  { %3056 = vmatpush.bf16.msra.mxu3 %v5016_v6  ;;  %v5184_v6 = vld [vmem:[#allocation8 + $0x14] sm:$0xf0]  ;;  %v4824_v8 = vor.u32 %v5252_v2, %v4823_v0  ;;  %v5017_v0 = vld [vmem:[#allocation8 + $0x3b8] sm:$0xf0]  ;;  %v5226_v1 = vld [vmem:[#allocation8 + $0x16c] sm:$0xf] }
 0x169   :  { %3015 = vmatpush.bf16.msra.mxu0 %v4616_v12  ;;  %v2131_v47 = vpop.f32.mrf.mxu2  ;;  %v5248_v12 = vld [vmem:[#allocation8 + $0x214] sm:$0xf0]  ;;  %v4552_v10 = vor.u32 %v5184_v6, %v4551_v5  ;;  %v4617_v5 = vld [vmem:[#allocation8 + $0x98] sm:$0xf0]  ;;  %v5230_v6 = vld [vmem:[#allocation8 + $0x18c] sm:$0xf] }
 0x16a   :  { %3029 = vmatpush.bf16.msra.mxu1 %v4744_v58  ;;  %v5280_v58 = vld [vmem:[#allocation8 + $0x314] sm:$0xf0]  ;;  %v2145_v15 = vpop.f32.mrf.mxu3  ;;  %v5286_v37 = vld [vmem:[#allocation8 + $0x34c] sm:$0xf]  ;;  %v4969_v38 = vld [vmem:[#allocation8 + $0x358] sm:$0xf0] }
 0x16b   :  { %3043 = vmatpush.bf16.msra.mxu2 %v4872_v14  ;;  %v2132_v14 = vadd.f32 %v2131_v47, %v2118_v62  ;;  %v4936_v26 = vor.u32 %v5280_v58, %v4935_v13  ;;  %v4889_v62 = vld [vmem:[#allocation8 + $0x2b8] sm:$0xf0]  ;;  %v5186_v55 = vld [vmem:[#allocation8 + $0x2c] sm:$0xf] }
 0x16c   :  { %3057 = vmatpush.bf16.msra.mxu3 %v5000_v18  ;;  %v5242_v18 = vld [vmem:[#allocation8 + $0x1ec] sm:$0xf] }
 0x16d   :  { %3016 = vmatpush.bf16.msra.mxu0 %v4600_v60  ;;  %v5934_v22 = vadd.f32 %v2145_v15, %v2132_v14  ;;  %v4808_v60 = vor.u32 %v5248_v12, %v4807_v44  ;;  %v4796_v28 = vor.u32 %v5242_v18, %v4793_v19  ;;  %v5294_v44 = vld [vmem:[#allocation8 + $0x38c] sm:$0xf]  ;;  %v4876_v14 = vor.u32 %v5262_v43, %v4873_v9  ;;  %v4729_v19 = vld [vmem:[#allocation8 + $0x178] sm:$0xf0] }
 0x16e   :  { %3030 = vmatpush.bf16.msra.mxu1 %v4728_v56  ;;  %v5306_v56 = vld [vmem:[#allocation8 + $0x3ec] sm:$0xf]  ;;  %v4553_v43 = vld [vmem:[#allocation8 + $0x18] sm:$0xf0] }
 0x16f   :  { %3044 = vmatpush.bf16.msra.mxu2 %v4856_v25  ;;  %v5049_v25 = vld [vmem:[#allocation8 + $0x3f8] sm:$0xf0]  ;;  %v5194_v15 = vld [vmem:[#allocation8 + $0x6c] sm:$0xf] }
 0x170   :  { %3058 = vmatpush.bf16.msra.mxu3 %v4984_v29  ;;  %v4924_v29 = vor.u32 %v5274_v20, %v4921_v21  ;;  %v5052_v34 = vor.u32 %v5306_v56, %v5049_v25  ;;  %v5258_v20 = vld [vmem:[#allocation8 + $0x26c] sm:$0xf]  ;;  %v4857_v21 = vld [vmem:[#allocation8 + $0x278] sm:$0xf0]  ;;  %v4604_v56 = vor.u32 %v5194_v15, %v4601_v16 }
 0x171   :  { %3017 = vmatpush.bf16.msra.mxu0 %v4584_v50  ;;  %v4780_v50 = vor.u32 %v5238_v4, %v4777_v35  ;;  %v5190_v25 = vld [vmem:[#allocation8 + $0x4c] sm:$0xf] }
 0x172   :  { %3031 = vmatpush.bf16.msra.mxu1 %v4712_v53  ;;  %v5202_v53 = vld [vmem:[#allocation8 + $0xac] sm:$0xf] }
 0x173   :  { %3045 = vmatpush.bf16.msra.mxu2 %v4840_v54  ;;  %v4633_v54 = vld [vmem:[#allocation8 + $0xb8] sm:$0xf0]  ;;  %v5254_v4 = vld [vmem:[#allocation8 + $0x24c] sm:$0xf] }
 0x174   :  { %3059 = vmatpush.bf16.msra.mxu3 %v4968_v30  ;;  %v5266_v30 = vld [vmem:[#allocation8 + $0x2ac] sm:$0xf]  ;;  %v4636_v2 = vor.u32 %v5202_v53, %v4633_v54 }
 0x175   :  { %3018 = vmatpush.bf16.msra.mxu0 %v4568_v24  ;;  %v4892_v39 = vor.u32 %v5266_v30, %v4889_v62  ;;  %v5198_v24 = vld [vmem:[#allocation8 + $0x8c] sm:$0xf] }
 0x176   :  { %3032 = vmatpush.bf16.msra.mxu1 %v4696_v7  ;;  %v5020_v7 = vor.u32 %v5298_v63, %v5017_v0  ;;  %v4620_v12 = vor.u32 %v5198_v24, %v4617_v5  ;;  %v5218_v61 = vld [vmem:[#allocation8 + $0x12c] sm:$0xf]  ;;  %v4972_v63 = vor.u32 %v5286_v37, %v4969_v38  ;;  %v4697_v0 = vld [vmem:[#allocation8 + $0x138] sm:$0xf0] }
 0x177   :  { %3046 = vmatpush.bf16.msra.mxu2 %v4824_v8  ;;  %v4745_v8 = vld [vmem:[#allocation8 + $0x198] sm:$0xf0]  ;;  %v5214_v9 = vld [vmem:[#allocation8 + $0x10c] sm:$0xf] }
 0x178   :  { %3060 = vmatpush.bf16.msra.mxu3 %v4952_v11  ;;  %v5001_v11 = vld [vmem:[#allocation8 + $0x398] sm:$0xf0]  ;;  %v4748_v58 = vor.u32 %v5230_v6, %v4745_v8  ;;  %v4700_v6 = vor.u32 %v5218_v61, %v4697_v0  ;;  %v5182_v8 = vld [vmem:[#allocation8 + $0xc] sm:$0xf] }
 0x179   :  { %3019 = vmatpush.bf16.msra.mxu0 %v4552_v10  ;;  %v2157_v47 = vpop.f32.mrf.mxu0  ;;  %v5004_v10 = vor.u32 %v5294_v44, %v5001_v11  ;;  %v4953_v24 = vld [vmem:[#allocation8 + $0x338] sm:$0xf0]  ;;  %v4556_v16 = vor.u32 %v5182_v8, %v4553_v43 }
 0x17a   :  { %3033 = vmatpush.bf16.msra.mxu1 %v4680_v23  ;;  %v2171_v13 = vpop.f32.mrf.mxu1  ;;  %v5290_v23 = vld [vmem:[#allocation8 + $0x36c] sm:$0xf]  ;;  %v4681_v11 = vld [vmem:[#allocation8 + $0x118] sm:$0xf0] }
 0x17b   :  { %3047 = vmatpush.bf16.msra.mxu2 %v4808_v60  ;;  %v2172_v18 = vadd.f32 %v2171_v13, %v2157_v47  ;;  %v4985_v60 = vld [vmem:[#allocation8 + $0x378] sm:$0xf0]  ;;  %v5246_v47 = vld [vmem:[#allocation8 + $0x20c] sm:$0xf] }
 0x17c   :  { %3061 = vmatpush.bf16.msra.mxu3 %v4936_v26  ;;  %3020 = vmatmul.bf16.vlgmr.msra.gmra.mxu0 %v5910_v36  ;;  %v4732_v26 = vor.u32 %v5226_v1, %v4729_v19  ;;  %v4988_v32 = vor.u32 %v5290_v23, %v4985_v60  ;;  %v5571_v23 = vld [vmem:[#allocation11 + $0x30] sm:$0xff] }
 0x17d   :  { %3068 = vmatpush.bf16.msrb.mxu0 %v4668_v27  ;;  %3034 = vmatmul.bf16.vlgmr.msra.gmra.mxu1 %v5914_v42  ;;  %v4860_v27 = vor.u32 %v5258_v20, %v4857_v21  ;;  %v5572_v21 = vld [vmem:[#allocation11 + $0x38] sm:$0xff] }
 0x17e   :  { %3082 = vmatpush.bf16.msrb.mxu1 %v4796_v28  ;;  %3048 = vmatmul.bf16.vlgmr.msra.gmra.mxu2 %v5912_v41  ;;  %v4585_v28 = vld [vmem:[#allocation8 + $0x58] sm:$0xf0] }
 0x17f   :  { %3096 = vmatpush.bf16.msrb.mxu2 %v4924_v29  ;;  %3062 = vmatmul.bf16.vlgmr.msra.gmra.mxu3 %v5916_v49  ;;  %v5222_v29 = vld [vmem:[#allocation8 + $0x14c] sm:$0xf] }
 0x180   :  { %3110 = vmatpush.bf16.msrb.mxu3 %v5052_v34  ;;  %v4841_v34 = vld [vmem:[#allocation8 + $0x258] sm:$0xf0] }
 0x181   :  { %3069 = vmatpush.bf16.msrb.mxu0 %v4652_v48  ;;  %v2185_v35 = vpop.f32.mrf.mxu2  ;;  %v4588_v48 = vor.u32 %v5190_v25, %v4585_v28  ;;  %v4844_v54 = vor.u32 %v5254_v4, %v4841_v34  ;;  %v5569_v28 = vld [vmem:[#allocation11 + $0x20] sm:$0xff] }
 0x182   :  { %3083 = vmatpush.bf16.msrb.mxu1 %v4780_v50  ;;  %v2186_v40 = vadd.f32 %v2185_v35, %v2172_v18  ;;  %v2199_v45 = vpop.f32.mrf.mxu3  ;;  %v4716_v50 = vor.u32 %v5222_v29, %v4713_v31  ;;  %v2173_v53 = vpop.f32.mrf.mxu1  ;;  %v4684_v18 = vor.u32 %v5214_v9, %v4681_v11 }
 0x183   :  { %3097 = vmatpush.bf16.msrb.mxu2 %v4908_v51  ;;  %v2159_v51 = vpop.f32.mrf.mxu0 }
 0x184   :  { %3111 = vmatpush.bf16.msrb.mxu3 %v5036_v59  ;;  %v4569_v59 = vld [vmem:[#allocation8 + $0x38] sm:$0xf0]  ;;  %v2200_v30 = vadd.f32 %v2199_v45, %v2186_v40  ;;  %v2174_v62 = vadd.f32 %v2173_v53, %v2159_v51  ;;  %v5579_v53 = vld [vmem:[#allocation11 + $0x70] sm:$0xff] }
 0x185   :  { %3070 = vmatpush.bf16.msrb.mxu0 %v4636_v2  ;;  %v5250_v2 = vld [vmem:[#allocation8 + $0x22c] sm:$0xf]  ;;  %v4572_v5 = vor.u32 %v5186_v55, %v4569_v59  ;;  %v5580_v51 = vld [vmem:[#allocation11 + $0x78] sm:$0xff] }
 0x186   :  { %3084 = vmatpush.bf16.msrb.mxu1 %v4764_v3  ;;  %v4825_v3 = vld [vmem:[#allocation8 + $0x238] sm:$0xf0]  ;;  %v5578_v59 = vld [vmem:[#allocation11 + $0x68] sm:$0xff] }
 0x187   :  { %3098 = vmatpush.bf16.msrb.mxu2 %v4892_v39  ;;  %v5282_v39 = vld [vmem:[#allocation8 + $0x32c] sm:$0xf] }
 0x188   :  { %3112 = vmatpush.bf16.msrb.mxu3 %v5020_v7  ;;  %v4828_v7 = vor.u32 %v5250_v2, %v4825_v3  ;;  %v4956_v44 = vor.u32 %v5282_v39, %v4953_v24  ;;  %v5576_v3 = vld [vmem:[#allocation11 + $0x58] sm:$0xff] }
 0x189   :  { %3071 = vmatpush.bf16.msrb.mxu0 %v4620_v12  ;;  %v4809_v12 = vld [vmem:[#allocation8 + $0x218] sm:$0xf0]  ;;  %v2187_v13 = vpop.f32.mrf.mxu2 }
 0x18a   :  { %3085 = vmatpush.bf16.msrb.mxu1 %v4748_v58  ;;  %v5278_v58 = vld [vmem:[#allocation8 + $0x30c] sm:$0xf]  ;;  %v2188_v15 = vadd.f32 %v2187_v13, %v2174_v62  ;;  %v2201_v1 = vpop.f32.mrf.mxu3 }
 0x18b   :  { %3099 = vmatpush.bf16.msrb.mxu2 %v4876_v14  ;;  %v4937_v14 = vld [vmem:[#allocation8 + $0x318] sm:$0xf0] }
 0x18c   :  { %3113 = vmatpush.bf16.msrb.mxu3 %v5004_v10  ;;  %v4812_v10 = vor.u32 %v5246_v47, %v4809_v12  ;;  %v2202_v19 = vadd.f32 %v2201_v1, %v2188_v15  ;;  %v4940_v20 = vor.u32 %v5278_v58, %v4937_v14  ;;  %v5574_v47 = vld [vmem:[#allocation11 + $0x48] sm:$0xff]  ;;  %v5573_v58 = vld [vmem:[#allocation11 + $0x40] sm:$0xff] }
 0x18d   :  { %3072 = vmatpush.bf16.msrb.mxu0 %v4604_v56 }
 0x18e   :  { %3086 = vmatpush.bf16.msrb.mxu1 %v4732_v26  ;;  %v5570_v26 = vld [vmem:[#allocation11 + $0x28] sm:$0xff] }
 0x18f   :  { %3100 = vmatpush.bf16.msrb.mxu2 %v4860_v27 }
 0x190   :  { %3114 = vmatpush.bf16.msrb.mxu3 %v4988_v32 }
 0x191   :  { %3073 = vmatpush.bf16.msrb.mxu0 %v4588_v48  ;;  %v5566_v48 = vld [vmem:[#allocation11 + $0x8] sm:$0xff] }
 0x192   :  { %3087 = vmatpush.bf16.msrb.mxu1 %v4716_v50  ;;  %v5565_v50 = vld [vmem:[#allocation11] sm:$0xff] }
 0x193   :  { %3101 = vmatpush.bf16.msrb.mxu2 %v4844_v54 }
 0x194   :  { %3115 = vmatpush.bf16.msrb.mxu3 %v4972_v63 }
 0x195   :  { %3074 = vmatpush.bf16.msrb.mxu0 %v4572_v5  ;;  %v5953_v5 = vld [vmem:[%s5981_s4] sm:$0xf] }
 0x196   :  { %3088 = vmatpush.bf16.msrb.mxu1 %v4700_v6 }
 0x197   :  { %3102 = vmatpush.bf16.msrb.mxu2 %v4828_v7  ;;  %v5575_v7 = vld [vmem:[#allocation11 + $0x50] sm:$0xff] }
 0x198   :  { %3116 = vmatpush.bf16.msrb.mxu3 %v4956_v44 }
 0x199   :  { %3075 = vmatpush.bf16.msrb.mxu0 %v4556_v16  ;;  %v2213_v60 = vpop.f32.mrf.mxu0  ;;  %v5588_v16 = vld [vmem:[#allocation11 + $0xb8] sm:$0xff] }
 0x19a   :  { %3089 = vmatpush.bf16.msrb.mxu1 %v4684_v18  ;;  %v2214_v56 = vadd.f32 %v2213_v60, %v2200_v30  ;;  %v2227_v25 = vpop.f32.mrf.mxu1  ;;  %v5577_v30 = vld [vmem:[#allocation11 + $0x60] sm:$0xff]  ;;  %v5587_v18 = vld [vmem:[#allocation11 + $0xb0] sm:$0xff] }
 0x19b   :  { %3103 = vmatpush.bf16.msrb.mxu2 %v4812_v10 }
 0x19c   :  { %3117 = vmatpush.bf16.msrb.mxu3 %v4940_v20  ;;  %3076 = vmatmul.bf16.vlgmr.msrb.gmra.mxu0 %v5910_v36  ;;  %v2228_v27 = vadd.f32 %v2227_v25, %v2214_v56 }
 0x19d   :  { %3414 = vmatpush.bf16.msra.mxu0 %v5572_v21  ;;  %3090 = vmatmul.bf16.vlgmr.msrb.gmra.mxu1 %v5914_v42 }
 0x19e   :  { %3104 = vmatmul.bf16.vlgmr.msrb.gmra.mxu2 %v5912_v41  ;;  %v5568_v41 = vld [vmem:[#allocation11 + $0x18] sm:$0xff]  ;;  %3428 = vmatpush.bf16.msra.mxu1 %v5580_v51 }
 0x19f   :  { %3118 = vmatmul.bf16.vlgmr.msrb.gmra.mxu3 %v5916_v49  ;;  %v5567_v49 = vld [vmem:[#allocation11 + $0x10] sm:$0xff]  ;;  %3442 = vmatpush.bf16.msra.mxu2 %v5588_v16 }
 0x1a1   :  { %3415 = vmatpush.bf16.msra.mxu0 %v5571_v23  ;;  %v2241_v29 = vpop.f32.mrf.mxu2  ;;  %v2215_v32 = vpop.f32.mrf.mxu0  ;;  %v5585_v23 = vld [vmem:[#allocation11 + $0xa0] sm:$0xff] }
 0x1a2   :  { %v2242_v31 = vadd.f32 %v2241_v29, %v2228_v27  ;;  %v2255_v4 = vpop.f32.mrf.mxu3  ;;  %v2216_v36 = vadd.f32 %v2215_v32, %v2202_v19  ;;  %v2229_v34 = vpop.f32.mrf.mxu1  ;;  %3429 = vmatpush.bf16.msra.mxu1 %v5579_v53  ;;  %v5586_v19 = vld [vmem:[#allocation11 + $0xa8] sm:$0xff]  ;;  %v5584_v27 = vld [vmem:[#allocation11 + $0x98] sm:$0xff]  ;;  %v5583_v32 = vld [vmem:[#allocation11 + $0x90] sm:$0xff] }
 0x1a3   :  { %3443 = vmatpush.bf16.msra.mxu2 %v5587_v18 }
 0x1a4   :  { %v5944_v42 = vadd.f32 %v2255_v4, %v2242_v31  ;;  %v2230_v35 = vadd.f32 %v2229_v34, %v2216_v36  ;;  %v3127_v36 = vperm.slane %v5953_v5, 1 }
 0x1a5   :  { %3416 = vmatpush.bf16.msra.mxu0 %v5570_v26 }
 0x1a6   :  { %3430 = vmatpush.bf16.msra.mxu1 %v5578_v59 }
 0x1a7   :  { %3444 = vmatpush.bf16.msra.mxu2 %v5586_v19 }
 0x1a9   :  { %3417 = vmatpush.bf16.msra.mxu0 %v5569_v28  ;;  %v2243_v37 = vpop.f32.mrf.mxu2 }
 0x1aa   :  { %v2244_v38 = vadd.f32 %v2243_v37, %v2230_v35  ;;  %v2257_v40 = vpop.f32.mrf.mxu3  ;;  %3431 = vmatpush.bf16.msra.mxu1 %v5577_v30  ;;  %v5593_v30 = vld [vmem:[#allocation11 + $0xe0] sm:$0xff] }
 0x1ab   :  { %3445 = vmatpush.bf16.msra.mxu2 %v5585_v23 }
 0x1ac   :  { %v5946_v45 = vadd.f32 %v2257_v40, %v2244_v38 }
 0x1ad   :  { %3418 = vmatpush.bf16.msra.mxu0 %v5568_v41 }
 0x1ae   :  { %3432 = vmatpush.bf16.msra.mxu1 %v5576_v3 }
 0x1af   :  { %3446 = vmatpush.bf16.msra.mxu2 %v5584_v27 }
 0x1b1   :  { %3419 = vmatpush.bf16.msra.mxu0 %v5567_v49  ;;  %v5582_v49 = vld [vmem:[#allocation11 + $0x88] sm:$0xff] }
 0x1b2   :  { %3433 = vmatpush.bf16.msra.mxu1 %v5575_v7 }
 0x1b3   :  { %3447 = vmatpush.bf16.msra.mxu2 %v5583_v32 }
 0x1b5   :  { %3420 = vmatpush.bf16.msra.mxu0 %v5566_v48  ;;  %v5581_v48 = vld [vmem:[#allocation11 + $0x80] sm:$0xff] }
 0x1b6   :  { %3434 = vmatpush.bf16.msra.mxu1 %v5574_v47 }
 0x1b7   :  { %3448 = vmatpush.bf16.msra.mxu2 %v5582_v49 }
 0x1b9   :  { %3421 = vmatpush.bf16.msra.mxu0 %v5565_v50  ;;  %v2909_v54 = vpop.f32.mrf.mxu0  ;;  %v5596_v50 = vld [vmem:[#allocation11 + $0xf8] sm:$0xff] }
 0x1ba   :  { %v2923_v55 = vpop.f32.mrf.mxu1  ;;  %v2910_v61 = vadd.f32 %v2909_v54, %v5888_v57  ;;  %v3126_v57 = vperm.slane %v5953_v5, 0  ;;  %3435 = vmatpush.bf16.msra.mxu1 %v5573_v58  ;;  %3456 = vmatpush.bf16.msra.mxu3 %v5596_v50  ;;  %v5595_v54 = vld [vmem:[#allocation11 + $0xf0] sm:$0xff] }
 0x1bb   :  { %3449 = vmatpush.bf16.msra.mxu2 %v5581_v48 }
 0x1bc   :  { %v2924_v63 = vadd.f32 %v2923_v55, %v2910_v61  ;;  %v5594_v55 = vld [vmem:[#allocation11 + $0xe8] sm:$0xff] }
 0x1be   :  { %3457 = vmatpush.bf16.msra.mxu3 %v5595_v54 }
 0x1c1   :  { %v2937_v62 = vpop.f32.mrf.mxu2  ;;  %v2911_v0 = vpop.f32.mrf.mxu0 }
 0x1c2   :  { %v2951_v2 = vpop.f32.mrf.mxu3  ;;  %v2938_v39 = vadd.f32 %v2937_v62, %v2924_v63  ;;  %v2912_v24 = vadd.f32 %v2911_v0, %v5890_v33  ;;  %v2925_v6 = vpop.f32.mrf.mxu1  ;;  %3458 = vmatpush.bf16.msra.mxu3 %v5594_v55  ;;  %v5592_v0 = vld [vmem:[#allocation11 + $0xd8] sm:$0xff] }
 0x1c4   :  { %v2952_v8 = vadd.f32 %v2951_v2, %v2938_v39  ;;  %v2926_v43 = vadd.f32 %v2925_v6, %v2912_v24 }
 0x1c6   :  { %v3134_v12 = vadd.f32 %v3126_v57, %v2952_v8  ;;  %3459 = vmatpush.bf16.msra.mxu3 %v5593_v30  ;;  %v5591_v8 = vld [vmem:[#allocation11 + $0xd0] sm:$0xff] }
 0x1c8   :  { %v3142_v14 = vmax.f32 %v3134_v12, 0.0 }
 0x1c9   :  { %v2939_v9 = vpop.f32.mrf.mxu2 }
 0x1ca   :  { %v2940_v44 = vadd.f32 %v2939_v9, %v2926_v43  ;;  %v2953_v11 = vpop.f32.mrf.mxu3  ;;  %3460 = vmatpush.bf16.msra.mxu3 %v5592_v0  ;;  %v3128_v43 = vperm.slane %v5953_v5, 2 }
 0x1cc   :  { %v2954_v13 = vadd.f32 %v2953_v11, %v2940_v44  ;;  %v5590_v11 = vld [vmem:[#allocation11 + $0xc8] sm:$0xff] }
 0x1ce   :  { %v3138_v33 = vadd.f32 %v3126_v57, %v2954_v13  ;;  %3461 = vmatpush.bf16.msra.mxu3 %v5591_v8 }
 0x1d0   :  { %v3146_v15 = vmax.f32 %v3138_v33, 0.0  ;;  %v5589_v33 = vld [vmem:[#allocation11 + $0xc0] sm:$0xff] }
 0x1d2   :  { %v3150_v1 = vpack.c.bf16 %v3146_v15, %v3142_v14  ;;  %3462 = vmatpush.bf16.msra.mxu3 %v5590_v11 }
 0x1d4   :  { %3422 = vmatmul.bf16.vlgmr.msra.gmra.mxu0 %v3150_v1 }
 0x1d6   :  { %3463 = vmatpush.bf16.msra.mxu3 %v5589_v33 }
 0x1d9   :  { %v2965_v10 = vpop.f32.mrf.mxu0 }
 0x1da   :  { %v2979_v20 = vpop.f32.mrf.mxu1  ;;  %v2966_v21 = vadd.f32 %v2965_v10, %v5906_v46 }
 0x1dc   :  { %v2980_v56 = vadd.f32 %v2979_v20, %v2966_v21 }
 0x1e1   :  { %v2993_v60 = vpop.f32.mrf.mxu2  ;;  %v2967_v25 = vpop.f32.mrf.mxu0 }
 0x1e2   :  { %v3007_v26 = vpop.f32.mrf.mxu3  ;;  %v2994_v28 = vadd.f32 %v2993_v60, %v2980_v56  ;;  %v2968_v29 = vadd.f32 %v2967_v25, %v5908_v17  ;;  %v2981_v31 = vpop.f32.mrf.mxu1 }
 0x1e4   :  { %v3008_v4 = vadd.f32 %v3007_v26, %v2994_v28  ;;  %v2982_v34 = vadd.f32 %v2981_v31, %v2968_v29  ;;  %v3129_v26 = vperm.slane %v5953_v5, 3 }
 0x1e6   :  { %v3135_v37 = vadd.f32 %v3127_v36, %v3008_v4 }
 0x1e8   :  { %v3143_v51 = vmax.f32 %v3135_v37, 0.0 }
 0x1e9   :  { %v2995_v41 = vpop.f32.mrf.mxu2 }
 0x1ea   :  { %v2996_v46 = vadd.f32 %v2995_v41, %v2982_v34  ;;  %v3009_v35 = vpop.f32.mrf.mxu3 }
 0x1ec   :  { %v3010_v38 = vadd.f32 %v3009_v35, %v2996_v46 }
 0x1ee   :  { %v3139_v40 = vadd.f32 %v3127_v36, %v3010_v38 }
 0x1f0   :  { %v3147_v17 = vmax.f32 %v3139_v40, 0.0 }
 0x1f2   :  { %v3151_v53 = vpack.c.bf16 %v3147_v17, %v3143_v51  ;;  %v5611_v51 = vld [vmem:[%s5984_s7] ss:$0 sm:$0xff]  ;;  %s5776_s7 = smov [#allocation12]  }
 0x1f3   :  { %s3503_s21 = sshll.u32 %s5776_s7, 4  ;;  %s3504_s21 = int_to_ptr.vmem [resolvable:$true] %s3503_s21 }
 0x1f4   :  { %3436 = vmatmul.bf16.vlgmr.msra.gmra.mxu1 %v3151_v53 }
 0x1f9   :  { %v3021_v59 = vpop.f32.mrf.mxu0 }
 0x1fa   :  { %v3035_v61 = vpop.f32.mrf.mxu1  ;;  %v3022_v62 = vadd.f32 %v3021_v59, %v5932_v52 }
 0x1fc   :  { %v3036_v2 = vadd.f32 %v3035_v61, %v3022_v62 }
 0x201   :  { %v3049_v63 = vpop.f32.mrf.mxu2  ;;  %v3023_v3 = vpop.f32.mrf.mxu0 }
 0x202   :  { %v3063_v39 = vpop.f32.mrf.mxu3  ;;  %v3050_v24 = vadd.f32 %v3049_v63, %v3036_v2  ;;  %v3024_v6 = vadd.f32 %v3023_v3, %v5934_v22  ;;  %v3037_v7 = vpop.f32.mrf.mxu1 }
 0x204   :  { %v3064_v57 = vadd.f32 %v3063_v39, %v3050_v24  ;;  %v3038_v9 = vadd.f32 %v3037_v7, %v3024_v6  ;;  %v3488_v39 = vlaneseq  ;;  %v3483_v24 = vstv %s5985_s8 }
 0x206   :  { %v3136_v12 = vadd.f32 %v3128_v43, %v3064_v57  ;;  %v3489_v6 = vand.u32 127, %v3488_v39 }
 0x208   :  { %v3144_v14 = vmax.f32 %v3136_v12, 0.0  ;;  %v3491_v8 = vadd.s32 4294967288, %v3489_v6 }
 0x209   :  { %v3051_v44 = vpop.f32.mrf.mxu2 }
 0x20a   :  { %v3052_v52 = vadd.f32 %v3051_v44, %v3038_v9  ;;  %v3065_v47 = vpop.f32.mrf.mxu3 }
 0x20c   :  { %v3066_v13 = vadd.f32 %v3065_v47, %v3052_v52 }
 0x20e   :  { %v3140_v58 = vadd.f32 %v3128_v43, %v3066_v13 }
 0x210   :  { %v3148_v15 = vmax.f32 %v3140_v58, 0.0 }
 0x212   :  { %v3152_v22 = vpack.c.bf16 %v3148_v15, %v3144_v14 }
 0x214   :  { %3450 = vmatmul.bf16.vlgmr.msra.gmra.mxu2 %v3152_v22 }
 0x219   :  { %v3077_v16 = vpop.f32.mrf.mxu0 }
 0x21a   :  { %v3091_v1 = vpop.f32.mrf.mxu1  ;;  %v3078_v18 = vadd.f32 %v3077_v16, %v5944_v42 }
 0x21c   :  { %v3092_v19 = vadd.f32 %v3091_v1, %v3078_v18 }
 0x221   :  { %v3105_v10 = vpop.f32.mrf.mxu2  ;;  %v3079_v21 = vpop.f32.mrf.mxu0 }
 0x222   :  { %v3119_v20 = vpop.f32.mrf.mxu3  ;;  %v3106_v23 = vadd.f32 %v3105_v10, %v3092_v19  ;;  %v3080_v60 = vadd.f32 %v3079_v21, %v5946_v45  ;;  %v3093_v56 = vpop.f32.mrf.mxu1  ;;  %v5610_v45 = vld [vmem:[%s5983_s6] ss:$0 sm:$0xff] }
 0x224   :  { %v3120_v25 = vadd.f32 %v3119_v20, %v3106_v23  ;;  %v3094_v27 = vadd.f32 %v3093_v56, %v3080_v60 }
 0x226   :  { %v3137_v32 = vadd.f32 %v3129_v26, %v3120_v25 }
 0x228   :  { %v3145_v34 = vmax.f32 %v3137_v32, 0.0 }
 0x229   :  { %v3107_v28 = vpop.f32.mrf.mxu2 }
 0x22a   :  { %v3108_v29 = vadd.f32 %v3107_v28, %v3094_v27  ;;  %v3121_v31 = vpop.f32.mrf.mxu3 }
 0x22c   :  { %v3122_v4 = vadd.f32 %v3121_v31, %v3108_v29 }
 0x22e   :  { %v3141_v36 = vadd.f32 %v3129_v26, %v3122_v4 }
 0x230   :  { %v3149_v42 = vmax.f32 %v3141_v36, 0.0 }
 0x232   :  { %v3153_v41 = vpack.c.bf16 %v3149_v42, %v3145_v34 }
 0x234   :  { %3464 = vmatmul.bf16.vlgmr.msra.gmra.mxu3 %v3153_v41 }
 0x251   :  { %v3423_v46 = vpop.f32.mrf.mxu0 }
 0x252   :  { %v3424_v37 = vadd.f32 %v5610_v45, %v3423_v46 }
 0x259   :  { %v3425_v40 = vpop.f32.mrf.mxu0 }
 0x25a   :  { %v3426_v53 = vadd.f32 %v5610_v45, %v3425_v40 }
 0x271   :  { %v3437_v35 = vpop.f32.mrf.mxu1 }
 0x272   :  { %v3438_v5 = vadd.f32 %v3437_v35, %v3424_v37 }
 0x279   :  { %v3439_v17 = vpop.f32.mrf.mxu1 }
 0x27a   :  { %v3440_v59 = vadd.f32 %v3439_v17, %v3426_v53 }
 0x297   :  { %v3451_v49 = vpop.f32.mrf.mxu2 }
 0x298   :  { %v3452_v38 = vadd.f32 %v3451_v49, %v3438_v5 }
 0x29f   :  { %v3453_v55 = vpop.f32.mrf.mxu2 }
 0x2a0   :  { %v3454_v30 = vadd.f32 %v3453_v55, %v3440_v59 }
 0x2b7   :  { %v3465_v48 = vpop.f32.mrf.mxu3 }
 0x2b8   :  { %v3466_v50 = vadd.f32 %v3465_v48, %v3452_v38 }
 0x2ba   :  { %v3470_v54 = vmax.f32 %v3466_v50, 0.0 }
 0x2bc   :  { %v3476_v61 = vmul.f32 %v5611_v51, %v3470_v54 }
 0x2be   :  { %3478 = vadd.xlane.f32.xlu0 %v3476_v61 }
 0x2bf   :  { %v3467_v62 = vpop.f32.mrf.mxu3 }
 0x2c0   :  { %v3468_v63 = vadd.f32 %v3467_v62, %v3454_v30 }
 0x2c2   :  { %v3471_v0 = vmax.f32 %v3468_v63, 0.0 }
 0x2c4   :  { %v3477_v2 = vmul.f32 %v5611_v51, %v3471_v0 }
 0x2c6   :  { %3480 = vadd.xlane.f32.xlu0 %v3477_v2 }
 0x331   :  { %v3479_v3 = vpop.xlane.xlu0 %3478 }
 0x332   :  { %v3484_v7 = vadd.f32 %v3483_v24, %v3479_v3 }
 0x334   :  { %v3490_v9 = vperm.slane %v3484_v7, %v3489_v6 }
 0x339   :  { %v3481_v57 = vpop.xlane.xlu0 %3480 }
 0x33a   :  { %v3485_v43 = vadd.f32 %v3483_v24, %v3481_v57 }
 0x33c   :  { %v3492_v44 = vperm.slane %v3485_v43, %v3491_v8 }
 0x33e   :  { %v3494_v11 = vsel %vm3493_vm0, %v3492_v44, %v3490_v9 }
 0x33f   :  { %3497 = vst.msk [vmem:[#allocation12] sm:$0x1] %vm3496_vm1, %v3494_v11 }
 0x340   :  { %3508 = dma.vmem_to_hbm [thread:$0]  %s3504_s21, 16, %s3506_s23, [#allocation5]  }
 0x341   :  { %5762 = dma.done.wait [#allocation5], 16  }
 0x342   :  { %5763 = vsyncadd [#allocation5], 4294967280 }
 0x343   :  { %3513 = vsyncpa [#allocation4], 1 }
 0x344   :  { %3514 = vsyncpa [#allocation7], 1 }
 0x345   :  { %3515 = vsyncpa [#allocation10], 1 }
 0x346   :  { %3516 = vsyncpa [#allocation5], 1 }

</bundles_post_ra>
